<compile_context>
chip_gen: v7x
topology: tpu7x:2x2x1
jax: 0.10.0
libtpu: 0.0.40
codegen_flags: <defaults>
</compile_context>

<pallas_src>
import jax
import jax.numpy as jnp
from jax.experimental import pallas as pl
from jax.experimental.pallas import tpu as pltpu

# ----- module hyper-parameters (SubwordLSTM defaults) -----
NUM_CHARS = 38
EMB = 128          # embedding_dim == hidden_dim
LABELS = 2
N_LAYERS = 2
LANES = 128        # lane-dense output width

# ----- example sizes -----
BATCH = 2
SEQ = 24           # char sequence length; MaxPool1d(3) -> T = 8 LSTM steps


# =====================================================================
# Fused kernel: gather -> conv+relu+pool -> 2-layer LSTM -> linear
# =====================================================================
def subword_lstm_kernel(ids_ref,                       # (B*(L+2), 1) int32 (padded ids)
                        emb_ref,                       # (NUM_CHARS+1, E) bf16, last row = 0
                        wconv_ref, bconv_ref,          # (3E, E) bf16, (1, E) f32
                        wih0_ref, whh0_ref, b0_ref,    # (E, 4E) bf16 x2, (1, 4E) f32
                        wih1_ref, whh1_ref, b1_ref,
                        wl_ref, bl_ref,                # (E, LANES) bf16, (1, LANES) f32
                        o_ref):                        # (B, LANES) f32
    E = EMB
    n_rows = ids_ref.shape[0]          # B * (L + 2)
    B = o_ref.shape[0]
    Lp2 = n_rows // B
    L = Lp2 - 2
    T = L // 3
    V = emb_ref.shape[0]               # NUM_CHARS + 1

    # ---- embedding gather as a one-hot matmul (MXU); pad rows hit the zero row ----
    ids = ids_ref[...]                                                     # (B*Lp2, 1)
    iota = jax.lax.broadcasted_iota(jnp.int32, (n_rows, V), 1)
    onehot = jnp.where(ids == iota, 1.0, 0.0).astype(jnp.bfloat16)         # (B*Lp2, V)
    xpad = jnp.dot(onehot, emb_ref[...],
                   preferred_element_type=jnp.float32).reshape(B, Lp2, E)  # (B, L+2, E)

    # ---- Conv1d(E, E, 3, padding=1) as one im2col matmul + bias + ReLU ----
    im2col = jnp.concatenate(
        [xpad[:, 0:L, :], xpad[:, 1:L + 1, :], xpad[:, 2:L + 2, :]], axis=2)
    im2col = im2col.reshape(B * L, 3 * E).astype(jnp.bfloat16)             # (B*L, 3E)
    y = jnp.dot(im2col, wconv_ref[...], preferred_element_type=jnp.float32)
    y = jnp.maximum(y + bconv_ref[...], 0.0)                               # (B*L, E) f32

    # ---- MaxPool1d(3): non-overlapping windows of 3 along the sequence ----
    # Built t-major so both LSTM layers can index gates by the leading axis.
    y3 = y.reshape(B, L, E)
    pooled = []
    for p in range(T):
        w = jnp.maximum(jnp.maximum(y3[:, 3 * p, :], y3[:, 3 * p + 1, :]),
                        y3[:, 3 * p + 2, :])
        pooled.append(w)                                                   # (B, E)
    xc = jnp.concatenate(pooled, axis=0)                                   # (T*B, E) t-major

    # TODO(synk): Dropout(0.2) (post-conv) and LSTM inter-layer dropout are identity here.

    # ---- 2-layer LSTM with hoisted input projections; gate layout [i | f | o | g] ----
    def recurrence(gates_all, whh_ref):
        # gates_all: (T, B, 4E) f32 = x_t @ W_ih + b  (bias already folded in)
        whh = whh_ref[...]
        h = jnp.zeros((B, E), jnp.float32)
        c = jnp.zeros((B, E), jnp.float32)
        hs = []
        for t in range(T):                                   # T is small & static
            g_all = gates_all[t] + jnp.dot(h.astype(jnp.bfloat16), whh,
                                           preferred_element_type=jnp.float32)
            ifo = jax.nn.sigmoid(g_all[:, :3 * E])           # one sigmoid over i,f,o
            g = jnp.tanh(g_all[:, 3 * E:])                   # one tanh over g
            c = ifo[:, E:2 * E] * c + ifo[:, 0:E] * g
            h = ifo[:, 2 * E:3 * E] * jnp.tanh(c)
            hs.append(h)
        return h, hs

    # layer 0: one batched input projection over all T timesteps
    gin0 = (jnp.dot(xc.astype(jnp.bfloat16), wih0_ref[...],
                    preferred_element_type=jnp.float32)
            + b0_ref[...]).reshape(T, B, 4 * E)
    _, h0s = recurrence(gin0, whh0_ref)

    # layer 1: batched input projection over the layer-0 hidden states
    h0_all = jnp.concatenate(h0s, axis=0)                                  # (T*B, E) t-major
    gin1 = (jnp.dot(h0_all.astype(jnp.bfloat16), wih1_ref[...],
                    preferred_element_type=jnp.float32)
            + b1_ref[...]).reshape(T, B, 4 * E)
    h1, _ = recurrence(gin1, whh1_ref)

    # ---- Linear on the last timestep (lane-dense, padded to 128 output lanes) ----
    o_ref[...] = (jnp.dot(h1.astype(jnp.bfloat16), wl_ref[...],
                          preferred_element_type=jnp.float32) + bl_ref[...])


def subword_lstm_forward(x_ids, params):
    B, L = x_ids.shape
    assert L % 3 == 0, "MaxPool1d(3) path assumes L divisible by 3"
    # Pad the id sequence with the dedicated zero-embedding row so conv padding=1
    # falls out of the in-kernel gather (tiny int ops; activations never leave VMEM).
    ids_pad = jnp.pad(x_ids.astype(jnp.int32), ((0, 0), (1, 1)),
                      constant_values=NUM_CHARS)
    ids_col = ids_pad.reshape(B * (L + 2), 1)

    out = pl.pallas_call(
        subword_lstm_kernel,
        out_shape=jax.ShapeDtypeStruct((B, LANES), jnp.float32),
        in_specs=[pl.BlockSpec(memory_space=pltpu.MemorySpace.VMEM)] * 12,
        out_specs=pl.BlockSpec(memory_space=pltpu.MemorySpace.VMEM),
    )(ids_col, params["emb"],
      params["wconv"], params["bconv"],
      params["wih0"], params["whh0"], params["b0"],
      params["wih1"], params["whh1"], params["b1"],
      params["wl"], params["bl"])
    return out[:, :LABELS]


# =====================================================================
# Parameter construction (PyTorch-shaped, then converted to kernel layout)
# =====================================================================
def make_params(key):
    ks = jax.random.split(key, 16)
    E = EMB

    def unif(k, shape, bound):
        return jax.random.uniform(k, shape, jnp.float32, -bound, bound)

    # Embedding(num_chars, E) ~ N(0, 1); append an all-zero row used for conv padding.
    emb = jax.random.normal(ks[0], (NUM_CHARS, E), jnp.float32)
    emb_ext = jnp.concatenate([emb, jnp.zeros((1, E), jnp.float32)], axis=0)

    # Conv1d(E, E, 3): torch weight (out, in, k), bias (out,) -> im2col layout (3E, E).
    cb = 1.0 / jnp.sqrt(E * 3.0)
    conv_w = unif(ks[1], (E, E, 3), cb)
    conv_b = unif(ks[2], (E,), cb)
    wconv = jnp.transpose(conv_w, (2, 1, 0)).reshape(3 * E, E)   # row k*E+i == W[o,i,k]
    bconv = conv_b.reshape(1, E)

    lb = 1.0 / jnp.sqrt(float(E))

    def permute_gates(w):
        # torch row-block order [i, f, g, o] -> kernel order [i, f, o, g]
        i, f, g, o = jnp.split(w, 4, axis=0)
        return jnp.concatenate([i, f, o, g], axis=0)

    def lstm_layer(k0, k1, k2, k3):
        w_ih = unif(k0, (4 * E, E), lb)
        w_hh = unif(k1, (4 * E, E), lb)
        b_ih = unif(k2, (4 * E,), lb)
        b_hh = unif(k3, (4 * E,), lb)
        wih = permute_gates(w_ih).T.astype(jnp.bfloat16)         # (E, 4E)
        whh = permute_gates(w_hh).T.astype(jnp.bfloat16)         # (E, 4E)
        b = permute_gates((b_ih + b_hh).reshape(4 * E, 1)).reshape(1, 4 * E)
        return wih, whh, b

    wih0, whh0, b0 = lstm_layer(ks[3], ks[4], ks[5], ks[6])
    wih1, whh1, b1 = lstm_layer(ks[7], ks[8], ks[9], ks[10])

    # Linear(E, LABELS): pad columns to 128 lanes for a lane-dense output store.
    fb = 1.0 / jnp.sqrt(float(E))
    wl = unif(ks[11], (LABELS, E), fb).T                         # (E, LABELS)
    bl = unif(ks[12], (LABELS,), fb)
    wl_pad = jnp.zeros((E, LANES), jnp.float32).at[:, :LABELS].set(wl)
    bl_pad = jnp.zeros((1, LANES), jnp.float32).at[0, :LABELS].set(bl)

    return {"emb": emb_ext.astype(jnp.bfloat16),
            "wconv": wconv.astype(jnp.bfloat16), "bconv": bconv,
            "wih0": wih0, "whh0": whh0, "b0": b0,
            "wih1": wih1, "whh1": whh1, "b1": b1,
            "wl": wl_pad.astype(jnp.bfloat16), "bl": bl_pad}


if __name__ == "__main__":
    root = jax.random.PRNGKey(0)
    k_params, k_ids = jax.random.split(root)
    params = make_params(k_params)
    x_ids = jax.random.randint(k_ids, (BATCH, SEQ), 0, NUM_CHARS, dtype=jnp.int32)

    fwd = jax.jit(subword_lstm_forward)
    out = jax.block_until_ready(fwd(x_ids, params))

    assert out.shape == (BATCH, LABELS)
    assert bool(jnp.all(jnp.isfinite(out)))
    print("KERNEL_OK")
</pallas_src>

<mosaic_0001>
module attributes {stable_mosaic.version = 11 : i64} {
  func.func @subword_lstm_kernel(%arg0: memref<52x1xi32, #tpu.memory_space<vmem>>, %arg1: memref<39x128xbf16, #tpu.memory_space<vmem>>, %arg2: memref<384x128xbf16, #tpu.memory_space<vmem>>, %arg3: memref<1x128xf32, #tpu.memory_space<vmem>>, %arg4: memref<128x512xbf16, #tpu.memory_space<vmem>>, %arg5: memref<128x512xbf16, #tpu.memory_space<vmem>>, %arg6: memref<1x512xf32, #tpu.memory_space<vmem>>, %arg7: memref<128x512xbf16, #tpu.memory_space<vmem>>, %arg8: memref<128x512xbf16, #tpu.memory_space<vmem>>, %arg9: memref<1x512xf32, #tpu.memory_space<vmem>>, %arg10: memref<128x128xbf16, #tpu.memory_space<vmem>>, %arg11: memref<1x128xf32, #tpu.memory_space<vmem>>, %arg12: memref<2x128xf32, #tpu.memory_space<vmem>>) attributes {dimension_semantics = [], scalar_prefetch = 0 : i64, scratch_operands = 0 : i64, tpu.core_type = #tpu.core_type<tc>} {
    %c0 = arith.constant 0 : index
    %c0_0 = arith.constant 0 : index
    %0 = vector.load %arg0[%c0, %c0_0] : memref<52x1xi32, #tpu.memory_space<vmem>>, vector<52x1xi32>
    %1 = tpu.iota {dimensions = array<i32: 1>} : vector<52x39xi32>
    %2 = vector.broadcast %0 : vector<52x1xi32> to vector<52x39xi32>
    %3 = arith.cmpi eq, %2, %1 : vector<52x39xi32>
    %cst = arith.constant 1.000000e+00 : f32
    %cst_1 = arith.constant 0.000000e+00 : f32
    %4 = vector.broadcast %cst : f32 to vector<52x39xf32>
    %5 = vector.broadcast %cst_1 : f32 to vector<52x39xf32>
    %6 = arith.select %3, %4, %5 : vector<52x39xi1>, vector<52x39xf32>
    %7 = arith.truncf %6 : vector<52x39xf32> to vector<52x39xbf16>
    %c0_2 = arith.constant 0 : index
    %c0_3 = arith.constant 0 : index
    %8 = vector.load %arg1[%c0_2, %c0_3] : memref<39x128xbf16, #tpu.memory_space<vmem>>, vector<39x128xbf16>
    %cst_4 = arith.constant dense<0.000000e+00> : vector<52x128xf32>
    %9 = tpu.matmul %7, %8, %cst_4 {dimension_numbers = #tpu.dot_dimension_numbers<[1], [0], [0], [1], [0, 0, 1, 1], [], []>} : vector<52x39xbf16>, vector<39x128xbf16>, vector<52x128xf32> -> vector<52x128xf32>
    %10 = vector.shape_cast %9 : vector<52x128xf32> to vector<2x26x128xf32>
    %11 = vector.extract_strided_slice %10 {offsets = [0, 0, 0], sizes = [2, 24, 128], strides = [1, 1, 1]} : vector<2x26x128xf32> to vector<2x24x128xf32>
    %12 = vector.extract_strided_slice %10 {offsets = [0, 1, 0], sizes = [2, 24, 128], strides = [1, 1, 1]} : vector<2x26x128xf32> to vector<2x24x128xf32>
    %13 = vector.extract_strided_slice %10 {offsets = [0, 2, 0], sizes = [2, 24, 128], strides = [1, 1, 1]} : vector<2x26x128xf32> to vector<2x24x128xf32>
    %14 = tpu.concatenate %11, %12, %13 in 2 : vector<2x24x128xf32>, vector<2x24x128xf32>, vector<2x24x128xf32> -> vector<2x24x384xf32>
    %15 = vector.shape_cast %14 : vector<2x24x384xf32> to vector<48x384xf32>
    %16 = arith.truncf %15 : vector<48x384xf32> to vector<48x384xbf16>
    %c0_5 = arith.constant 0 : index
    %c0_6 = arith.constant 0 : index
    %17 = vector.load %arg2[%c0_5, %c0_6] : memref<384x128xbf16, #tpu.memory_space<vmem>>, vector<384x128xbf16>
    %cst_7 = arith.constant dense<0.000000e+00> : vector<48x128xf32>
    %18 = tpu.matmul %16, %17, %cst_7 {dimension_numbers = #tpu.dot_dimension_numbers<[1], [0], [0], [1], [0, 0, 1, 1], [], []>} : vector<48x384xbf16>, vector<384x128xbf16>, vector<48x128xf32> -> vector<48x128xf32>
    %c0_8 = arith.constant 0 : index
    %c0_9 = arith.constant 0 : index
    %19 = vector.load %arg3[%c0_8, %c0_9] : memref<1x128xf32, #tpu.memory_space<vmem>>, vector<1x128xf32>
    %20 = vector.broadcast %19 : vector<1x128xf32> to vector<48x128xf32>
    %21 = arith.addf %18, %20 : vector<48x128xf32>
    %cst_10 = arith.constant 0.000000e+00 : f32
    %22 = vector.broadcast %cst_10 : f32 to vector<48x128xf32>
    %23 = arith.maximumf %21, %22 : vector<48x128xf32>
    %24 = vector.shape_cast %23 : vector<48x128xf32> to vector<2x24x128xf32>
    %25 = vector.extract_strided_slice %24 {offsets = [0, 0, 0], sizes = [2, 1, 128], strides = [1, 1, 1]} : vector<2x24x128xf32> to vector<2x1x128xf32>
    %26 = vector.shape_cast %25 : vector<2x1x128xf32> to vector<2x128xf32>
    %27 = vector.extract_strided_slice %24 {offsets = [0, 1, 0], sizes = [2, 1, 128], strides = [1, 1, 1]} : vector<2x24x128xf32> to vector<2x1x128xf32>
    %28 = vector.shape_cast %27 : vector<2x1x128xf32> to vector<2x128xf32>
    %29 = arith.maximumf %26, %28 : vector<2x128xf32>
    %30 = vector.extract_strided_slice %24 {offsets = [0, 2, 0], sizes = [2, 1, 128], strides = [1, 1, 1]} : vector<2x24x128xf32> to vector<2x1x128xf32>
    %31 = vector.shape_cast %30 : vector<2x1x128xf32> to vector<2x128xf32>
    %32 = arith.maximumf %29, %31 : vector<2x128xf32>
    %33 = vector.extract_strided_slice %24 {offsets = [0, 3, 0], sizes = [2, 1, 128], strides = [1, 1, 1]} : vector<2x24x128xf32> to vector<2x1x128xf32>
    %34 = vector.shape_cast %33 : vector<2x1x128xf32> to vector<2x128xf32>
    %35 = vector.extract_strided_slice %24 {offsets = [0, 4, 0], sizes = [2, 1, 128], strides = [1, 1, 1]} : vector<2x24x128xf32> to vector<2x1x128xf32>
    %36 = vector.shape_cast %35 : vector<2x1x128xf32> to vector<2x128xf32>
    %37 = arith.maximumf %34, %36 : vector<2x128xf32>
    %38 = vector.extract_strided_slice %24 {offsets = [0, 5, 0], sizes = [2, 1, 128], strides = [1, 1, 1]} : vector<2x24x128xf32> to vector<2x1x128xf32>
    %39 = vector.shape_cast %38 : vector<2x1x128xf32> to vector<2x128xf32>
    %40 = arith.maximumf %37, %39 : vector<2x128xf32>
    %41 = vector.extract_strided_slice %24 {offsets = [0, 6, 0], sizes = [2, 1, 128], strides = [1, 1, 1]} : vector<2x24x128xf32> to vector<2x1x128xf32>
    %42 = vector.shape_cast %41 : vector<2x1x128xf32> to vector<2x128xf32>
    %43 = vector.extract_strided_slice %24 {offsets = [0, 7, 0], sizes = [2, 1, 128], strides = [1, 1, 1]} : vector<2x24x128xf32> to vector<2x1x128xf32>
    %44 = vector.shape_cast %43 : vector<2x1x128xf32> to vector<2x128xf32>
    %45 = arith.maximumf %42, %44 : vector<2x128xf32>
    %46 = vector.extract_strided_slice %24 {offsets = [0, 8, 0], sizes = [2, 1, 128], strides = [1, 1, 1]} : vector<2x24x128xf32> to vector<2x1x128xf32>
    %47 = vector.shape_cast %46 : vector<2x1x128xf32> to vector<2x128xf32>
    %48 = arith.maximumf %45, %47 : vector<2x128xf32>
    %49 = vector.extract_strided_slice %24 {offsets = [0, 9, 0], sizes = [2, 1, 128], strides = [1, 1, 1]} : vector<2x24x128xf32> to vector<2x1x128xf32>
    %50 = vector.shape_cast %49 : vector<2x1x128xf32> to vector<2x128xf32>
    %51 = vector.extract_strided_slice %24 {offsets = [0, 10, 0], sizes = [2, 1, 128], strides = [1, 1, 1]} : vector<2x24x128xf32> to vector<2x1x128xf32>
    %52 = vector.shape_cast %51 : vector<2x1x128xf32> to vector<2x128xf32>
    %53 = arith.maximumf %50, %52 : vector<2x128xf32>
    %54 = vector.extract_strided_slice %24 {offsets = [0, 11, 0], sizes = [2, 1, 128], strides = [1, 1, 1]} : vector<2x24x128xf32> to vector<2x1x128xf32>
    %55 = vector.shape_cast %54 : vector<2x1x128xf32> to vector<2x128xf32>
    %56 = arith.maximumf %53, %55 : vector<2x128xf32>
    %57 = vector.extract_strided_slice %24 {offsets = [0, 12, 0], sizes = [2, 1, 128], strides = [1, 1, 1]} : vector<2x24x128xf32> to vector<2x1x128xf32>
    %58 = vector.shape_cast %57 : vector<2x1x128xf32> to vector<2x128xf32>
    %59 = vector.extract_strided_slice %24 {offsets = [0, 13, 0], sizes = [2, 1, 128], strides = [1, 1, 1]} : vector<2x24x128xf32> to vector<2x1x128xf32>
    %60 = vector.shape_cast %59 : vector<2x1x128xf32> to vector<2x128xf32>
    %61 = arith.maximumf %58, %60 : vector<2x128xf32>
    %62 = vector.extract_strided_slice %24 {offsets = [0, 14, 0], sizes = [2, 1, 128], strides = [1, 1, 1]} : vector<2x24x128xf32> to vector<2x1x128xf32>
    %63 = vector.shape_cast %62 : vector<2x1x128xf32> to vector<2x128xf32>
    %64 = arith.maximumf %61, %63 : vector<2x128xf32>
    %65 = vector.extract_strided_slice %24 {offsets = [0, 15, 0], sizes = [2, 1, 128], strides = [1, 1, 1]} : vector<2x24x128xf32> to vector<2x1x128xf32>
    %66 = vector.shape_cast %65 : vector<2x1x128xf32> to vector<2x128xf32>
    %67 = vector.extract_strided_slice %24 {offsets = [0, 16, 0], sizes = [2, 1, 128], strides = [1, 1, 1]} : vector<2x24x128xf32> to vector<2x1x128xf32>
    %68 = vector.shape_cast %67 : vector<2x1x128xf32> to vector<2x128xf32>
    %69 = arith.maximumf %66, %68 : vector<2x128xf32>
    %70 = vector.extract_strided_slice %24 {offsets = [0, 17, 0], sizes = [2, 1, 128], strides = [1, 1, 1]} : vector<2x24x128xf32> to vector<2x1x128xf32>
    %71 = vector.shape_cast %70 : vector<2x1x128xf32> to vector<2x128xf32>
    %72 = arith.maximumf %69, %71 : vector<2x128xf32>
    %73 = vector.extract_strided_slice %24 {offsets = [0, 18, 0], sizes = [2, 1, 128], strides = [1, 1, 1]} : vector<2x24x128xf32> to vector<2x1x128xf32>
    %74 = vector.shape_cast %73 : vector<2x1x128xf32> to vector<2x128xf32>
    %75 = vector.extract_strided_slice %24 {offsets = [0, 19, 0], sizes = [2, 1, 128], strides = [1, 1, 1]} : vector<2x24x128xf32> to vector<2x1x128xf32>
    %76 = vector.shape_cast %75 : vector<2x1x128xf32> to vector<2x128xf32>
    %77 = arith.maximumf %74, %76 : vector<2x128xf32>
    %78 = vector.extract_strided_slice %24 {offsets = [0, 20, 0], sizes = [2, 1, 128], strides = [1, 1, 1]} : vector<2x24x128xf32> to vector<2x1x128xf32>
    %79 = vector.shape_cast %78 : vector<2x1x128xf32> to vector<2x128xf32>
    %80 = arith.maximumf %77, %79 : vector<2x128xf32>
    %81 = vector.extract_strided_slice %24 {offsets = [0, 21, 0], sizes = [2, 1, 128], strides = [1, 1, 1]} : vector<2x24x128xf32> to vector<2x1x128xf32>
    %82 = vector.shape_cast %81 : vector<2x1x128xf32> to vector<2x128xf32>
    %83 = vector.extract_strided_slice %24 {offsets = [0, 22, 0], sizes = [2, 1, 128], strides = [1, 1, 1]} : vector<2x24x128xf32> to vector<2x1x128xf32>
    %84 = vector.shape_cast %83 : vector<2x1x128xf32> to vector<2x128xf32>
    %85 = arith.maximumf %82, %84 : vector<2x128xf32>
    %86 = vector.extract_strided_slice %24 {offsets = [0, 23, 0], sizes = [2, 1, 128], strides = [1, 1, 1]} : vector<2x24x128xf32> to vector<2x1x128xf32>
    %87 = vector.shape_cast %86 : vector<2x1x128xf32> to vector<2x128xf32>
    %88 = arith.maximumf %85, %87 : vector<2x128xf32>
    %89 = tpu.concatenate %32, %40, %48, %56, %64, %72, %80, %88 in 0 : vector<2x128xf32>, vector<2x128xf32>, vector<2x128xf32>, vector<2x128xf32>, vector<2x128xf32>, vector<2x128xf32>, vector<2x128xf32>, vector<2x128xf32> -> vector<16x128xf32>
    %90 = arith.truncf %89 : vector<16x128xf32> to vector<16x128xbf16>
    %c0_11 = arith.constant 0 : index
    %c0_12 = arith.constant 0 : index
    %91 = vector.load %arg4[%c0_11, %c0_12] : memref<128x512xbf16, #tpu.memory_space<vmem>>, vector<128x512xbf16>
    %cst_13 = arith.constant dense<0.000000e+00> : vector<16x512xf32>
    %92 = tpu.matmul %90, %91, %cst_13 {dimension_numbers = #tpu.dot_dimension_numbers<[1], [0], [0], [1], [0, 0, 1, 1], [], []>} : vector<16x128xbf16>, vector<128x512xbf16>, vector<16x512xf32> -> vector<16x512xf32>
    %c0_14 = arith.constant 0 : index
    %c0_15 = arith.constant 0 : index
    %93 = vector.load %arg6[%c0_14, %c0_15] : memref<1x512xf32, #tpu.memory_space<vmem>>, vector<1x512xf32>
    %94 = vector.broadcast %93 : vector<1x512xf32> to vector<16x512xf32>
    %95 = arith.addf %92, %94 : vector<16x512xf32>
    %96 = vector.shape_cast %95 : vector<16x512xf32> to vector<8x2x512xf32>
    %c0_16 = arith.constant 0 : index
    %c0_17 = arith.constant 0 : index
    %97 = vector.load %arg5[%c0_16, %c0_17] : memref<128x512xbf16, #tpu.memory_space<vmem>>, vector<128x512xbf16>
    %cst_18 = arith.constant 0.000000e+00 : f32
    %98 = vector.broadcast %cst_18 : f32 to vector<2x128xf32>
    %cst_19 = arith.constant 0.000000e+00 : f32
    %99 = vector.broadcast %cst_19 : f32 to vector<2x128xf32>
    %100 = vector.extract_strided_slice %96 {offsets = [0, 0, 0], sizes = [1, 2, 512], strides = [1, 1, 1]} : vector<8x2x512xf32> to vector<1x2x512xf32>
    %101 = vector.shape_cast %100 : vector<1x2x512xf32> to vector<2x512xf32>
    %102 = arith.truncf %98 : vector<2x128xf32> to vector<2x128xbf16>
    %cst_20 = arith.constant dense<0.000000e+00> : vector<2x512xf32>
    %103 = tpu.matmul %102, %97, %cst_20 {dimension_numbers = #tpu.dot_dimension_numbers<[1], [0], [0], [1], [0, 0, 1, 1], [], []>} : vector<2x128xbf16>, vector<128x512xbf16>, vector<2x512xf32> -> vector<2x512xf32>
    %104 = arith.addf %101, %103 : vector<2x512xf32>
    %105 = vector.extract_strided_slice %104 {offsets = [0, 0], sizes = [2, 384], strides = [1, 1]} : vector<2x512xf32> to vector<2x384xf32>
    %106 = arith.negf %105 : vector<2x384xf32>
    %107 = math.exp %106 : vector<2x384xf32>
    %cst_21 = arith.constant 1.000000e+00 : f32
    %108 = vector.broadcast %cst_21 : f32 to vector<2x384xf32>
    %109 = arith.addf %108, %107 : vector<2x384xf32>
    %110 = arith.divf %108, %109 : vector<2x384xf32>
    %111 = vector.extract_strided_slice %104 {offsets = [0, 384], sizes = [2, 128], strides = [1, 1]} : vector<2x512xf32> to vector<2x128xf32>
    %112 = math.tanh %111 : vector<2x128xf32>
    %113 = vector.extract_strided_slice %110 {offsets = [0, 128], sizes = [2, 128], strides = [1, 1]} : vector<2x384xf32> to vector<2x128xf32>
    %114 = arith.mulf %113, %99 : vector<2x128xf32>
    %115 = vector.extract_strided_slice %110 {offsets = [0, 0], sizes = [2, 128], strides = [1, 1]} : vector<2x384xf32> to vector<2x128xf32>
    %116 = arith.mulf %115, %112 : vector<2x128xf32>
    %117 = arith.addf %114, %116 : vector<2x128xf32>
    %118 = vector.extract_strided_slice %110 {offsets = [0, 256], sizes = [2, 128], strides = [1, 1]} : vector<2x384xf32> to vector<2x128xf32>
    %119 = math.tanh %117 : vector<2x128xf32>
    %120 = arith.mulf %118, %119 : vector<2x128xf32>
    %121 = vector.extract_strided_slice %96 {offsets = [1, 0, 0], sizes = [1, 2, 512], strides = [1, 1, 1]} : vector<8x2x512xf32> to vector<1x2x512xf32>
    %122 = vector.shape_cast %121 : vector<1x2x512xf32> to vector<2x512xf32>
    %123 = arith.truncf %120 : vector<2x128xf32> to vector<2x128xbf16>
    %cst_22 = arith.constant dense<0.000000e+00> : vector<2x512xf32>
    %124 = tpu.matmul %123, %97, %cst_22 {dimension_numbers = #tpu.dot_dimension_numbers<[1], [0], [0], [1], [0, 0, 1, 1], [], []>} : vector<2x128xbf16>, vector<128x512xbf16>, vector<2x512xf32> -> vector<2x512xf32>
    %125 = arith.addf %122, %124 : vector<2x512xf32>
    %126 = vector.extract_strided_slice %125 {offsets = [0, 0], sizes = [2, 384], strides = [1, 1]} : vector<2x512xf32> to vector<2x384xf32>
    %127 = arith.negf %126 : vector<2x384xf32>
    %128 = math.exp %127 : vector<2x384xf32>
    %cst_23 = arith.constant 1.000000e+00 : f32
    %129 = vector.broadcast %cst_23 : f32 to vector<2x384xf32>
    %130 = arith.addf %129, %128 : vector<2x384xf32>
    %131 = arith.divf %129, %130 : vector<2x384xf32>
    %132 = vector.extract_strided_slice %125 {offsets = [0, 384], sizes = [2, 128], strides = [1, 1]} : vector<2x512xf32> to vector<2x128xf32>
    %133 = math.tanh %132 : vector<2x128xf32>
    %134 = vector.extract_strided_slice %131 {offsets = [0, 128], sizes = [2, 128], strides = [1, 1]} : vector<2x384xf32> to vector<2x128xf32>
    %135 = arith.mulf %134, %117 : vector<2x128xf32>
    %136 = vector.extract_strided_slice %131 {offsets = [0, 0], sizes = [2, 128], strides = [1, 1]} : vector<2x384xf32> to vector<2x128xf32>
    %137 = arith.mulf %136, %133 : vector<2x128xf32>
    %138 = arith.addf %135, %137 : vector<2x128xf32>
    %139 = vector.extract_strided_slice %131 {offsets = [0, 256], sizes = [2, 128], strides = [1, 1]} : vector<2x384xf32> to vector<2x128xf32>
    %140 = math.tanh %138 : vector<2x128xf32>
    %141 = arith.mulf %139, %140 : vector<2x128xf32>
    %142 = vector.extract_strided_slice %96 {offsets = [2, 0, 0], sizes = [1, 2, 512], strides = [1, 1, 1]} : vector<8x2x512xf32> to vector<1x2x512xf32>
    %143 = vector.shape_cast %142 : vector<1x2x512xf32> to vector<2x512xf32>
    %144 = arith.truncf %141 : vector<2x128xf32> to vector<2x128xbf16>
    %cst_24 = arith.constant dense<0.000000e+00> : vector<2x512xf32>
    %145 = tpu.matmul %144, %97, %cst_24 {dimension_numbers = #tpu.dot_dimension_numbers<[1], [0], [0], [1], [0, 0, 1, 1], [], []>} : vector<2x128xbf16>, vector<128x512xbf16>, vector<2x512xf32> -> vector<2x512xf32>
    %146 = arith.addf %143, %145 : vector<2x512xf32>
    %147 = vector.extract_strided_slice %146 {offsets = [0, 0], sizes = [2, 384], strides = [1, 1]} : vector<2x512xf32> to vector<2x384xf32>
    %148 = arith.negf %147 : vector<2x384xf32>
    %149 = math.exp %148 : vector<2x384xf32>
    %cst_25 = arith.constant 1.000000e+00 : f32
    %150 = vector.broadcast %cst_25 : f32 to vector<2x384xf32>
    %151 = arith.addf %150, %149 : vector<2x384xf32>
    %152 = arith.divf %150, %151 : vector<2x384xf32>
    %153 = vector.extract_strided_slice %146 {offsets = [0, 384], sizes = [2, 128], strides = [1, 1]} : vector<2x512xf32> to vector<2x128xf32>
    %154 = math.tanh %153 : vector<2x128xf32>
    %155 = vector.extract_strided_slice %152 {offsets = [0, 128], sizes = [2, 128], strides = [1, 1]} : vector<2x384xf32> to vector<2x128xf32>
    %156 = arith.mulf %155, %138 : vector<2x128xf32>
    %157 = vector.extract_strided_slice %152 {offsets = [0, 0], sizes = [2, 128], strides = [1, 1]} : vector<2x384xf32> to vector<2x128xf32>
    %158 = arith.mulf %157, %154 : vector<2x128xf32>
    %159 = arith.addf %156, %158 : vector<2x128xf32>
    %160 = vector.extract_strided_slice %152 {offsets = [0, 256], sizes = [2, 128], strides = [1, 1]} : vector<2x384xf32> to vector<2x128xf32>
    %161 = math.tanh %159 : vector<2x128xf32>
    %162 = arith.mulf %160, %161 : vector<2x128xf32>
    %163 = vector.extract_strided_slice %96 {offsets = [3, 0, 0], sizes = [1, 2, 512], strides = [1, 1, 1]} : vector<8x2x512xf32> to vector<1x2x512xf32>
    %164 = vector.shape_cast %163 : vector<1x2x512xf32> to vector<2x512xf32>
    %165 = arith.truncf %162 : vector<2x128xf32> to vector<2x128xbf16>
    %cst_26 = arith.constant dense<0.000000e+00> : vector<2x512xf32>
    %166 = tpu.matmul %165, %97, %cst_26 {dimension_numbers = #tpu.dot_dimension_numbers<[1], [0], [0], [1], [0, 0, 1, 1], [], []>} : vector<2x128xbf16>, vector<128x512xbf16>, vector<2x512xf32> -> vector<2x512xf32>
    %167 = arith.addf %164, %166 : vector<2x512xf32>
    %168 = vector.extract_strided_slice %167 {offsets = [0, 0], sizes = [2, 384], strides = [1, 1]} : vector<2x512xf32> to vector<2x384xf32>
    %169 = arith.negf %168 : vector<2x384xf32>
    %170 = math.exp %169 : vector<2x384xf32>
    %cst_27 = arith.constant 1.000000e+00 : f32
    %171 = vector.broadcast %cst_27 : f32 to vector<2x384xf32>
    %172 = arith.addf %171, %170 : vector<2x384xf32>
    %173 = arith.divf %171, %172 : vector<2x384xf32>
    %174 = vector.extract_strided_slice %167 {offsets = [0, 384], sizes = [2, 128], strides = [1, 1]} : vector<2x512xf32> to vector<2x128xf32>
    %175 = math.tanh %174 : vector<2x128xf32>
    %176 = vector.extract_strided_slice %173 {offsets = [0, 128], sizes = [2, 128], strides = [1, 1]} : vector<2x384xf32> to vector<2x128xf32>
    %177 = arith.mulf %176, %159 : vector<2x128xf32>
    %178 = vector.extract_strided_slice %173 {offsets = [0, 0], sizes = [2, 128], strides = [1, 1]} : vector<2x384xf32> to vector<2x128xf32>
    %179 = arith.mulf %178, %175 : vector<2x128xf32>
    %180 = arith.addf %177, %179 : vector<2x128xf32>
    %181 = vector.extract_strided_slice %173 {offsets = [0, 256], sizes = [2, 128], strides = [1, 1]} : vector<2x384xf32> to vector<2x128xf32>
    %182 = math.tanh %180 : vector<2x128xf32>
    %183 = arith.mulf %181, %182 : vector<2x128xf32>
    %184 = vector.extract_strided_slice %96 {offsets = [4, 0, 0], sizes = [1, 2, 512], strides = [1, 1, 1]} : vector<8x2x512xf32> to vector<1x2x512xf32>
    %185 = vector.shape_cast %184 : vector<1x2x512xf32> to vector<2x512xf32>
    %186 = arith.truncf %183 : vector<2x128xf32> to vector<2x128xbf16>
    %cst_28 = arith.constant dense<0.000000e+00> : vector<2x512xf32>
    %187 = tpu.matmul %186, %97, %cst_28 {dimension_numbers = #tpu.dot_dimension_numbers<[1], [0], [0], [1], [0, 0, 1, 1], [], []>} : vector<2x128xbf16>, vector<128x512xbf16>, vector<2x512xf32> -> vector<2x512xf32>
    %188 = arith.addf %185, %187 : vector<2x512xf32>
    %189 = vector.extract_strided_slice %188 {offsets = [0, 0], sizes = [2, 384], strides = [1, 1]} : vector<2x512xf32> to vector<2x384xf32>
    %190 = arith.negf %189 : vector<2x384xf32>
    %191 = math.exp %190 : vector<2x384xf32>
    %cst_29 = arith.constant 1.000000e+00 : f32
    %192 = vector.broadcast %cst_29 : f32 to vector<2x384xf32>
    %193 = arith.addf %192, %191 : vector<2x384xf32>
    %194 = arith.divf %192, %193 : vector<2x384xf32>
    %195 = vector.extract_strided_slice %188 {offsets = [0, 384], sizes = [2, 128], strides = [1, 1]} : vector<2x512xf32> to vector<2x128xf32>
    %196 = math.tanh %195 : vector<2x128xf32>
    %197 = vector.extract_strided_slice %194 {offsets = [0, 128], sizes = [2, 128], strides = [1, 1]} : vector<2x384xf32> to vector<2x128xf32>
    %198 = arith.mulf %197, %180 : vector<2x128xf32>
    %199 = vector.extract_strided_slice %194 {offsets = [0, 0], sizes = [2, 128], strides = [1, 1]} : vector<2x384xf32> to vector<2x128xf32>
    %200 = arith.mulf %199, %196 : vector<2x128xf32>
    %201 = arith.addf %198, %200 : vector<2x128xf32>
    %202 = vector.extract_strided_slice %194 {offsets = [0, 256], sizes = [2, 128], strides = [1, 1]} : vector<2x384xf32> to vector<2x128xf32>
    %203 = math.tanh %201 : vector<2x128xf32>
    %204 = arith.mulf %202, %203 : vector<2x128xf32>
    %205 = vector.extract_strided_slice %96 {offsets = [5, 0, 0], sizes = [1, 2, 512], strides = [1, 1, 1]} : vector<8x2x512xf32> to vector<1x2x512xf32>
    %206 = vector.shape_cast %205 : vector<1x2x512xf32> to vector<2x512xf32>
    %207 = arith.truncf %204 : vector<2x128xf32> to vector<2x128xbf16>
    %cst_30 = arith.constant dense<0.000000e+00> : vector<2x512xf32>
    %208 = tpu.matmul %207, %97, %cst_30 {dimension_numbers = #tpu.dot_dimension_numbers<[1], [0], [0], [1], [0, 0, 1, 1], [], []>} : vector<2x128xbf16>, vector<128x512xbf16>, vector<2x512xf32> -> vector<2x512xf32>
    %209 = arith.addf %206, %208 : vector<2x512xf32>
    %210 = vector.extract_strided_slice %209 {offsets = [0, 0], sizes = [2, 384], strides = [1, 1]} : vector<2x512xf32> to vector<2x384xf32>
    %211 = arith.negf %210 : vector<2x384xf32>
    %212 = math.exp %211 : vector<2x384xf32>
    %cst_31 = arith.constant 1.000000e+00 : f32
    %213 = vector.broadcast %cst_31 : f32 to vector<2x384xf32>
    %214 = arith.addf %213, %212 : vector<2x384xf32>
    %215 = arith.divf %213, %214 : vector<2x384xf32>
    %216 = vector.extract_strided_slice %209 {offsets = [0, 384], sizes = [2, 128], strides = [1, 1]} : vector<2x512xf32> to vector<2x128xf32>
    %217 = math.tanh %216 : vector<2x128xf32>
    %218 = vector.extract_strided_slice %215 {offsets = [0, 128], sizes = [2, 128], strides = [1, 1]} : vector<2x384xf32> to vector<2x128xf32>
    %219 = arith.mulf %218, %201 : vector<2x128xf32>
    %220 = vector.extract_strided_slice %215 {offsets = [0, 0], sizes = [2, 128], strides = [1, 1]} : vector<2x384xf32> to vector<2x128xf32>
    %221 = arith.mulf %220, %217 : vector<2x128xf32>
    %222 = arith.addf %219, %221 : vector<2x128xf32>
    %223 = vector.extract_strided_slice %215 {offsets = [0, 256], sizes = [2, 128], strides = [1, 1]} : vector<2x384xf32> to vector<2x128xf32>
    %224 = math.tanh %222 : vector<2x128xf32>
    %225 = arith.mulf %223, %224 : vector<2x128xf32>
    %226 = vector.extract_strided_slice %96 {offsets = [6, 0, 0], sizes = [1, 2, 512], strides = [1, 1, 1]} : vector<8x2x512xf32> to vector<1x2x512xf32>
    %227 = vector.shape_cast %226 : vector<1x2x512xf32> to vector<2x512xf32>
    %228 = arith.truncf %225 : vector<2x128xf32> to vector<2x128xbf16>
    %cst_32 = arith.constant dense<0.000000e+00> : vector<2x512xf32>
    %229 = tpu.matmul %228, %97, %cst_32 {dimension_numbers = #tpu.dot_dimension_numbers<[1], [0], [0], [1], [0, 0, 1, 1], [], []>} : vector<2x128xbf16>, vector<128x512xbf16>, vector<2x512xf32> -> vector<2x512xf32>
    %230 = arith.addf %227, %229 : vector<2x512xf32>
    %231 = vector.extract_strided_slice %230 {offsets = [0, 0], sizes = [2, 384], strides = [1, 1]} : vector<2x512xf32> to vector<2x384xf32>
    %232 = arith.negf %231 : vector<2x384xf32>
    %233 = math.exp %232 : vector<2x384xf32>
    %cst_33 = arith.constant 1.000000e+00 : f32
    %234 = vector.broadcast %cst_33 : f32 to vector<2x384xf32>
    %235 = arith.addf %234, %233 : vector<2x384xf32>
    %236 = arith.divf %234, %235 : vector<2x384xf32>
    %237 = vector.extract_strided_slice %230 {offsets = [0, 384], sizes = [2, 128], strides = [1, 1]} : vector<2x512xf32> to vector<2x128xf32>
    %238 = math.tanh %237 : vector<2x128xf32>
    %239 = vector.extract_strided_slice %236 {offsets = [0, 128], sizes = [2, 128], strides = [1, 1]} : vector<2x384xf32> to vector<2x128xf32>
    %240 = arith.mulf %239, %222 : vector<2x128xf32>
    %241 = vector.extract_strided_slice %236 {offsets = [0, 0], sizes = [2, 128], strides = [1, 1]} : vector<2x384xf32> to vector<2x128xf32>
    %242 = arith.mulf %241, %238 : vector<2x128xf32>
    %243 = arith.addf %240, %242 : vector<2x128xf32>
    %244 = vector.extract_strided_slice %236 {offsets = [0, 256], sizes = [2, 128], strides = [1, 1]} : vector<2x384xf32> to vector<2x128xf32>
    %245 = math.tanh %243 : vector<2x128xf32>
    %246 = arith.mulf %244, %245 : vector<2x128xf32>
    %247 = vector.extract_strided_slice %96 {offsets = [7, 0, 0], sizes = [1, 2, 512], strides = [1, 1, 1]} : vector<8x2x512xf32> to vector<1x2x512xf32>
    %248 = vector.shape_cast %247 : vector<1x2x512xf32> to vector<2x512xf32>
    %249 = arith.truncf %246 : vector<2x128xf32> to vector<2x128xbf16>
    %cst_34 = arith.constant dense<0.000000e+00> : vector<2x512xf32>
    %250 = tpu.matmul %249, %97, %cst_34 {dimension_numbers = #tpu.dot_dimension_numbers<[1], [0], [0], [1], [0, 0, 1, 1], [], []>} : vector<2x128xbf16>, vector<128x512xbf16>, vector<2x512xf32> -> vector<2x512xf32>
    %251 = arith.addf %248, %250 : vector<2x512xf32>
    %252 = vector.extract_strided_slice %251 {offsets = [0, 0], sizes = [2, 384], strides = [1, 1]} : vector<2x512xf32> to vector<2x384xf32>
    %253 = arith.negf %252 : vector<2x384xf32>
    %254 = math.exp %253 : vector<2x384xf32>
    %cst_35 = arith.constant 1.000000e+00 : f32
    %255 = vector.broadcast %cst_35 : f32 to vector<2x384xf32>
    %256 = arith.addf %255, %254 : vector<2x384xf32>
    %257 = arith.divf %255, %256 : vector<2x384xf32>
    %258 = vector.extract_strided_slice %251 {offsets = [0, 384], sizes = [2, 128], strides = [1, 1]} : vector<2x512xf32> to vector<2x128xf32>
    %259 = math.tanh %258 : vector<2x128xf32>
    %260 = vector.extract_strided_slice %257 {offsets = [0, 128], sizes = [2, 128], strides = [1, 1]} : vector<2x384xf32> to vector<2x128xf32>
    %261 = arith.mulf %260, %243 : vector<2x128xf32>
    %262 = vector.extract_strided_slice %257 {offsets = [0, 0], sizes = [2, 128], strides = [1, 1]} : vector<2x384xf32> to vector<2x128xf32>
    %263 = arith.mulf %262, %259 : vector<2x128xf32>
    %264 = arith.addf %261, %263 : vector<2x128xf32>
    %265 = vector.extract_strided_slice %257 {offsets = [0, 256], sizes = [2, 128], strides = [1, 1]} : vector<2x384xf32> to vector<2x128xf32>
    %266 = math.tanh %264 : vector<2x128xf32>
    %267 = arith.mulf %265, %266 : vector<2x128xf32>
    %268 = tpu.concatenate %120, %141, %162, %183, %204, %225, %246, %267 in 0 : vector<2x128xf32>, vector<2x128xf32>, vector<2x128xf32>, vector<2x128xf32>, vector<2x128xf32>, vector<2x128xf32>, vector<2x128xf32>, vector<2x128xf32> -> vector<16x128xf32>
    %269 = arith.truncf %268 : vector<16x128xf32> to vector<16x128xbf16>
    %c0_36 = arith.constant 0 : index
    %c0_37 = arith.constant 0 : index
    %270 = vector.load %arg7[%c0_36, %c0_37] : memref<128x512xbf16, #tpu.memory_space<vmem>>, vector<128x512xbf16>
    %cst_38 = arith.constant dense<0.000000e+00> : vector<16x512xf32>
    %271 = tpu.matmul %269, %270, %cst_38 {dimension_numbers = #tpu.dot_dimension_numbers<[1], [0], [0], [1], [0, 0, 1, 1], [], []>} : vector<16x128xbf16>, vector<128x512xbf16>, vector<16x512xf32> -> vector<16x512xf32>
    %c0_39 = arith.constant 0 : index
    %c0_40 = arith.constant 0 : index
    %272 = vector.load %arg9[%c0_39, %c0_40] : memref<1x512xf32, #tpu.memory_space<vmem>>, vector<1x512xf32>
    %273 = vector.broadcast %272 : vector<1x512xf32> to vector<16x512xf32>
    %274 = arith.addf %271, %273 : vector<16x512xf32>
    %275 = vector.shape_cast %274 : vector<16x512xf32> to vector<8x2x512xf32>
    %c0_41 = arith.constant 0 : index
    %c0_42 = arith.constant 0 : index
    %276 = vector.load %arg8[%c0_41, %c0_42] : memref<128x512xbf16, #tpu.memory_space<vmem>>, vector<128x512xbf16>
    %cst_43 = arith.constant 0.000000e+00 : f32
    %277 = vector.broadcast %cst_43 : f32 to vector<2x128xf32>
    %cst_44 = arith.constant 0.000000e+00 : f32
    %278 = vector.broadcast %cst_44 : f32 to vector<2x128xf32>
    %279 = vector.extract_strided_slice %275 {offsets = [0, 0, 0], sizes = [1, 2, 512], strides = [1, 1, 1]} : vector<8x2x512xf32> to vector<1x2x512xf32>
    %280 = vector.shape_cast %279 : vector<1x2x512xf32> to vector<2x512xf32>
    %281 = arith.truncf %277 : vector<2x128xf32> to vector<2x128xbf16>
    %cst_45 = arith.constant dense<0.000000e+00> : vector<2x512xf32>
    %282 = tpu.matmul %281, %276, %cst_45 {dimension_numbers = #tpu.dot_dimension_numbers<[1], [0], [0], [1], [0, 0, 1, 1], [], []>} : vector<2x128xbf16>, vector<128x512xbf16>, vector<2x512xf32> -> vector<2x512xf32>
    %283 = arith.addf %280, %282 : vector<2x512xf32>
    %284 = vector.extract_strided_slice %283 {offsets = [0, 0], sizes = [2, 384], strides = [1, 1]} : vector<2x512xf32> to vector<2x384xf32>
    %285 = arith.negf %284 : vector<2x384xf32>
    %286 = math.exp %285 : vector<2x384xf32>
    %cst_46 = arith.constant 1.000000e+00 : f32
    %287 = vector.broadcast %cst_46 : f32 to vector<2x384xf32>
    %288 = arith.addf %287, %286 : vector<2x384xf32>
    %289 = arith.divf %287, %288 : vector<2x384xf32>
    %290 = vector.extract_strided_slice %283 {offsets = [0, 384], sizes = [2, 128], strides = [1, 1]} : vector<2x512xf32> to vector<2x128xf32>
    %291 = math.tanh %290 : vector<2x128xf32>
    %292 = vector.extract_strided_slice %289 {offsets = [0, 128], sizes = [2, 128], strides = [1, 1]} : vector<2x384xf32> to vector<2x128xf32>
    %293 = arith.mulf %292, %278 : vector<2x128xf32>
    %294 = vector.extract_strided_slice %289 {offsets = [0, 0], sizes = [2, 128], strides = [1, 1]} : vector<2x384xf32> to vector<2x128xf32>
    %295 = arith.mulf %294, %291 : vector<2x128xf32>
    %296 = arith.addf %293, %295 : vector<2x128xf32>
    %297 = vector.extract_strided_slice %289 {offsets = [0, 256], sizes = [2, 128], strides = [1, 1]} : vector<2x384xf32> to vector<2x128xf32>
    %298 = math.tanh %296 : vector<2x128xf32>
    %299 = arith.mulf %297, %298 : vector<2x128xf32>
    %300 = vector.extract_strided_slice %275 {offsets = [1, 0, 0], sizes = [1, 2, 512], strides = [1, 1, 1]} : vector<8x2x512xf32> to vector<1x2x512xf32>
    %301 = vector.shape_cast %300 : vector<1x2x512xf32> to vector<2x512xf32>
    %302 = arith.truncf %299 : vector<2x128xf32> to vector<2x128xbf16>
    %cst_47 = arith.constant dense<0.000000e+00> : vector<2x512xf32>
    %303 = tpu.matmul %302, %276, %cst_47 {dimension_numbers = #tpu.dot_dimension_numbers<[1], [0], [0], [1], [0, 0, 1, 1], [], []>} : vector<2x128xbf16>, vector<128x512xbf16>, vector<2x512xf32> -> vector<2x512xf32>
    %304 = arith.addf %301, %303 : vector<2x512xf32>
    %305 = vector.extract_strided_slice %304 {offsets = [0, 0], sizes = [2, 384], strides = [1, 1]} : vector<2x512xf32> to vector<2x384xf32>
    %306 = arith.negf %305 : vector<2x384xf32>
    %307 = math.exp %306 : vector<2x384xf32>
    %cst_48 = arith.constant 1.000000e+00 : f32
    %308 = vector.broadcast %cst_48 : f32 to vector<2x384xf32>
    %309 = arith.addf %308, %307 : vector<2x384xf32>
    %310 = arith.divf %308, %309 : vector<2x384xf32>
    %311 = vector.extract_strided_slice %304 {offsets = [0, 384], sizes = [2, 128], strides = [1, 1]} : vector<2x512xf32> to vector<2x128xf32>
    %312 = math.tanh %311 : vector<2x128xf32>
    %313 = vector.extract_strided_slice %310 {offsets = [0, 128], sizes = [2, 128], strides = [1, 1]} : vector<2x384xf32> to vector<2x128xf32>
    %314 = arith.mulf %313, %296 : vector<2x128xf32>
    %315 = vector.extract_strided_slice %310 {offsets = [0, 0], sizes = [2, 128], strides = [1, 1]} : vector<2x384xf32> to vector<2x128xf32>
    %316 = arith.mulf %315, %312 : vector<2x128xf32>
    %317 = arith.addf %314, %316 : vector<2x128xf32>
    %318 = vector.extract_strided_slice %310 {offsets = [0, 256], sizes = [2, 128], strides = [1, 1]} : vector<2x384xf32> to vector<2x128xf32>
    %319 = math.tanh %317 : vector<2x128xf32>
    %320 = arith.mulf %318, %319 : vector<2x128xf32>
    %321 = vector.extract_strided_slice %275 {offsets = [2, 0, 0], sizes = [1, 2, 512], strides = [1, 1, 1]} : vector<8x2x512xf32> to vector<1x2x512xf32>
    %322 = vector.shape_cast %321 : vector<1x2x512xf32> to vector<2x512xf32>
    %323 = arith.truncf %320 : vector<2x128xf32> to vector<2x128xbf16>
    %cst_49 = arith.constant dense<0.000000e+00> : vector<2x512xf32>
    %324 = tpu.matmul %323, %276, %cst_49 {dimension_numbers = #tpu.dot_dimension_numbers<[1], [0], [0], [1], [0, 0, 1, 1], [], []>} : vector<2x128xbf16>, vector<128x512xbf16>, vector<2x512xf32> -> vector<2x512xf32>
    %325 = arith.addf %322, %324 : vector<2x512xf32>
    %326 = vector.extract_strided_slice %325 {offsets = [0, 0], sizes = [2, 384], strides = [1, 1]} : vector<2x512xf32> to vector<2x384xf32>
    %327 = arith.negf %326 : vector<2x384xf32>
    %328 = math.exp %327 : vector<2x384xf32>
    %cst_50 = arith.constant 1.000000e+00 : f32
    %329 = vector.broadcast %cst_50 : f32 to vector<2x384xf32>
    %330 = arith.addf %329, %328 : vector<2x384xf32>
    %331 = arith.divf %329, %330 : vector<2x384xf32>
    %332 = vector.extract_strided_slice %325 {offsets = [0, 384], sizes = [2, 128], strides = [1, 1]} : vector<2x512xf32> to vector<2x128xf32>
    %333 = math.tanh %332 : vector<2x128xf32>
    %334 = vector.extract_strided_slice %331 {offsets = [0, 128], sizes = [2, 128], strides = [1, 1]} : vector<2x384xf32> to vector<2x128xf32>
    %335 = arith.mulf %334, %317 : vector<2x128xf32>
    %336 = vector.extract_strided_slice %331 {offsets = [0, 0], sizes = [2, 128], strides = [1, 1]} : vector<2x384xf32> to vector<2x128xf32>
    %337 = arith.mulf %336, %333 : vector<2x128xf32>
    %338 = arith.addf %335, %337 : vector<2x128xf32>
    %339 = vector.extract_strided_slice %331 {offsets = [0, 256], sizes = [2, 128], strides = [1, 1]} : vector<2x384xf32> to vector<2x128xf32>
    %340 = math.tanh %338 : vector<2x128xf32>
    %341 = arith.mulf %339, %340 : vector<2x128xf32>
    %342 = vector.extract_strided_slice %275 {offsets = [3, 0, 0], sizes = [1, 2, 512], strides = [1, 1, 1]} : vector<8x2x512xf32> to vector<1x2x512xf32>
    %343 = vector.shape_cast %342 : vector<1x2x512xf32> to vector<2x512xf32>
    %344 = arith.truncf %341 : vector<2x128xf32> to vector<2x128xbf16>
    %cst_51 = arith.constant dense<0.000000e+00> : vector<2x512xf32>
    %345 = tpu.matmul %344, %276, %cst_51 {dimension_numbers = #tpu.dot_dimension_numbers<[1], [0], [0], [1], [0, 0, 1, 1], [], []>} : vector<2x128xbf16>, vector<128x512xbf16>, vector<2x512xf32> -> vector<2x512xf32>
    %346 = arith.addf %343, %345 : vector<2x512xf32>
    %347 = vector.extract_strided_slice %346 {offsets = [0, 0], sizes = [2, 384], strides = [1, 1]} : vector<2x512xf32> to vector<2x384xf32>
    %348 = arith.negf %347 : vector<2x384xf32>
    %349 = math.exp %348 : vector<2x384xf32>
    %cst_52 = arith.constant 1.000000e+00 : f32
    %350 = vector.broadcast %cst_52 : f32 to vector<2x384xf32>
    %351 = arith.addf %350, %349 : vector<2x384xf32>
    %352 = arith.divf %350, %351 : vector<2x384xf32>
    %353 = vector.extract_strided_slice %346 {offsets = [0, 384], sizes = [2, 128], strides = [1, 1]} : vector<2x512xf32> to vector<2x128xf32>
    %354 = math.tanh %353 : vector<2x128xf32>
    %355 = vector.extract_strided_slice %352 {offsets = [0, 128], sizes = [2, 128], strides = [1, 1]} : vector<2x384xf32> to vector<2x128xf32>
    %356 = arith.mulf %355, %338 : vector<2x128xf32>
    %357 = vector.extract_strided_slice %352 {offsets = [0, 0], sizes = [2, 128], strides = [1, 1]} : vector<2x384xf32> to vector<2x128xf32>
    %358 = arith.mulf %357, %354 : vector<2x128xf32>
    %359 = arith.addf %356, %358 : vector<2x128xf32>
    %360 = vector.extract_strided_slice %352 {offsets = [0, 256], sizes = [2, 128], strides = [1, 1]} : vector<2x384xf32> to vector<2x128xf32>
    %361 = math.tanh %359 : vector<2x128xf32>
    %362 = arith.mulf %360, %361 : vector<2x128xf32>
    %363 = vector.extract_strided_slice %275 {offsets = [4, 0, 0], sizes = [1, 2, 512], strides = [1, 1, 1]} : vector<8x2x512xf32> to vector<1x2x512xf32>
    %364 = vector.shape_cast %363 : vector<1x2x512xf32> to vector<2x512xf32>
    %365 = arith.truncf %362 : vector<2x128xf32> to vector<2x128xbf16>
    %cst_53 = arith.constant dense<0.000000e+00> : vector<2x512xf32>
    %366 = tpu.matmul %365, %276, %cst_53 {dimension_numbers = #tpu.dot_dimension_numbers<[1], [0], [0], [1], [0, 0, 1, 1], [], []>} : vector<2x128xbf16>, vector<128x512xbf16>, vector<2x512xf32> -> vector<2x512xf32>
    %367 = arith.addf %364, %366 : vector<2x512xf32>
    %368 = vector.extract_strided_slice %367 {offsets = [0, 0], sizes = [2, 384], strides = [1, 1]} : vector<2x512xf32> to vector<2x384xf32>
    %369 = arith.negf %368 : vector<2x384xf32>
    %370 = math.exp %369 : vector<2x384xf32>
    %cst_54 = arith.constant 1.000000e+00 : f32
    %371 = vector.broadcast %cst_54 : f32 to vector<2x384xf32>
    %372 = arith.addf %371, %370 : vector<2x384xf32>
    %373 = arith.divf %371, %372 : vector<2x384xf32>
    %374 = vector.extract_strided_slice %367 {offsets = [0, 384], sizes = [2, 128], strides = [1, 1]} : vector<2x512xf32> to vector<2x128xf32>
    %375 = math.tanh %374 : vector<2x128xf32>
    %376 = vector.extract_strided_slice %373 {offsets = [0, 128], sizes = [2, 128], strides = [1, 1]} : vector<2x384xf32> to vector<2x128xf32>
    %377 = arith.mulf %376, %359 : vector<2x128xf32>
    %378 = vector.extract_strided_slice %373 {offsets = [0, 0], sizes = [2, 128], strides = [1, 1]} : vector<2x384xf32> to vector<2x128xf32>
    %379 = arith.mulf %378, %375 : vector<2x128xf32>
    %380 = arith.addf %377, %379 : vector<2x128xf32>
    %381 = vector.extract_strided_slice %373 {offsets = [0, 256], sizes = [2, 128], strides = [1, 1]} : vector<2x384xf32> to vector<2x128xf32>
    %382 = math.tanh %380 : vector<2x128xf32>
    %383 = arith.mulf %381, %382 : vector<2x128xf32>
    %384 = vector.extract_strided_slice %275 {offsets = [5, 0, 0], sizes = [1, 2, 512], strides = [1, 1, 1]} : vector<8x2x512xf32> to vector<1x2x512xf32>
    %385 = vector.shape_cast %384 : vector<1x2x512xf32> to vector<2x512xf32>
    %386 = arith.truncf %383 : vector<2x128xf32> to vector<2x128xbf16>
    %cst_55 = arith.constant dense<0.000000e+00> : vector<2x512xf32>
    %387 = tpu.matmul %386, %276, %cst_55 {dimension_numbers = #tpu.dot_dimension_numbers<[1], [0], [0], [1], [0, 0, 1, 1], [], []>} : vector<2x128xbf16>, vector<128x512xbf16>, vector<2x512xf32> -> vector<2x512xf32>
    %388 = arith.addf %385, %387 : vector<2x512xf32>
    %389 = vector.extract_strided_slice %388 {offsets = [0, 0], sizes = [2, 384], strides = [1, 1]} : vector<2x512xf32> to vector<2x384xf32>
    %390 = arith.negf %389 : vector<2x384xf32>
    %391 = math.exp %390 : vector<2x384xf32>
    %cst_56 = arith.constant 1.000000e+00 : f32
    %392 = vector.broadcast %cst_56 : f32 to vector<2x384xf32>
    %393 = arith.addf %392, %391 : vector<2x384xf32>
    %394 = arith.divf %392, %393 : vector<2x384xf32>
    %395 = vector.extract_strided_slice %388 {offsets = [0, 384], sizes = [2, 128], strides = [1, 1]} : vector<2x512xf32> to vector<2x128xf32>
    %396 = math.tanh %395 : vector<2x128xf32>
    %397 = vector.extract_strided_slice %394 {offsets = [0, 128], sizes = [2, 128], strides = [1, 1]} : vector<2x384xf32> to vector<2x128xf32>
    %398 = arith.mulf %397, %380 : vector<2x128xf32>
    %399 = vector.extract_strided_slice %394 {offsets = [0, 0], sizes = [2, 128], strides = [1, 1]} : vector<2x384xf32> to vector<2x128xf32>
    %400 = arith.mulf %399, %396 : vector<2x128xf32>
    %401 = arith.addf %398, %400 : vector<2x128xf32>
    %402 = vector.extract_strided_slice %394 {offsets = [0, 256], sizes = [2, 128], strides = [1, 1]} : vector<2x384xf32> to vector<2x128xf32>
    %403 = math.tanh %401 : vector<2x128xf32>
    %404 = arith.mulf %402, %403 : vector<2x128xf32>
    %405 = vector.extract_strided_slice %275 {offsets = [6, 0, 0], sizes = [1, 2, 512], strides = [1, 1, 1]} : vector<8x2x512xf32> to vector<1x2x512xf32>
    %406 = vector.shape_cast %405 : vector<1x2x512xf32> to vector<2x512xf32>
    %407 = arith.truncf %404 : vector<2x128xf32> to vector<2x128xbf16>
    %cst_57 = arith.constant dense<0.000000e+00> : vector<2x512xf32>
    %408 = tpu.matmul %407, %276, %cst_57 {dimension_numbers = #tpu.dot_dimension_numbers<[1], [0], [0], [1], [0, 0, 1, 1], [], []>} : vector<2x128xbf16>, vector<128x512xbf16>, vector<2x512xf32> -> vector<2x512xf32>
    %409 = arith.addf %406, %408 : vector<2x512xf32>
    %410 = vector.extract_strided_slice %409 {offsets = [0, 0], sizes = [2, 384], strides = [1, 1]} : vector<2x512xf32> to vector<2x384xf32>
    %411 = arith.negf %410 : vector<2x384xf32>
    %412 = math.exp %411 : vector<2x384xf32>
    %cst_58 = arith.constant 1.000000e+00 : f32
    %413 = vector.broadcast %cst_58 : f32 to vector<2x384xf32>
    %414 = arith.addf %413, %412 : vector<2x384xf32>
    %415 = arith.divf %413, %414 : vector<2x384xf32>
    %416 = vector.extract_strided_slice %409 {offsets = [0, 384], sizes = [2, 128], strides = [1, 1]} : vector<2x512xf32> to vector<2x128xf32>
    %417 = math.tanh %416 : vector<2x128xf32>
    %418 = vector.extract_strided_slice %415 {offsets = [0, 128], sizes = [2, 128], strides = [1, 1]} : vector<2x384xf32> to vector<2x128xf32>
    %419 = arith.mulf %418, %401 : vector<2x128xf32>
    %420 = vector.extract_strided_slice %415 {offsets = [0, 0], sizes = [2, 128], strides = [1, 1]} : vector<2x384xf32> to vector<2x128xf32>
    %421 = arith.mulf %420, %417 : vector<2x128xf32>
    %422 = arith.addf %419, %421 : vector<2x128xf32>
    %423 = vector.extract_strided_slice %415 {offsets = [0, 256], sizes = [2, 128], strides = [1, 1]} : vector<2x384xf32> to vector<2x128xf32>
    %424 = math.tanh %422 : vector<2x128xf32>
    %425 = arith.mulf %423, %424 : vector<2x128xf32>
    %426 = vector.extract_strided_slice %275 {offsets = [7, 0, 0], sizes = [1, 2, 512], strides = [1, 1, 1]} : vector<8x2x512xf32> to vector<1x2x512xf32>
    %427 = vector.shape_cast %426 : vector<1x2x512xf32> to vector<2x512xf32>
    %428 = arith.truncf %425 : vector<2x128xf32> to vector<2x128xbf16>
    %cst_59 = arith.constant dense<0.000000e+00> : vector<2x512xf32>
    %429 = tpu.matmul %428, %276, %cst_59 {dimension_numbers = #tpu.dot_dimension_numbers<[1], [0], [0], [1], [0, 0, 1, 1], [], []>} : vector<2x128xbf16>, vector<128x512xbf16>, vector<2x512xf32> -> vector<2x512xf32>
    %430 = arith.addf %427, %429 : vector<2x512xf32>
    %431 = vector.extract_strided_slice %430 {offsets = [0, 0], sizes = [2, 384], strides = [1, 1]} : vector<2x512xf32> to vector<2x384xf32>
    %432 = arith.negf %431 : vector<2x384xf32>
    %433 = math.exp %432 : vector<2x384xf32>
    %cst_60 = arith.constant 1.000000e+00 : f32
    %434 = vector.broadcast %cst_60 : f32 to vector<2x384xf32>
    %435 = arith.addf %434, %433 : vector<2x384xf32>
    %436 = arith.divf %434, %435 : vector<2x384xf32>
    %437 = vector.extract_strided_slice %430 {offsets = [0, 384], sizes = [2, 128], strides = [1, 1]} : vector<2x512xf32> to vector<2x128xf32>
    %438 = math.tanh %437 : vector<2x128xf32>
    %439 = vector.extract_strided_slice %436 {offsets = [0, 128], sizes = [2, 128], strides = [1, 1]} : vector<2x384xf32> to vector<2x128xf32>
    %440 = arith.mulf %439, %422 : vector<2x128xf32>
    %441 = vector.extract_strided_slice %436 {offsets = [0, 0], sizes = [2, 128], strides = [1, 1]} : vector<2x384xf32> to vector<2x128xf32>
    %442 = arith.mulf %441, %438 : vector<2x128xf32>
    %443 = arith.addf %440, %442 : vector<2x128xf32>
    %444 = vector.extract_strided_slice %436 {offsets = [0, 256], sizes = [2, 128], strides = [1, 1]} : vector<2x384xf32> to vector<2x128xf32>
    %445 = math.tanh %443 : vector<2x128xf32>
    %446 = arith.mulf %444, %445 : vector<2x128xf32>
    %447 = arith.truncf %446 : vector<2x128xf32> to vector<2x128xbf16>
    %c0_61 = arith.constant 0 : index
    %c0_62 = arith.constant 0 : index
    %448 = vector.load %arg10[%c0_61, %c0_62] : memref<128x128xbf16, #tpu.memory_space<vmem>>, vector<128x128xbf16>
    %cst_63 = arith.constant dense<0.000000e+00> : vector<2x128xf32>
    %449 = tpu.matmul %447, %448, %cst_63 {dimension_numbers = #tpu.dot_dimension_numbers<[1], [0], [0], [1], [0, 0, 1, 1], [], []>} : vector<2x128xbf16>, vector<128x128xbf16>, vector<2x128xf32> -> vector<2x128xf32>
    %c0_64 = arith.constant 0 : index
    %c0_65 = arith.constant 0 : index
    %450 = vector.load %arg11[%c0_64, %c0_65] : memref<1x128xf32, #tpu.memory_space<vmem>>, vector<1x128xf32>
    %451 = vector.broadcast %450 : vector<1x128xf32> to vector<2x128xf32>
    %452 = arith.addf %449, %451 : vector<2x128xf32>
    %c0_66 = arith.constant 0 : index
    %c0_67 = arith.constant 0 : index
    %453 = vector.load %arg12[%c0_66, %c0_67] : memref<2x128xf32, #tpu.memory_space<vmem>>, vector<2x128xf32>
    tpu.vector_store %arg12[%c0_66, %c0_67], %452 {strides = array<i32>} : memref<2x128xf32, #tpu.memory_space<vmem>>, vector<2x128xf32>,
    return
  }
}

</mosaic_0001>

<bundles_post_ra>
// kernel: subword_lstm_forward.1
= control target key start
LH: loop header
LB: loop body
LE: loop exit
PB: predicated region body
PF: predicated region fallthrough
CT: control target
= control target key end

     0   :  { %17 = vsyncpa [#allocation3], 0  ;;  %s6597_s0 = inlined_call_operand.vmem [shape: s32[52,1], index: 0, kind: input, shape index: {}]   ;;  %s6598_s1 = inlined_call_operand.vmem [shape: bf16[39,128], index: 1, kind: input, shape index: {}]   ;;  %s6599_s2 = inlined_call_operand.hbm [shape: bf16[384,128], index: 2, kind: input, shape index: {}]   ;;  %s6600_s3 = inlined_call_operand.vmem [shape: f32[1,128], index: 3, kind: input, shape index: {}]   ;;  %s6601_s4 = inlined_call_operand.hbm [shape: bf16[128,512], index: 4, kind: input, shape index: {}]   ;;  %s6602_s5 = inlined_call_operand.hbm [shape: bf16[128,512], index: 5, kind: input, shape index: {}]   ;;  %s6603_s6 = inlined_call_operand.vmem [shape: f32[1,512], index: 6, kind: input, shape index: {}]   ;;  %s6604_s7 = inlined_call_operand.hbm [shape: bf16[128,512], index: 7, kind: input, shape index: {}]   ;;  %s6605_s8 = inlined_call_operand.hbm [shape: bf16[128,512], index: 8, kind: input, shape index: {}]   ;;  %s6606_s9 = inlined_call_operand.vmem [shape: f32[1,512], index: 9, kind: input, shape index: {}]   ;;  %s6607_s10 = inlined_call_operand.vmem [shape: bf16[128,128], index: 10, kind: input, shape index: {}]   ;;  %s6608_s11 = inlined_call_operand.vmem [shape: f32[1,128], index: 11, kind: input, shape index: {}]   ;;  %s6609_s12 = inlined_call_operand.hbm [shape: f32[2,128], index: 12, kind: output, shape index: {}]  }
   0x1   :  { %18 = vsyncpa [#allocation6], 0 }
   0x2   :  { %19 = vsyncpa [#allocation9], 0 }
   0x3   :  { %20 = vsyncpa [#allocation4], 0  ;;  %s5291_s21 = smov [#allocation5]   ;;  %s5151_s25 = scalar_lea.hbm %s6601_s4, 4096 }
   0x4   :  { %s44_s22 = sshll.u32 %s5291_s21, 4  ;;  %p5152_p0 = scmp.ne.s32.totalorder %s6601_s4, %s5151_s25  ;;  %s45_s22 = int_to_ptr.vmem [resolvable:$true] %s44_s22 }
   0x5   :  { %p5155_p1 = scmp.lt.u32.totalorder %s5151_s25, %s6601_s4 }
   0x7   :  { %p5157_p2 = pnand %p5155_p1, %p5152_p0 }
   0x9   :  { %5160 = shalt.err (!%p5157_p2)
}
   0xa   :  { %s5161_s30 = scalar_lea.vmem %s45_s22, 4096  ;;  %p5166_p4 = scmp.lt.s32.totalorder %s45_s22, %s45_s22 }
   0xb   :  { %p5162_p3 = scmp.ne.s32.totalorder %s45_s22, %s5161_s30  ;;  %p5167_p5 = scmp.lt.s32.totalorder %s5161_s30, %s5161_s30 }
   0xd   :  { %p5168_p6 = por %p5167_p5, %p5166_p4 }
   0xf   :  { %p5169_p7 = pnand %p5168_p6, %p5162_p3 }
  0x11   :  { %5172 = shalt.err (!%p5169_p7)
}
  0x12   :  { %s5292_s13 = smov 256   ;;  %s5293_s14 = smov 16  }
  0x13   :  { %50 = dma.hbm_to_vmem [thread:$0]  %s6601_s4, 4096, %s45_s22, [#allocation6], %s5292_s13, %s5292_s13, %s5293_s14  }
  0x14   :  { %s5294_s17 = smov [#allocation8]   ;;  %s5295_s19 = smov [#allocation2]  }
  0x15   :  { %s70_s18 = sshll.u32 %s5294_s17, 4  ;;  %s30_s20 = sshll.u32 %s5295_s19, 4  ;;  %s71_s18 = int_to_ptr.vmem [resolvable:$true] %s70_s18  ;;  %s31_s20 = int_to_ptr.vmem [resolvable:$true] %s30_s20 }
  0x16   :  { %s5173_s24 = scalar_lea.hbm %s6604_s7, 4096 }
  0x17   :  { %p5174_p8 = scmp.ne.s32.totalorder %s6604_s7, %s5173_s24  ;;  %p5177_p9 = scmp.lt.u32.totalorder %s5173_s24, %s6604_s7 }
  0x19   :  { %p5179_p10 = pnand %p5177_p9, %p5174_p8 }
  0x1b   :  { %5182 = shalt.err (!%p5179_p10)
}
  0x1c   :  { %s5183_s4 = scalar_lea.vmem %s71_s18, 4096  ;;  %p5188_p12 = scmp.lt.s32.totalorder %s71_s18, %s71_s18 }
  0x1d   :  { %p5184_p11 = scmp.ne.s32.totalorder %s71_s18, %s5183_s4  ;;  %p5189_p13 = scmp.lt.s32.totalorder %s5183_s4, %s5183_s4 }
  0x1f   :  { %p5190_p0 = por %p5189_p13, %p5188_p12 }
  0x21   :  { %p5191_p1 = pnand %p5190_p0, %p5184_p11 }
  0x23   :  { %5194 = shalt.err (!%p5191_p1)
}
  0x24   :  { %76 = dma.hbm_to_vmem [thread:$0]  %s6604_s7, 4096, %s71_s18, [#allocation9], %s5292_s13, %s5292_s13, %s5293_s14  }
  0x25   :  { %s5195_s16 = scalar_lea.hbm %s6599_s2, 3072 }
  0x26   :  { %p5196_p2 = scmp.ne.s32.totalorder %s6599_s2, %s5195_s16  ;;  %p5199_p3 = scmp.lt.u32.totalorder %s5195_s16, %s6599_s2 }
  0x28   :  { %p5201_p4 = pnand %p5199_p3, %p5196_p2 }
  0x2a   :  { %5204 = shalt.err (!%p5201_p4)
}
  0x2b   :  { %s5205_s24 = scalar_lea.vmem %s31_s20, 3072  ;;  %p5210_p6 = scmp.lt.s32.totalorder %s31_s20, %s31_s20 }
  0x2c   :  { %p5206_p5 = scmp.ne.s32.totalorder %s31_s20, %s5205_s24  ;;  %p5211_p7 = scmp.lt.s32.totalorder %s5205_s24, %s5205_s24 }
  0x2e   :  { %p5212_p8 = por %p5211_p7, %p5210_p6 }
  0x30   :  { %p5213_p9 = pnand %p5212_p8, %p5206_p5 }
  0x32   :  { %5216 = shalt.err (!%p5213_p9)
}
  0x33   :  { %s5296_s7 = smov 64   ;;  %s5297_s18 = smov 4  }
  0x34   :  { %36 = dma.hbm_to_vmem [thread:$0]  %s6599_s2, 3072, %s31_s20, [#allocation3], %s5296_s7, %s5296_s7, %s5297_s18  }
  0x35   :  { %s5298_s27 = smov [#allocation7]   ;;  %s5299_s4 = smov [#allocation10]  }
  0x36   :  { %s56_s28 = sshll.u32 %s5298_s27, 4  ;;  %s82_s22 = sshll.u32 %s5299_s4, 4  ;;  %s57_s28 = int_to_ptr.vmem [resolvable:$true] %s56_s28  ;;  %s83_s22 = int_to_ptr.vmem [resolvable:$true] %s82_s22 }
  0x37   :  { %s5217_s15 = scalar_lea.hbm %s6602_s5, 4096 }
  0x38   :  { %p5218_p10 = scmp.ne.s32.totalorder %s6602_s5, %s5217_s15  ;;  %p5221_p11 = scmp.lt.u32.totalorder %s5217_s15, %s6602_s5 }
  0x3a   :  { %p5223_p12 = pnand %p5221_p11, %p5218_p10 }
  0x3c   :  { %5226 = shalt.err (!%p5223_p12)
}
  0x3d   :  { %s5227_s2 = scalar_lea.vmem %s57_s28, 4096  ;;  %p5232_p0 = scmp.lt.s32.totalorder %s57_s28, %s57_s28 }
  0x3e   :  { %p5228_p13 = scmp.ne.s32.totalorder %s57_s28, %s5227_s2  ;;  %p5233_p1 = scmp.lt.s32.totalorder %s5227_s2, %s5227_s2 }
  0x40   :  { %p5234_p2 = por %p5233_p1, %p5232_p0 }
  0x42   :  { %p5235_p3 = pnand %p5234_p2, %p5228_p13 }
  0x44   :  { %5238 = shalt.err (!%p5235_p3)
}
  0x45   :  { %62 = dma.hbm_to_vmem [thread:$0]  %s6602_s5, 4096, %s57_s28, [#allocation6], %s5292_s13, %s5292_s13, %s5293_s14  }
  0x46   :  { %s5239_s18 = scalar_lea.hbm %s6605_s8, 4096 }
  0x47   :  { %p5240_p4 = scmp.ne.s32.totalorder %s6605_s8, %s5239_s18  ;;  %p5243_p5 = scmp.lt.u32.totalorder %s5239_s18, %s6605_s8 }
  0x49   :  { %p5245_p6 = pnand %p5243_p5, %p5240_p4 }
  0x4b   :  { %5248 = shalt.err (!%p5245_p6)
}
  0x4c   :  { %s5249_s29 = scalar_lea.vmem %s83_s22, 4096  ;;  %p5254_p8 = scmp.lt.s32.totalorder %s83_s22, %s83_s22 }
  0x4d   :  { %p5250_p7 = scmp.ne.s32.totalorder %s83_s22, %s5249_s29  ;;  %p5255_p9 = scmp.lt.s32.totalorder %s5249_s29, %s5249_s29 }
  0x4f   :  { %p5256_p10 = por %p5255_p9, %p5254_p8 }
  0x51   :  { %p5257_p11 = pnand %p5256_p10, %p5250_p7 }
  0x53   :  { %5260 = shalt.err (!%p5257_p11)
}
  0x54   :  { %88 = dma.hbm_to_vmem [thread:$0]  %s6605_s8, 4096, %s83_s22, [#allocation9], %s5292_s13, %s5292_s13, %s5293_s14  }
  0x55   :  { %5283 = dma.done.wait [#allocation3], 3072  }
  0x56   :  { %5284 = vsyncadd [#allocation3], 4294964224 }
  0x57   :  { %5285 = dma.done.wait [#allocation6], 8192  }
  0x58   :  { %5286 = vsyncadd [#allocation6], 4294959104 }
  0x59   :  { %5287 = dma.done.wait [#allocation9], 8192  }
  0x5a   :  { %5288 = vsyncadd [#allocation9], 4294959104  ;;  %v5300_v0 = vmov 0   ;;  %v113_v1 = vld [vmem:[%s6597_s0 + $0x10] sm:$0xff]  ;;  %v111_v2 = vld [vmem:[%s6597_s0] sm:$0xff]  ;;  %vm192_vm0 = vcmask 1042432   ;;  %v118_v22 = vlaneseq }
  0x5b   :  { %4757 = vset.pattern.permute.xlu1 %v5300_v0  ;;  %4756 = vset.pattern.permute.xlu0 %v5300_v0  ;;  %v114_v3 = vld [vmem:[%s6597_s0 + $0x18] sm:$0xff]  ;;  %v112_v4 = vld [vmem:[%s6597_s0 + $0x8] sm:$0xff]  ;;  %v4758_v5 = vld [vmem:[%s6598_s1] sm:$0xff]   ;;  %vm193_vm1 = vcmask 1043456   ;;  %v5301_v10 = vmov 65535   ;;  %v6610_v15 = vmov 0.0  }
  0x5c   :  { %127 = vperm.xlu1 %4757, %v113_v1   ;;  %121 = vperm.xlu0 %4756, %v111_v2   ;;  %v116_v6 = vld [vmem:[%s6597_s0 + $0x28] sm:$0xff]  ;;  %v115_v7 = vld [vmem:[%s6597_s0 + $0x20] sm:$0xff]  ;;  %v4760_v9 = vld [vmem:[%s6598_s1 + $0x10] ss:$0 sps:$4 sm:$0xff]   ;;  %v194_v11 = vsel %vm192_vm0, 4294967295, %v5301_v10  ;;  %v119_v23 = vand.u32 127, %v118_v22 }
  0x5d   :  { %v4759_v8 = vld [vmem:[%s6598_s1 + $0x8] sm:$0xff]   ;;  %v195_v12 = vsel %vm193_vm1, %v194_v11, 0  ;;  %4679 = vmatprep.subr.bf16.mxu0 %v4758_v5  ;;  %v117_v13 = vld [vmem:[%s6597_s0 + $0x30] sm:$0xf]  ;;  %v4762_v16 = vld [vmem:[#allocation2 + $0x40] sm:$0xff]   ;;  %vm179_vm6 = vcmask 318464  }
  0x5e   :  { %4680 = vmatpush3.bf16.msra.mxu0 %v4758_v5  ;;  %v197_v14 = vand.u32 %v4760_v9, %v195_v12  ;;  %v4763_v17 = vld [vmem:[#allocation2] sm:$0xff]   ;;  %v4765_v18 = vld [vmem:[#allocation2 + $0x48] sm:$0xff]   ;;  %4625 = vmatprep.subr.bf16.mxu1 %v4762_v16  ;;  %v4768_v20 = vld [vmem:[#allocation2 + $0x50] sm:$0xff]   ;;  %vm5303_vm10 = vmmov 0   ;;  %v5304_v60 = vmov 1983009808  }
  0x5f   :  { %4681 = vmatprep.subr.bf16.mxu0 %v4759_v8  ;;  %v4766_v19 = vld [vmem:[#allocation2 + $0x8] sm:$0xff]   ;;  %4626 = vmatpush3.bf16.msra.mxu1 %v4763_v17  ;;  %v4769_v21 = vld [vmem:[#allocation2 + $0x10] sm:$0xff]   ;;  %v4761_v34 = vld [vmem:[#allocation2 + $0x80] sm:$0xff]   ;;  %v272_v61 = vunpack.c.l.s4 %v5304_v60  ;;  %v5499_v63 = vshrl.u32 %v118_v22, 7  ;;  %vm502_vm11 = vcmask 1046528   ;;  %vm1014_vm12 = vcmask 1043459  }
  0x60   :  { %130 = vperm.xlu1 %4757, %v114_v3   ;;  %124 = vperm.xlu0 %4756, %v112_v4   ;;  %v4764_v40 = vld [vmem:[#allocation2 + $0x88] sm:$0xff]   ;;  %v4767_v44 = vld [vmem:[#allocation2 + $0x90] sm:$0xff]   ;;  %v4770_v45 = vld [vmem:[#allocation2 + $0x98] sm:$0xff]   ;;  %vm1010_vm13 = vcmask 1041409   ;;  %vm1021_vm14 = vcmask 1045509   ;;  %vm1051_vm15 = vcmask 1041408  }
  0x61   :  { %4627 = vmatprep.subr.bf16.mxu1 %v4765_v18  ;;  %v4771_v46 = vld [vmem:[#allocation2 + $0x58] sm:$0xff]   ;;  %v4773_v48 = vld [vmem:[#allocation2 + $0xa0] sm:$0xff]   ;;  %v4776_v51 = vld [vmem:[#allocation2 + $0xa8] sm:$0xff]   ;;  %v273_v62 = vunpack.c.0.s8 %v272_v61  ;;  %vm1028_vm0 = vcmask 1047559   ;;  %s5305_s18 = smov [#allocation11]  }
  0x62   :  { %4682 = vmatpush3.bf16.msra.mxu0 %v4759_v8  ;;  %v4772_v47 = vld [vmem:[#allocation2 + $0x18] sm:$0xff]   ;;  %v4774_v49 = vld [vmem:[#allocation2 + $0x60] sm:$0xff]   ;;  %v4777_v52 = vld [vmem:[#allocation2 + $0x68] sm:$0xff]   ;;  %s4422_s25 = sshll.u32 %s5305_s18, 4  ;;  %s4423_s25 = int_to_ptr.vmem [resolvable:$true] %s4422_s25 }
  0x63   :  { %4683 = vmatprep.subr.bf16.mxu0 %v197_v14  ;;  %4628 = vmatpush3.bf16.msra.mxu1 %v4766_v19  ;;  %v4775_v50 = vld [vmem:[#allocation2 + $0x20] sm:$0xff]   ;;  %v4778_v53 = vld [vmem:[#allocation2 + $0x28] sm:$0xff]   ;;  %v4779_v54 = vld [vmem:[#allocation2 + $0xb0] sm:$0xff]   ;;  %v5502_v1 = vsub.s32 %v273_v62, %v5499_v63  ;;  %s5261_s26 = scalar_lea.vmem %s4423_s25, 32  ;;  %p5266_p13 = scmp.lt.s32.totalorder %s4423_s25, %s4423_s25 }
  0x64   :  { %136 = vperm.xlu1 %4757, %v116_v6   ;;  %133 = vperm.xlu0 %4756, %v115_v7   ;;  %v4780_v55 = vld [vmem:[#allocation2 + $0x70] sm:$0xff]   ;;  %v4782_v57 = vld [vmem:[#allocation2 + $0xb8] sm:$0xff]   ;;  %p5262_p12 = scmp.ne.s32.totalorder %s4423_s25, %s5261_s26  ;;  %p5267_p0 = scmp.lt.s32.totalorder %s5261_s26, %s5261_s26 }
  0x65   :  { %4629 = vmatprep.subr.bf16.mxu1 %v4768_v20  ;;  %v4781_v56 = vld [vmem:[#allocation2 + $0x30] sm:$0xff]   ;;  %v4783_v58 = vld [vmem:[#allocation2 + $0x78] sm:$0xff]  }
  0x66   :  { %4684 = vmatpush3.bf16.msra.mxu0 %v197_v14  ;;  %v4784_v59 = vld [vmem:[#allocation2 + $0x38] sm:$0xff]   ;;  %p5268_p1 = por %p5267_p0, %p5266_p13 }
  0x67   :  { %4693 = vmatprep.subr.bf16.mxu0 %v6610_v15  ;;  %4630 = vmatpush3.bf16.msra.mxu1 %v4769_v21 }
  0x68   :  { %139 = vperm.xlu0 %4756, %v117_v13   ;;  %4631 = vmatprep.subr.bf16.mxu1 %v4771_v46  ;;  %p5269_p2 = pnand %p5268_p1, %p5262_p12 }
  0x6b   :  { %4632 = vmatpush3.bf16.msra.mxu1 %v4772_v47 }
  0x6c   :  { %4633 = vmatprep.subr.bf16.mxu1 %v4774_v49 }
  0x6f   :  { %4634 = vmatpush3.bf16.msra.mxu1 %v4775_v50 }
  0x70   :  { %4635 = vmatprep.subr.bf16.mxu1 %v4777_v52 }
  0x73   :  { %4636 = vmatpush3.bf16.msra.mxu1 %v4778_v53 }
  0x74   :  { %4637 = vmatprep.subr.bf16.mxu1 %v4780_v55 }
  0x77   :  { %4638 = vmatpush3.bf16.msra.mxu1 %v4781_v56 }
  0x78   :  { %4639 = vmatprep.subr.bf16.mxu1 %v4783_v58 }
  0x7b   :  { %4640 = vmatpush3.bf16.msra.mxu1 %v4784_v59 }
  0xdb   :  { %v128_v24 = vpop.permute.xlu1 %127  ;;  %v122_v25 = vpop.permute.xlu0 %121 }
  0xdc   :  { %vm143_vm2 = vcmp.eq.s32.totalorder %v128_v24, %v119_v23  ;;  %vm141_vm3 = vcmp.eq.s32.totalorder %v122_v25, %v119_v23 }
  0xdd   :  { %v150_v28 = vsel %vm143_vm2, 1.0, %v6610_v15  ;;  %v148_v29 = vsel %vm141_vm3, 1.0, %v6610_v15  ;;  %vm1054_vm2 = vcmask 1045504  }
  0xdf   :  { %v131_v26 = vpop.permute.xlu1 %130  ;;  %v125_v27 = vpop.permute.xlu0 %124 }
  0xe0   :  { %vm144_vm4 = vcmp.eq.s32.totalorder %v131_v26, %v119_v23  ;;  %vm142_vm5 = vcmp.eq.s32.totalorder %v125_v27, %v119_v23 }
  0xe1   :  { %v151_v30 = vsel %vm144_vm4, 1.0, %v6610_v15  ;;  %v149_v31 = vsel %vm142_vm5, 1.0, %v6610_v15 }
  0xe2   :  { %v156_v32 = vpack.c.bf16 %v151_v30, %v150_v28  ;;  %v155_v33 = vpack.c.bf16 %v149_v31, %v148_v29 }
  0xe3   :  { %v137_v35 = vpop.permute.xlu1 %136  ;;  %v134_v36 = vpop.permute.xlu0 %133 }
  0xe4   :  { %vm146_vm7 = vcmp.eq.s32.totalorder %v137_v35, %v119_v23  ;;  %vm145_vm8 = vcmp.eq.s32.totalorder %v134_v36, %v119_v23  ;;  %4685 = vmatprep.mubr.msk.bf16.mxu0 %vm179_vm6, %v155_v33 }
  0xe5   :  { %v153_v37 = vsel %vm146_vm7, 1.0, %v6610_v15  ;;  %v152_v38 = vsel %vm145_vm8, 1.0, %v6610_v15  ;;  %4686 = vmatmul.mubr.msk.bf16.vlgmr.msra.gmra.mrb[0].mxu0 %vm179_vm6, %v156_v32 }
  0xe6   :  { %v157_v39 = vpack.c.bf16 %v153_v37, %v152_v38  ;;  %4694 = vmatpush3.bf16.msra.mxu0 %v4761_v34 }
  0xe7   :  { %v140_v41 = vpop.permute.xlu0 %139  ;;  %4695 = vmatprep.subr.bf16.mxu0 %v6610_v15 }
  0xe8   :  { %vm147_vm9 = vcmp.eq.s32.totalorder %v140_v41, %v119_v23  ;;  %4689 = vmatprep.mubr.msk.bf16.mxu0 %vm179_vm6, %v157_v39 }
  0xe9   :  { %v154_v42 = vsel %vm147_vm9, 1.0, %v6610_v15 }
  0xea   :  { %v158_v43 = vpack.c.bf16 %v154_v42, %v154_v42  ;;  %4696 = vmatpush3.bf16.msra.mxu0 %v4764_v40 }
  0xeb   :  { %4697 = vmatprep.subr.bf16.mxu0 %v6610_v15 }
  0xed   :  { %4690 = vmatmul.mubr.msk.bf16.gmra.mrb[4].mxu0 %vm179_vm6, %v158_v43 }
  0xee   :  { %4698 = vmatpush3.bf16.msra.mxu0 %v4767_v44  ;;  %4709 = vmatprep.mubr.msk.bf16.mxu0 %vm5303_vm10, %v6610_v15 }
  0xef   :  { %4699 = vmatprep.subr.bf16.mxu0 %v6610_v15 }
  0xf2   :  { %4700 = vmatpush3.bf16.msra.mxu0 %v4770_v45 }
  0xf3   :  { %4701 = vmatprep.subr.bf16.mxu0 %v6610_v15 }
  0xf6   :  { %4702 = vmatpush3.bf16.msra.mxu0 %v4773_v48 }
  0xf7   :  { %4703 = vmatprep.subr.bf16.mxu0 %v6610_v15 }
  0xfa   :  { %4704 = vmatpush3.bf16.msra.mxu0 %v4776_v51 }
  0xfb   :  { %4705 = vmatprep.subr.bf16.mxu0 %v6610_v15 }
  0xfe   :  { %4706 = vmatpush3.bf16.msra.mxu0 %v4779_v54 }
  0xff   :  { %4707 = vmatprep.subr.bf16.mxu0 %v6610_v15 }
 0x102   :  { %4708 = vmatpush3.bf16.msra.mxu0 %v4782_v57 }
 0x1b8   :  { %v4687_v2 = vpop.f32.mrb[0].mxu0 }
 0x1b9   :  { %v304_v3 = vcombine.high %v4687_v2, %v4687_v2  ;;  %v311_v4 = vrot.slane %v4687_v2, %v5502_v1  ;;  %v233_v5 = vpop.f32.mrb[1].mxu0 }
 0x1ba   :  { %v270_v6 = vcombine.high %v233_v5, %v233_v5  ;;  %v277_v7 = vrot.slane %v233_v5, %v5502_v1  ;;  %v4688_v8 = vpop.f32.mrb[2].mxu0 }
 0x1bb   :  { %v5507_v9 = vrot.slane %v304_v3, %v5502_v1  ;;  %v5509_v10 = vcombine.high %v311_v4, %v311_v4  ;;  %v321_v11 = vcombine.high %v4688_v8, %v4688_v8  ;;  %v5512_v12 = vrot.slane %v4688_v8, %v5502_v1  ;;  %v236_v13 = vpop.f32.mrb[3].mxu0 }
 0x1bc   :  { %v284_v14 = vrot.slane %v270_v6, %v5502_v1  ;;  %v285_v16 = vcombine.high %v277_v7, %v277_v7  ;;  %v287_v17 = vcombine.high %v236_v13, %v236_v13  ;;  %v294_v21 = vrot.slane %v236_v13, %v5502_v1 }
 0x1bd   :  { %v5517_v18 = vcombine.high %v5507_v9, %v5507_v9  ;;  %v414_v19 = vcombine.low %v311_v4, %v5509_v10  ;;  %v5521_v20 = vrot.slane %v321_v11, %v5502_v1  ;;  %v336_v25 = vcombine.high %v5512_v12, %v5512_v12 }
 0x1be   :  { %v286_v22 = vcombine.high %v284_v14, %v284_v14  ;;  %v380_v23 = vcombine.low %v277_v7, %v285_v16  ;;  %v523_v24 = vcombine.low %v285_v16, %v284_v14  ;;  %v557_v27 = vcombine.low %v5509_v10, %v5507_v9 }
 0x1bf   :  { %v415_v26 = vcombine.low %v5507_v9, %v5517_v18  ;;  %v5532_v28 = vcombine.high %v5521_v20, %v5521_v20  ;;  %v494_v29 = vrot.slane %v5512_v12, %v5502_v1  ;;  %v422_v30 = vrot.slane %v414_v19, %v5502_v1 }
 0x1c0   :  { %v381_v31 = vcombine.low %v284_v14, %v286_v22  ;;  %v388_v32 = vrot.slane %v380_v23, %v5502_v1  ;;  %v431_v33 = vcombine.low %v336_v25, %v5521_v20  ;;  %v4691_v34 = vpop.f32.mrb[4].mxu0  ;;  %v531_v35 = vrot.slane %v523_v24, %v5502_v1 }
 0x1c1   :  { %v5540_v36 = vrot.slane %v494_v29, 1  ;;  %v558_v37 = vcombine.low %v5517_v18, %v5512_v12  ;;  %v301_v38 = vrot.slane %v287_v17, %v5502_v1  ;;  %v249_v39 = vpop.f32.mrb[5].mxu0  ;;  %v574_v40 = vcombine.low %v5521_v20, %v5532_v28 }
 0x1c2   :  { %v302_v41 = vcombine.high %v294_v21, %v294_v21  ;;  %v524_v42 = vcombine.low %v286_v22, %v294_v21  ;;  %v5548_v43 = vrot.slane %v4691_v34, %v5502_v1  ;;  %v4692_v44 = vpop.f32.mrb[6].mxu0  ;;  %v439_v45 = vrot.slane %v431_v33, %v5502_v1 }
 0x1c3   :  { %v303_v46 = vcombine.high %v301_v38, %v301_v38  ;;  %v338_v47 = vcombine.high %v249_v39, %v249_v39  ;;  %v345_v48 = vrot.slane %v249_v39, %v5502_v1  ;;  %v252_v49 = vpop.f32.mrb[7].mxu0  ;;  %v395_v57 = vrot.slane %v381_v31, %v5502_v1 }
 0x1c4   :  { %v397_v50 = vcombine.low %v294_v21, %v302_v41  ;;  %v538_v51 = vrot.slane %v524_v42, %v5502_v1  ;;  %v540_v52 = vcombine.low %v302_v41, %v301_v38  ;;  %v5555_v53 = vcombine.high %v5548_v43, %v5548_v43 }
 0x1c5   :  { %v541_v54 = vcombine.low %v303_v46, %v311_v4  ;;  %v352_v55 = vrot.slane %v338_v47, %v5502_v1  ;;  %v353_v56 = vcombine.high %v345_v48, %v345_v48  ;;  %v398_v58 = vcombine.low %v301_v38, %v303_v46 }
 0x1c6   :  { %v405_v59 = vrot.slane %v397_v50, %v5502_v1  ;;  %v539_v60 = vcombine.low %v531_v35, %v538_v51  ;;  %v501_v61 = vrot.slane %v5555_v53, %v5502_v1  ;;  %v548_v62 = vrot.slane %v540_v52, %v5502_v1 }
 0x1c7   :  { %v555_v2 = vrot.slane %v541_v54, %v5502_v1  ;;  %v354_v3 = vcombine.high %v352_v55, %v352_v55  ;;  %v432_v5 = vcombine.low %v5532_v28, %v345_v48  ;;  %v609_v6 = vcombine.low %v5548_v43, %v5555_v53 }
 0x1c8   :  { %v5565_v4 = vrot.slane %v501_v61, 1  ;;  %v448_v7 = vcombine.low %v353_v56, %v352_v55  ;;  %v355_v8 = vcombine.high %v252_v49, %v252_v49  ;;  %v575_v13 = vcombine.low %v345_v48, %v353_v56 }
 0x1c9   :  { %v556_v11 = vcombine.low %v548_v62, %v555_v2  ;;  %v446_v12 = vrot.slane %v432_v5, %v5502_v1  ;;  %v591_v14 = vcombine.low %v352_v55, %v354_v3  ;;  %v362_v17 = vrot.slane %v252_v49, %v5502_v1 }
 0x1ca   :  { %v456_v16 = vrot.slane %v448_v7, %v5502_v1  ;;  %v369_v18 = vrot.slane %v355_v8, %v5502_v1  ;;  %v396_v19 = vcombine.low %v388_v32, %v395_v57  ;;  %v412_v23 = vrot.slane %v398_v58, %v5502_v1  ;;  %v4787_v8 = vld [vmem:[#allocation5 + $0x4] ss:$16 sps:$4 sm:$0xff]  }
 0x1cb   :  { %v447_v21 = vcombine.low %v439_v45, %v446_v12  ;;  %v633_v22 = vpack.c.bf16 %v556_v11, %v539_v60  ;;  %v429_v24 = vrot.slane %v415_v26, %v5502_v1  ;;  %v370_v25 = vcombine.high %v362_v17, %v362_v17  ;;  %v4790_v11 = vld [vmem:[#allocation5 + $0xc] ss:$16 sps:$4 sm:$0xff]   ;;  %v4785_v12 = vld [vmem:[#allocation5] ss:$16 sps:$4 sm:$0xff]   ;;  %1274 = vmatprep.subr.bf16.mxu1 %v4787_v8 }
 0x1cc   :  { %v371_v29 = vcombine.high %v369_v18, %v369_v18  ;;  %v449_v31 = vcombine.low %v354_v3, %v362_v17  ;;  %v503_v33 = vrot.slane %v396_v19, 1  ;;  %v413_v34 = vcombine.low %v405_v59, %v412_v23  ;;  %1317 = vmatprep.subr.bf16.mxu0 %v4790_v11  ;;  %v4805_v23 = vld [vmem:[#allocation5 + $0x64] ss:$16 sps:$4 sm:$0xff]  }
 0x1cd   :  { %4710 = vmatmul.mubr.bf16.vlgmr.msra.gmra.mrb[8].mxu0 %v633_v22  ;;  %v430_v35 = vcombine.low %v422_v30, %v429_v24  ;;  %v565_v38 = vrot.slane %v557_v27, %v5502_v1  ;;  %v572_v32 = vrot.slane %v558_v37, %v5502_v1  ;;  %v465_v41 = vcombine.low %v370_v25, %v369_v18  ;;  %v4800_v22 = vld [vmem:[#allocation5 + $0x48] ss:$16 sps:$4 sm:$0xff]   ;;  %v4808_v24 = vld [vmem:[#allocation5 + $0x6c] ss:$16 sps:$4 sm:$0xff]  }
 0x1ce   :  { %v463_v39 = vrot.slane %v449_v31, %v5502_v1  ;;  %v466_v42 = vcombine.low %v371_v29, %v5548_v43  ;;  %v592_v26 = vcombine.low %v362_v17, %v370_v25  ;;  %4713 = vmatprep.mubr.msk.bf16.mxu0 %vm5303_vm10, %v6610_v15  ;;  %v608_v44 = vcombine.low %v369_v18, %v371_v29  ;;  %v4794_v17 = vld [vmem:[#allocation5 + $0x28] ss:$16 sps:$4 sm:$0xff]   ;;  %v4799_v18 = vld [vmem:[#allocation5 + $0x44] ss:$16 sps:$4 sm:$0xff]   ;;  %v4803_v25 = vld [vmem:[#allocation5 + $0x60] ss:$16 sps:$4 sm:$0xff]  }
 0x1cf   :  { %v504_v45 = vrot.slane %v413_v34, 1  ;;  %v506_v46 = vrot.slane %v430_v35, 1  ;;  %v631_v30 = vpack.c.bf16 %v413_v34, %v396_v19  ;;  %v473_v48 = vrot.slane %v465_v41, %v5502_v1  ;;  %v4802_v19 = vld [vmem:[#allocation5 + $0x4c] ss:$16 sps:$4 sm:$0xff]   ;;  %v4806_v29 = vld [vmem:[#allocation5 + $0x68] ss:$16 sps:$4 sm:$0xff]  }
 0x1d0   :  { %v464_v47 = vcombine.low %v456_v16, %v463_v39  ;;  %v480_v9 = vrot.slane %v466_v42, %v5502_v1  ;;  %v573_v10 = vcombine.low %v565_v38, %v572_v32  ;;  %v582_v43 = vrot.slane %v574_v40, %v5502_v1  ;;  %v4791_v16 = vld [vmem:[#allocation5 + $0x20] ss:$16 sps:$4 sm:$0xff]   ;;  %v4811_v31 = vld [vmem:[#allocation5 + $0x84] ss:$16 sps:$4 sm:$0xff]   ;;  %v4820_v32 = vld [vmem:[#allocation5 + $0xac] ss:$16 sps:$4 sm:$0xff]  }
 0x1d1   :  { %v505_v27 = vsel %vm502_vm11, %v503_v33, %v504_v45  ;;  %v507_v37 = vsel %vm502_vm11, %v504_v45, %v506_v46  ;;  %v589_v49 = vrot.slane %v575_v13, %v5502_v1  ;;  %v509_v51 = vsel %vm502_vm11, %v506_v46, %v5540_v36  ;;  %v4788_v13 = vld [vmem:[#allocation5 + $0x8] ss:$16 sps:$4 sm:$0xff]   ;;  %v4814_v33 = vld [vmem:[#allocation5 + $0x8c] ss:$16 sps:$4 sm:$0xff]   ;;  %v4809_v34 = vld [vmem:[#allocation5 + $0x80] ss:$16 sps:$4 sm:$0xff]  }
 0x1d2   :  { %v632_v50 = vpack.c.bf16 %v507_v37, %v505_v27  ;;  %v510_v52 = vrot.slane %v447_v21, 1  ;;  %v511_v53 = vrot.slane %v464_v47, 1  ;;  %v634_v55 = vpack.c.bf16 %v447_v21, %v430_v35  ;;  %1318 = vmatpush1.bf16.msra.mxu0 %v4788_v13  ;;  %v4797_v21 = vld [vmem:[#allocation5 + $0x40] ss:$16 sps:$4 sm:$0xff]   ;;  %v4812_v35 = vld [vmem:[#allocation5 + $0x88] ss:$16 sps:$4 sm:$0xff]  }
 0x1d3   :  { %v590_v54 = vcombine.low %v582_v43, %v589_v49  ;;  %v481_v56 = vcombine.low %v473_v48, %v480_v9  ;;  %v599_v57 = vrot.slane %v591_v14, %v5502_v1  ;;  %v623_v58 = vrot.slane %v609_v6, %v5502_v1  ;;  %v4796_v14 = vld [vmem:[#allocation5 + $0x2c] ss:$16 sps:$4 sm:$0xff]   ;;  %v4817_v38 = vld [vmem:[#allocation5 + $0xa4] ss:$16 sps:$4 sm:$0xff]   ;;  %v4815_v39 = vld [vmem:[#allocation5 + $0xa0] ss:$16 sps:$4 sm:$0xff]  }
 0x1d4   :  { %871 = vmatprep.mubr.bf16.mxu1 %v632_v50  ;;  %v512_v59 = vsel %vm502_vm11, %v510_v52, %v511_v53  ;;  %v606_v20 = vrot.slane %v592_v26, %v5502_v1  ;;  %v616_v28 = vrot.slane %v608_v44, %v5502_v1  ;;  %1319 = vmatprep.subr.bf16.mxu0 %v4796_v14  ;;  %v4818_v41 = vld [vmem:[#allocation5 + $0xa8] ss:$16 sps:$4 sm:$0xff]   ;;  %v4823_v42 = vld [vmem:[#allocation5 + $0xc4] ss:$16 sps:$4 sm:$0xff]   ;;  %v4821_v26 = vld [vmem:[#allocation5 + $0xc0] ss:$16 sps:$4 sm:$0xff]  }
 0x1d5   :  { %872 = vmatmul.mubr.bf16.vlgmr.msra.gmra.mrb[0].mxu1 %v631_v30  ;;  %v636_v40 = vpack.c.bf16 %v590_v54, %v573_v10  ;;  %v635_v60 = vpack.c.bf16 %v512_v59, %v509_v51  ;;  %v513_v36 = vrot.slane %v481_v56, 1  ;;  %v637_v61 = vpack.c.bf16 %v481_v56, %v464_v47  ;;  %v4824_v44 = vld [vmem:[#allocation5 + $0xc8] ss:$16 sps:$4 sm:$0xff]   ;;  %v4826_v45 = vld [vmem:[#allocation5 + $0xcc] ss:$16 sps:$4 sm:$0xff]  }
 0x1d6   :  { %v607_v62 = vcombine.low %v599_v57, %v606_v20  ;;  %v624_v2 = vcombine.low %v616_v28, %v623_v58  ;;  %1275 = vmatpush1.bf16.msra.mxu1 %v4785_v12  ;;  %1320 = vmatpush1.bf16.msra.mxu0 %v4794_v17  ;;  %v4829_v46 = vld [vmem:[#allocation5 + $0xe4] ss:$16 sps:$4 sm:$0xff]   ;;  %v4832_v30 = vld [vmem:[#allocation5 + $0xec] ss:$16 sps:$4 sm:$0xff]   ;;  %v4827_v47 = vld [vmem:[#allocation5 + $0xe0] ss:$16 sps:$4 sm:$0xff]  }
 0x1d7   :  { %4714 = vmatmul.mubr.bf16.gmra.mrb[12].mxu0 %v636_v40  ;;  %879 = vmatprep.mubr.bf16.mxu1 %v635_v60  ;;  %v514_v3 = vsel %vm502_vm11, %v511_v53, %v513_v36  ;;  %v516_v5 = vsel %vm502_vm11, %v513_v36, %v5565_v4  ;;  %v4793_v4 = vld [vmem:[#allocation5 + $0x24] ss:$16 sps:$4 sm:$0xff]   ;;  %v4830_v48 = vld [vmem:[#allocation5 + $0xe8] ss:$16 sps:$4 sm:$0xff]   ;;  %v5609_v10 = vld [vmem:[#allocation7 + $0xc] ss:$16 sps:$4 sm:$0xff]  }
 0x1d8   :  { %v638_v6 = vpack.c.bf16 %v516_v5, %v514_v3  ;;  %4717 = vmatprep.mubr.msk.bf16.mxu0 %vm5303_vm10, %v6610_v15  ;;  %v639_v7 = vpack.c.bf16 %v624_v2, %v607_v62  ;;  %1276 = vmatprep.subr.bf16.mxu1 %v4793_v4  ;;  %v5607_v9 = vld [vmem:[#allocation7 + $0x4] ss:$16 sps:$4 sm:$0xff]   ;;  %v4440_v51 = vld [vmem:[%s6600_s3] ss:$0 sm:$0xff] }
 0x1d9   :  { %1321 = vmatprep.subr.bf16.mxu0 %v4802_v19 }
 0x1da   :  { %1277 = vmatpush1.bf16.msra.mxu1 %v4791_v16  ;;  %1322 = vmatpush1.bf16.msra.mxu0 %v4800_v22 }
 0x1db   :  { %1278 = vmatprep.subr.bf16.mxu1 %v4799_v18  ;;  %1323 = vmatprep.subr.bf16.mxu0 %v4808_v24 }
 0x1dd   :  { %880 = vmatmul.mubr.bf16.gmra.mrb[4].mxu1 %v634_v55 }
 0x1de   :  { %887 = vmatprep.mubr.bf16.mxu1 %v638_v6  ;;  %1279 = vmatpush1.bf16.msra.mxu1 %v4797_v21 }
 0x1df   :  { %4718 = vmatmul.mubr.bf16.gmra.mrb[16].mxu0 %v639_v7  ;;  %1280 = vmatprep.subr.bf16.mxu1 %v4805_v23 }
 0x1e0   :  { %1349 = vmatprep.mubr.bf16.mxu0 %v5300_v0  ;;  %1324 = vmatpush1.bf16.msra.mxu0 %v4806_v29 }
 0x1e1   :  { %1325 = vmatprep.subr.bf16.mxu0 %v4814_v33 }
 0x1e2   :  { %1281 = vmatpush1.bf16.msra.mxu1 %v4803_v25 }
 0x1e3   :  { %1282 = vmatprep.subr.bf16.mxu1 %v4811_v31 }
 0x1e4   :  { %1326 = vmatpush1.bf16.msra.mxu0 %v4812_v35 }
 0x1e5   :  { %888 = vmatmul.mubr.bf16.gmra.mrb[8].mxu1 %v637_v61  ;;  %1327 = vmatprep.subr.bf16.mxu0 %v4820_v32 }
 0x1e6   :  { %1306 = vmatprep.mubr.bf16.mxu1 %v5300_v0  ;;  %1283 = vmatpush1.bf16.msra.mxu1 %v4809_v34 }
 0x1e7   :  { %1284 = vmatprep.subr.bf16.mxu1 %v4817_v38 }
 0x1e8   :  { %1328 = vmatpush1.bf16.msra.mxu0 %v4818_v41 }
 0x1e9   :  { %1329 = vmatprep.subr.bf16.mxu0 %v4826_v45 }
 0x1ea   :  { %1285 = vmatpush1.bf16.msra.mxu1 %v4815_v39 }
 0x1eb   :  { %1286 = vmatprep.subr.bf16.mxu1 %v4823_v42 }
 0x1ec   :  { %1330 = vmatpush1.bf16.msra.mxu0 %v4824_v44 }
 0x1ed   :  { %1331 = vmatprep.subr.bf16.mxu0 %v4832_v30 }
 0x1ee   :  { %1287 = vmatpush1.bf16.msra.mxu1 %v4821_v26 }
 0x1ef   :  { %1288 = vmatprep.subr.bf16.mxu1 %v4829_v46 }
 0x1f0   :  { %1332 = vmatpush1.bf16.msra.mxu0 %v4830_v48 }
 0x1f1   :  { %1681 = vmatprep.subr.bf16.mxu0 %v5609_v10 }
 0x1f2   :  { %1289 = vmatpush1.bf16.msra.mxu1 %v4827_v47 }
 0x1f3   :  { %1640 = vmatprep.subr.bf16.mxu1 %v5607_v9 }
 0x2a0   :  { %v930_v27 = vpop.f32.mrb[8].mxu0 }
 0x2a1   :  { %v4711_v37 = vpop.f32.mrb[9].mxu0 }
 0x2a2   :  { %v933_v43 = vpop.f32.mrb[10].mxu0 }
 0x2a3   :  { %v4712_v49 = vpop.f32.mrb[11].mxu0 }
 0x2a8   :  { %v4641_v50 = vpop.f32.mrb[0].mxu1 }
 0x2a9   :  { %v4642_v52 = vpop.f32.mrb[1].mxu1 }
 0x2aa   :  { %v4643_v53 = vadd.f32 %v4642_v52, %v4641_v50  ;;  %v4644_v54 = vpop.f32.mrb[2].mxu1  ;;  %v938_v55 = vpop.f32.mrb[12].mxu0 }
 0x2ab   :  { %v4645_v56 = vpop.f32.mrb[3].mxu1  ;;  %v4715_v57 = vpop.f32.mrb[13].mxu0 }
 0x2ac   :  { %v874_v58 = vadd.f32 %v4643_v53, %v4440_v51  ;;  %v4646_v59 = vadd.f32 %v4645_v56, %v4644_v54  ;;  %v941_v20 = vpop.f32.mrb[14].mxu0 }
 0x2ad   :  { %v4716_v28 = vpop.f32.mrb[15].mxu0 }
 0x2ae   :  { %v931_v40 = vadd.f32 %v930_v27, %v874_v58  ;;  %v877_v60 = vadd.f32 %v4646_v59, %v4440_v51 }
 0x2b0   :  { %v953_v36 = vmax.f32 %v931_v40, 0.0  ;;  %v934_v61 = vadd.f32 %v933_v43, %v877_v60  ;;  %v4647_v62 = vpop.f32.mrb[4].mxu1 }
 0x2b1   :  { %v4648_v2 = vpop.f32.mrb[5].mxu1 }
 0x2b2   :  { %v961_v3 = vrot.slane %v953_v36, 1  ;;  %v954_v5 = vmax.f32 %v934_v61, 0.0  ;;  %v4649_v6 = vadd.f32 %v4648_v2, %v4647_v62  ;;  %v4650_v7 = vpop.f32.mrb[6].mxu1  ;;  %v946_v8 = vpop.f32.mrb[16].mxu0  ;;  %v967_v35 = vrot.slane %v953_v36, 2 }
 0x2b3   :  { %v4651_v11 = vpop.f32.mrb[7].mxu1  ;;  %v4719_v12 = vpop.f32.mrb[17].mxu0 }
 0x2b4   :  { %v965_v13 = vmax.f32 %v953_v36, %v961_v3  ;;  %v975_v4 = vrot.slane %v954_v5, 2  ;;  %v882_v14 = vadd.f32 %v4649_v6, %v4440_v51  ;;  %v949_v16 = vpop.f32.mrb[18].mxu0  ;;  %v4652_v17 = vadd.f32 %v4651_v11, %v4650_v7 }
 0x2b5   :  { %v4720_v18 = vpop.f32.mrb[19].mxu0  ;;  %v981_v31 = vrot.slane %v954_v5, 1 }
 0x2b6   :  { %v5616_v19 = vmax.f32 %v965_v13, %v975_v4  ;;  %v939_v21 = vadd.f32 %v938_v55, %v882_v14  ;;  %v885_v22 = vadd.f32 %v4652_v17, %v4440_v51  ;;  %v971_v44 = vmax.f32 %v965_v13, %v967_v35 }
 0x2b7   :  { %v985_v30 = vmax.f32 %v954_v5, %v981_v31 }
 0x2b8   :  { %v955_v23 = vmax.f32 %v939_v21, 0.0  ;;  %v4653_v24 = vpop.f32.mrb[8].mxu1  ;;  %v942_v25 = vadd.f32 %v941_v20, %v885_v22  ;;  %v1013_v52 = vrot.slane %v971_v44, 1  ;;  %v1019_v40 = vrot.slane %v5616_v19, 2 }
 0x2b9   :  { %v4654_v29 = vpop.f32.mrb[9].mxu1  ;;  %v987_v55 = vmax.f32 %v985_v30, %v975_v4  ;;  %v5645_v30 = vld [vmem:[#allocation7 + $0x28] ss:$16 sps:$4 sm:$0xff]  }
 0x2ba   :  { %v991_v33 = vrot.slane %v955_v23, 1  ;;  %v4656_v34 = vpop.f32.mrb[10].mxu1  ;;  %v956_v38 = vmax.f32 %v942_v25, 0.0  ;;  %v4655_v32 = vadd.f32 %v4654_v29, %v4653_v24  ;;  %v997_v42 = vrot.slane %v955_v23, 2 }
 0x2bb   :  { %v4657_v39 = vpop.f32.mrb[11].mxu1  ;;  %v1026_v6 = vrot.slane %v987_v55, 3  ;;  %v1031_v7 = vrot.slane %v987_v55, 4  ;;  %v5681_v55 = vld [vmem:[#allocation7 + $0x80] ss:$16 sps:$4 sm:$0xff]  }
 0x2bc   :  { %v995_v41 = vmax.f32 %v954_v5, %v991_v33  ;;  %v4658_v26 = vadd.f32 %v4657_v39, %v4656_v34  ;;  %v962_v45 = vrot.slane %v956_v38, 1  ;;  %v890_v46 = vadd.f32 %v4655_v32, %v4440_v51 }
 0x2bd   :  { %v968_v37 = vrot.slane %v956_v38, 2  ;;  %v1003_v49 = vmax.f32 %v955_v23, %v991_v33 }
 0x2be   :  { %v1001_v47 = vmax.f32 %v995_v41, %v997_v42  ;;  %v893_v48 = vadd.f32 %v4658_v26, %v4440_v51  ;;  %v966_v27 = vmax.f32 %v956_v38, %v962_v45  ;;  %v947_v43 = vadd.f32 %v946_v8, %v890_v46  ;;  %v5633_v41 = vld [vmem:[#allocation7] ss:$16 sps:$4 sm:$0xff]   ;;  %v5639_v45 = vld [vmem:[#allocation7 + $0x2c] ss:$16 sps:$4 sm:$0xff]  }
 0x2bf   :  { %v1005_v51 = vmax.f32 %v1003_v49, %v997_v42  ;;  %v5635_v42 = vld [vmem:[#allocation7 + $0x8] ss:$16 sps:$4 sm:$0xff]   ;;  %v5643_v46 = vld [vmem:[#allocation7 + $0x20] ss:$16 sps:$4 sm:$0xff]   ;;  %v5665_v49 = vld [vmem:[#allocation7 + $0x6c] ss:$16 sps:$4 sm:$0xff]  }
 0x2c0   :  { %v950_v50 = vadd.f32 %v949_v16, %v893_v48  ;;  %v972_v53 = vmax.f32 %v966_v27, %v968_v37  ;;  %v957_v54 = vmax.f32 %v947_v43, 0.0  ;;  %v1037_v12 = vrot.slane %v1001_v47, 5  ;;  %v5649_v47 = vld [vmem:[#allocation7 + $0x44] ss:$16 sps:$4 sm:$0xff]   ;;  %v5651_v48 = vld [vmem:[#allocation7 + $0x4c] ss:$16 sps:$4 sm:$0xff]  }
 0x2c1   :  { %v1043_v13 = vrot.slane %v1005_v51, 6  ;;  %v1047_v16 = vrot.slane %v1005_v51, 7  ;;  %v5659_v37 = vld [vmem:[#allocation7 + $0x48] ss:$16 sps:$4 sm:$0xff]   ;;  %v5663_v43 = vld [vmem:[#allocation7 + $0x64] ss:$16 sps:$4 sm:$0xff]  }
 0x2c2   :  { %v958_v56 = vmax.f32 %v950_v50, 0.0  ;;  %v1009_v57 = vrot.slane %v972_v53, 7  ;;  %v1015_v58 = vsel %vm1014_vm12, %v972_v53, %v1013_v52  ;;  %v976_v59 = vrot.slane %v957_v54, 2  ;;  %v5669_v50 = vld [vmem:[#allocation7 + $0x60] ss:$16 sps:$4 sm:$0xff]  }
 0x2c3   :  { %v982_v20 = vrot.slane %v957_v54, 1  ;;  %v5671_v52 = vld [vmem:[#allocation7 + $0x68] ss:$16 sps:$4 sm:$0xff]   ;;  %v5675_v53 = vld [vmem:[#allocation7 + $0x84] ss:$16 sps:$4 sm:$0xff]  }
 0x2c4   :  { %v992_v28 = vrot.slane %v958_v56, 1  ;;  %v1011_v60 = vsel %vm1010_vm13, %v1009_v57, %v971_v44  ;;  %v980_v36 = vmax.f32 %v966_v27, %v976_v59  ;;  %v998_v2 = vrot.slane %v958_v56, 2  ;;  %v5637_v44 = vld [vmem:[#allocation7 + $0x24] ss:$16 sps:$4 sm:$0xff]   ;;  %v5657_v27 = vld [vmem:[#allocation7 + $0x40] ss:$16 sps:$4 sm:$0xff]  }
 0x2c5   :  { %v986_v61 = vmax.f32 %v957_v54, %v982_v20  ;;  %v1052_v5 = vsel %vm1051_vm15, %v1011_v60, %v1015_v58  ;;  %v5687_v57 = vld [vmem:[#allocation7 + $0xa4] ss:$16 sps:$4 sm:$0xff]   ;;  %v5689_v58 = vld [vmem:[#allocation7 + $0xac] ss:$16 sps:$4 sm:$0xff]   ;;  %v5695_v20 = vld [vmem:[#allocation7 + $0xa8] ss:$16 sps:$4 sm:$0xff]  }
 0x2c6   :  { %v996_v62 = vmax.f32 %v957_v54, %v992_v28  ;;  %v1004_v3 = vmax.f32 %v958_v56, %v992_v28  ;;  %v1020_v11 = vrot.slane %v980_v36, 1  ;;  %v5677_v54 = vld [vmem:[#allocation7 + $0x8c] ss:$16 sps:$4 sm:$0xff]   ;;  %v5683_v56 = vld [vmem:[#allocation7 + $0x88] ss:$16 sps:$4 sm:$0xff]  }
 0x2c7   :  { %v988_v8 = vmax.f32 %v986_v61, %v976_v59  ;;  %v5693_v59 = vld [vmem:[#allocation7 + $0xa0] ss:$16 sps:$4 sm:$0xff]   ;;  %v5699_v51 = vld [vmem:[#allocation7 + $0xc4] ss:$16 sps:$4 sm:$0xff]   ;;  %v5701_v28 = vld [vmem:[#allocation7 + $0xcc] ss:$16 sps:$4 sm:$0xff]  }
 0x2c8   :  { %v1002_v4 = vmax.f32 %v996_v62, %v998_v2  ;;  %v1006_v14 = vmax.f32 %v1004_v3, %v998_v2  ;;  %v1022_v19 = vsel %vm1021_vm14, %v1020_v11, %v1019_v40  ;;  %v5705_v40 = vld [vmem:[#allocation7 + $0xc0] ss:$16 sps:$4 sm:$0xff]   ;;  %v5707_v60 = vld [vmem:[#allocation7 + $0xc8] ss:$16 sps:$4 sm:$0xff]   ;;  %v5711_v36 = vld [vmem:[#allocation7 + $0xe4] ss:$16 sps:$4 sm:$0xff]  }
 0x2c9   :  { %v1027_v17 = vrot.slane %v988_v8, 2  ;;  %v1032_v18 = vrot.slane %v988_v8, 3  ;;  %v1053_v24 = vsel %vm193_vm1, %v1052_v5, %v1022_v19  ;;  %v5713_v61 = vld [vmem:[#allocation7 + $0xec] ss:$16 sps:$4 sm:$0xff]   ;;  %v5717_v62 = vld [vmem:[#allocation7 + $0xe0] ss:$16 sps:$4 sm:$0xff]  }
 0x2ca   :  { %v1038_v21 = vrot.slane %v1002_v4, 4  ;;  %v1044_v22 = vrot.slane %v1006_v14, 5  ;;  %v1048_v23 = vrot.slane %v1006_v14, 6  ;;  %v5719_v2 = vld [vmem:[#allocation7 + $0xe8] ss:$16 sps:$4 sm:$0xff]   ;;  %v6615_v3 = vsub.s32 0, %v5499_v63 }
 0x2cb   :  { %v1029_v25 = vsel %vm1028_vm0, %v1027_v17, %v1026_v6  ;;  %v1033_v29 = vsel %vm1010_vm13, %v1032_v18, %v1031_v7  ;;  %v6614_v5 = vsub.s32 2, %v5499_v63  ;;  %v1092_v6 = vld [vmem:[%s6603_s6] sm:$0xf]  ;;  %v6613_v7 = vsub.s32 1, %v5499_v63 }
 0x2cc   :  { %v1039_v31 = vsel %vm1014_vm12, %v1038_v21, %v1037_v12  ;;  %v1045_v33 = vsel %vm1021_vm14, %v1044_v22, %v1043_v13  ;;  %v1049_v34 = vsel %vm1028_vm0, %v1048_v23, %v1047_v16  ;;  %v1055_v35 = vsel %vm1054_vm2, %v1053_v24, %v1029_v25 }
 0x2cd   :  { %v1056_v38 = vsel %vm1051_vm15, %v1033_v29, %v1039_v31  ;;  %v6612_v8 = vsub.s32 3, %v5499_v63  ;;  %v1097_v11 = vrot.slane %v1092_v6, %v6615_v3  ;;  %v1105_v12 = vrot.slane %v1092_v6, %v6614_v5 }
 0x2ce   :  { %v1057_v32 = vsel %vm193_vm1, %v1056_v38, %v1045_v33  ;;  %v1101_v13 = vrot.slane %v1092_v6, %v6613_v7 }
 0x2cf   :  { %v1058_v39 = vsel %vm1054_vm2, %v1057_v32, %v1049_v34  ;;  %v1109_v4 = vrot.slane %v1092_v6, %v6612_v8 }
 0x2d0   :  { %v1059_v26 = vpack.c.bf16 %v1058_v39, %v1055_v35 }
 0x2d2   :  { %1307 = vmatmul.mubr.bf16.vlgmr.msra.gmra.mrb[12].mxu1 %v1059_v26  ;;  %1350 = vmatmul.mubr.bf16.vlgmr.msra.gmra.mrb[20].mxu0 %v1059_v26 }
 0x2d3   :  { %1641 = vmatpush1.bf16.msra.mxu1 %v5633_v41  ;;  %1682 = vmatpush1.bf16.msra.mxu0 %v5635_v42 }
 0x2d4   :  { %1642 = vmatprep.subr.bf16.mxu1 %v5637_v44  ;;  %1683 = vmatprep.subr.bf16.mxu0 %v5639_v45 }
 0x2d5   :  { %1672 = vmatprep.mubr.bf16.mxu1 %v5300_v0  ;;  %1713 = vmatprep.mubr.bf16.mxu0 %v5300_v0 }
 0x2d7   :  { %1643 = vmatpush1.bf16.msra.mxu1 %v5643_v46  ;;  %1684 = vmatpush1.bf16.msra.mxu0 %v5645_v30 }
 0x2d8   :  { %1644 = vmatprep.subr.bf16.mxu1 %v5649_v47  ;;  %1685 = vmatprep.subr.bf16.mxu0 %v5651_v48 }
 0x2db   :  { %1645 = vmatpush1.bf16.msra.mxu1 %v5657_v27  ;;  %1686 = vmatpush1.bf16.msra.mxu0 %v5659_v37 }
 0x2dc   :  { %1646 = vmatprep.subr.bf16.mxu1 %v5663_v43  ;;  %1687 = vmatprep.subr.bf16.mxu0 %v5665_v49 }
 0x2df   :  { %1647 = vmatpush1.bf16.msra.mxu1 %v5669_v50  ;;  %1688 = vmatpush1.bf16.msra.mxu0 %v5671_v52 }
 0x2e0   :  { %1648 = vmatprep.subr.bf16.mxu1 %v5675_v53  ;;  %1689 = vmatprep.subr.bf16.mxu0 %v5677_v54 }
 0x2e3   :  { %1649 = vmatpush1.bf16.msra.mxu1 %v5681_v55  ;;  %1690 = vmatpush1.bf16.msra.mxu0 %v5683_v56 }
 0x2e4   :  { %1650 = vmatprep.subr.bf16.mxu1 %v5687_v57  ;;  %1691 = vmatprep.subr.bf16.mxu0 %v5689_v58 }
 0x2e7   :  { %1651 = vmatpush1.bf16.msra.mxu1 %v5693_v59  ;;  %1692 = vmatpush1.bf16.msra.mxu0 %v5695_v20 }
 0x2e8   :  { %1652 = vmatprep.subr.bf16.mxu1 %v5699_v51  ;;  %1693 = vmatprep.subr.bf16.mxu0 %v5701_v28 }
 0x2eb   :  { %1653 = vmatpush1.bf16.msra.mxu1 %v5705_v40  ;;  %1694 = vmatpush1.bf16.msra.mxu0 %v5707_v60 }
 0x2ec   :  { %1654 = vmatprep.subr.bf16.mxu1 %v5711_v36  ;;  %1695 = vmatprep.subr.bf16.mxu0 %v5713_v61 }
 0x2ef   :  { %1655 = vmatpush1.bf16.msra.mxu1 %v5717_v62  ;;  %1696 = vmatpush1.bf16.msra.mxu0 %v5719_v2 }
 0x2f0   :  { %1766 = vmatprep.subr.bf16.mxu1 %v5607_v9  ;;  %1807 = vmatprep.subr.bf16.mxu0 %v5609_v10 }
 0x2f2   :  { %1673 = vmatmul.mubr.bf16.vlgmr.msra.gmra.mrb[16].mxu1 %v5300_v0  ;;  %1714 = vmatmul.mubr.bf16.vlgmr.msra.gmra.mrb[24].mxu0 %v5300_v0 }
 0x2f3   :  { %1767 = vmatpush1.bf16.msra.mxu1 %v5633_v41  ;;  %1808 = vmatpush1.bf16.msra.mxu0 %v5635_v42 }
 0x2f4   :  { %1768 = vmatprep.subr.bf16.mxu1 %v5637_v44  ;;  %1809 = vmatprep.subr.bf16.mxu0 %v5639_v45 }
 0x2f5   :  { %1798 = vmatprep.mubr.bf16.mxu1 %v5300_v0  ;;  %1839 = vmatprep.mubr.bf16.mxu0 %v5300_v0 }
 0x2f7   :  { %1769 = vmatpush1.bf16.msra.mxu1 %v5643_v46  ;;  %1810 = vmatpush1.bf16.msra.mxu0 %v5645_v30 }
 0x2f8   :  { %1770 = vmatprep.subr.bf16.mxu1 %v5649_v47  ;;  %1811 = vmatprep.subr.bf16.mxu0 %v5651_v48 }
 0x2fb   :  { %1771 = vmatpush1.bf16.msra.mxu1 %v5657_v27  ;;  %1812 = vmatpush1.bf16.msra.mxu0 %v5659_v37 }
 0x2fc   :  { %1772 = vmatprep.subr.bf16.mxu1 %v5663_v43  ;;  %1813 = vmatprep.subr.bf16.mxu0 %v5665_v49 }
 0x2ff   :  { %1773 = vmatpush1.bf16.msra.mxu1 %v5669_v50  ;;  %1814 = vmatpush1.bf16.msra.mxu0 %v5671_v52 }
 0x300   :  { %1774 = vmatprep.subr.bf16.mxu1 %v5675_v53  ;;  %1815 = vmatprep.subr.bf16.mxu0 %v5677_v54 }
 0x303   :  { %1775 = vmatpush1.bf16.msra.mxu1 %v5681_v55  ;;  %1816 = vmatpush1.bf16.msra.mxu0 %v5683_v56 }
 0x304   :  { %1776 = vmatprep.subr.bf16.mxu1 %v5687_v57  ;;  %1817 = vmatprep.subr.bf16.mxu0 %v5689_v58 }
 0x307   :  { %1777 = vmatpush1.bf16.msra.mxu1 %v5693_v59  ;;  %1818 = vmatpush1.bf16.msra.mxu0 %v5695_v20 }
 0x308   :  { %1778 = vmatprep.subr.bf16.mxu1 %v5699_v51  ;;  %1819 = vmatprep.subr.bf16.mxu0 %v5701_v28 }
 0x30b   :  { %1779 = vmatpush1.bf16.msra.mxu1 %v5705_v40  ;;  %1820 = vmatpush1.bf16.msra.mxu0 %v5707_v60 }
 0x30c   :  { %1780 = vmatprep.subr.bf16.mxu1 %v5711_v36  ;;  %1821 = vmatprep.subr.bf16.mxu0 %v5713_v61 }
 0x30f   :  { %1781 = vmatpush1.bf16.msra.mxu1 %v5717_v62  ;;  %1822 = vmatpush1.bf16.msra.mxu0 %v5719_v2 }
 0x310   :  { %1892 = vmatprep.subr.bf16.mxu1 %v5607_v9  ;;  %1933 = vmatprep.subr.bf16.mxu0 %v5609_v10 }
 0x3a5   :  { %v1308_v14 = vpop.f32.mrb[12].mxu1  ;;  %v1351_v16 = vpop.f32.mrb[20].mxu0 }
 0x3a6   :  { %v1309_v17 = vadd.f32 %v1308_v14, %v1097_v11  ;;  %v1352_v18 = vadd.f32 %v1351_v16, %v1105_v12  ;;  %v1310_v19 = vpop.f32.mrb[13].mxu1  ;;  %v1353_v21 = vpop.f32.mrb[21].mxu0 }
 0x3a7   :  { %v1311_v22 = vadd.f32 %v1310_v19, %v1101_v13  ;;  %v1354_v23 = vadd.f32 %v1353_v21, %v1109_v4  ;;  %v1312_v24 = vpop.f32.mrb[14].mxu1  ;;  %v1355_v25 = vpop.f32.mrb[22].mxu0 }
 0x3a8   :  { %v1313_v29 = vadd.f32 %v1312_v24, %v1097_v11  ;;  %v1356_v31 = vadd.f32 %v1355_v25, %v1105_v12  ;;  %v1314_v33 = vpop.f32.mrb[15].mxu1  ;;  %v1357_v34 = vpop.f32.mrb[23].mxu0 }
 0x3a9   :  { %v1368_v35 = vcombine.low %v1309_v17, %v1311_v22  ;;  %v1369_v38 = vcombine.high %v1309_v17, %v1311_v22  ;;  %v1370_v32 = vcombine.low %v1352_v18, %v1354_v23  ;;  %v1371_v39 = vcombine.high %v1352_v18, %v1354_v23 }
 0x3aa   :  { %v1315_v26 = vadd.f32 %v1314_v33, %v1101_v13  ;;  %v1358_v6 = vadd.f32 %v1357_v34, %v1109_v4 }
 0x3ab   :  { %v5779_v15 = vrot.slane %v1368_v35, %v5502_v1  ;;  %v5782_v14 = vrot.slane %v1369_v38, %v5502_v1  ;;  %v5785_v16 = vrot.slane %v1370_v32, %v5502_v1  ;;  %v5788_v11 = vrot.slane %v1371_v39, %v5502_v1 }
 0x3ac   :  { %v1404_v12 = vcombine.low %v1313_v29, %v1315_v26  ;;  %v1405_v19 = vcombine.high %v1313_v29, %v1315_v26  ;;  %v1406_v21 = vcombine.low %v1356_v31, %v1358_v6  ;;  %v1407_v17 = vcombine.high %v1356_v31, %v1358_v6 }
 0x3ad   :  { %v1400_v13 = vcombine.low %v5779_v15, %v5785_v16  ;;  %v1401_v4 = vcombine.high %v5779_v15, %v5785_v16 }
 0x3ae   :  { %v5799_v23 = vrot.slane %v1404_v12, %v5502_v1  ;;  %v5802_v24 = vrot.slane %v1405_v19, %v5502_v1  ;;  %v5805_v25 = vrot.slane %v1406_v21, %v5502_v1  ;;  %v5808_v29 = vrot.slane %v1407_v17, %v5502_v1 }
 0x3c5   :  { %v1674_v38 = vpop.f32.mrb[16].mxu1  ;;  %v1715_v32 = vpop.f32.mrb[24].mxu0 }
 0x3c6   :  { %v1676_v39 = vpop.f32.mrb[17].mxu1  ;;  %v1717_v26 = vpop.f32.mrb[25].mxu0 }
 0x3c7   :  { %v1726_v6 = vcombine.low %v1674_v38, %v1676_v39  ;;  %v1727_v12 = vcombine.low %v1715_v32, %v1717_v26  ;;  %v1678_v19 = vpop.f32.mrb[18].mxu1  ;;  %v1719_v21 = vpop.f32.mrb[26].mxu0 }
 0x3c8   :  { %v1679_v17 = vpop.f32.mrb[19].mxu1  ;;  %v1720_v8 = vpop.f32.mrb[27].mxu0 }
 0x3c9   :  { %v1734_v7 = vrot.slane %v1726_v6, %v5502_v1  ;;  %v1741_v5 = vrot.slane %v1727_v12, %v5502_v1 }
 0x3cb   :  { %v1742_v3 = vcombine.low %v1734_v7, %v1741_v5 }
 0x3cd   :  { %v1744_v33 = vadd.f32 %v1742_v3, %v1400_v13 }
 0x3cf   :  { %v4529_v34 = vmul.f32 -1.442695, %v1744_v33  ;;  %v1752_v22 = vrot.slane %v1744_v33, 6 }
 0x3d1   :  { %4985 = vpow2.f32 %v4529_v34 }
 0x3db   :  { %v4986_v31 = vpop.eup %4985 }
 0x3dc   :  { %v1748_v35 = vadd.f32 1.0, %v4986_v31 }
 0x3de   :  { %4987 = vrcp.f32 %v1748_v35 }
 0x3df   :  { %4989 = vtanh.f32 %v1752_v22 }
 0x3e8   :  { %v4988_v18 = vpop.eup %4987 }
 0x3e9   :  { %v1756_v38 = vrot.slane %v4988_v18, 2  ;;  %v4990_v32 = vpop.eup %4989  ;;  %v1762_v8 = vrot.slane %v4988_v18, 4 }
 0x3ea   :  { %v1759_v26 = vmul.f32 %v4990_v32, %v4988_v18 }
 0x3eb   :  { %v1758_v39 = vmul.f32 0.0, %v1756_v38 }
 0x3ed   :  { %v5820_v19 = vadd.f32 %v1759_v26, %v1758_v39 }
 0x3ef   :  { %4991 = vtanh.f32 %v5820_v19 }
 0x3f9   :  { %v4992_v6 = vpop.eup %4991 }
 0x3fa   :  { %v5823_v5 = vmul.f32 %v4992_v6, %v1762_v8 }
 0x3fc   :  { %v1765_v3 = vpack.c.bf16 %v5823_v5, %v5823_v5 }
 0x3fe   :  { %1799 = vmatmul.mubr.bf16.vlgmr.msra.gmra.mrb[20].mxu1 %v1765_v3  ;;  %1840 = vmatmul.mubr.bf16.vlgmr.msra.gmra.mrb[28].mxu0 %v1765_v3 }
 0x3ff   :  { %1893 = vmatpush1.bf16.msra.mxu1 %v5633_v41  ;;  %1934 = vmatpush1.bf16.msra.mxu0 %v5635_v42 }
 0x400   :  { %1894 = vmatprep.subr.bf16.mxu1 %v5637_v44  ;;  %1935 = vmatprep.subr.bf16.mxu0 %v5639_v45 }
 0x401   :  { %1924 = vmatprep.mubr.bf16.mxu1 %v5300_v0  ;;  %1965 = vmatprep.mubr.bf16.mxu0 %v5300_v0 }
 0x403   :  { %1895 = vmatpush1.bf16.msra.mxu1 %v5643_v46  ;;  %1936 = vmatpush1.bf16.msra.mxu0 %v5645_v30 }
 0x404   :  { %1896 = vmatprep.subr.bf16.mxu1 %v5649_v47  ;;  %1937 = vmatprep.subr.bf16.mxu0 %v5651_v48 }
 0x407   :  { %1897 = vmatpush1.bf16.msra.mxu1 %v5657_v27  ;;  %1938 = vmatpush1.bf16.msra.mxu0 %v5659_v37 }
 0x408   :  { %1898 = vmatprep.subr.bf16.mxu1 %v5663_v43  ;;  %1939 = vmatprep.subr.bf16.mxu0 %v5665_v49 }
 0x40b   :  { %1899 = vmatpush1.bf16.msra.mxu1 %v5669_v50  ;;  %1940 = vmatpush1.bf16.msra.mxu0 %v5671_v52 }
 0x40c   :  { %1900 = vmatprep.subr.bf16.mxu1 %v5675_v53  ;;  %1941 = vmatprep.subr.bf16.mxu0 %v5677_v54 }
 0x40f   :  { %1901 = vmatpush1.bf16.msra.mxu1 %v5681_v55  ;;  %1942 = vmatpush1.bf16.msra.mxu0 %v5683_v56 }
 0x410   :  { %1902 = vmatprep.subr.bf16.mxu1 %v5687_v57  ;;  %1943 = vmatprep.subr.bf16.mxu0 %v5689_v58 }
 0x413   :  { %1903 = vmatpush1.bf16.msra.mxu1 %v5693_v59  ;;  %1944 = vmatpush1.bf16.msra.mxu0 %v5695_v20 }
 0x414   :  { %1904 = vmatprep.subr.bf16.mxu1 %v5699_v51  ;;  %1945 = vmatprep.subr.bf16.mxu0 %v5701_v28 }
 0x417   :  { %1905 = vmatpush1.bf16.msra.mxu1 %v5705_v40  ;;  %1946 = vmatpush1.bf16.msra.mxu0 %v5707_v60 }
 0x418   :  { %1906 = vmatprep.subr.bf16.mxu1 %v5711_v36  ;;  %1947 = vmatprep.subr.bf16.mxu0 %v5713_v61 }
 0x41b   :  { %1907 = vmatpush1.bf16.msra.mxu1 %v5717_v62  ;;  %1948 = vmatpush1.bf16.msra.mxu0 %v5719_v2 }
 0x41c   :  { %2018 = vmatprep.subr.bf16.mxu1 %v5607_v9  ;;  %2059 = vmatprep.subr.bf16.mxu0 %v5609_v10 }
 0x4d1   :  { %v1800_v7 = vpop.f32.mrb[20].mxu1  ;;  %v1841_v13 = vpop.f32.mrb[28].mxu0 }
 0x4d2   :  { %v1802_v18 = vpop.f32.mrb[21].mxu1  ;;  %v1843_v22 = vpop.f32.mrb[29].mxu0 }
 0x4d3   :  { %v1852_v31 = vcombine.low %v1800_v7, %v1802_v18  ;;  %v1853_v33 = vcombine.low %v1841_v13, %v1843_v22  ;;  %v1804_v34 = vpop.f32.mrb[22].mxu1  ;;  %v1845_v35 = vpop.f32.mrb[30].mxu0 }
 0x4d4   :  { %v1805_v12 = vpop.f32.mrb[23].mxu1  ;;  %v1846_v21 = vpop.f32.mrb[31].mxu0 }
 0x4d5   :  { %v1860_v17 = vrot.slane %v1852_v31, %v5502_v1  ;;  %v1867_v38 = vrot.slane %v1853_v33, %v5502_v1 }
 0x4d7   :  { %v1868_v32 = vcombine.low %v1860_v17, %v1867_v38 }
 0x4d9   :  { %v1870_v39 = vadd.f32 %v1868_v32, %v1401_v4 }
 0x4db   :  { %v4530_v26 = vmul.f32 -1.442695, %v1870_v39  ;;  %v1878_v3 = vrot.slane %v1870_v39, 6 }
 0x4dd   :  { %4993 = vpow2.f32 %v4530_v26 }
 0x4e7   :  { %v4994_v8 = vpop.eup %4993 }
 0x4e8   :  { %v1874_v6 = vadd.f32 1.0, %v4994_v8 }
 0x4ea   :  { %4995 = vrcp.f32 %v1874_v6 }
 0x4eb   :  { %4997 = vtanh.f32 %v1878_v3 }
 0x4f4   :  { %v4996_v7 = vpop.eup %4995 }
 0x4f5   :  { %v1882_v13 = vrot.slane %v4996_v7, 2  ;;  %v4998_v18 = vpop.eup %4997  ;;  %v1888_v33 = vrot.slane %v4996_v7, 4 }
 0x4f6   :  { %v1885_v31 = vmul.f32 %v4998_v18, %v4996_v7 }
 0x4f7   :  { %v1884_v22 = vmul.f32 %v1882_v13, %v5820_v19  ;;  %v6616_v13 = vcombine.low %v5782_v14, %v5788_v11 }
 0x4f9   :  { %v5867_v34 = vadd.f32 %v1885_v31, %v1884_v22 }
 0x4fb   :  { %4999 = vtanh.f32 %v5867_v34 }
 0x505   :  { %v5000_v15 = vpop.eup %4999 }
 0x506   :  { %v5870_v16 = vmul.f32 %v5000_v15, %v1888_v33 }
 0x508   :  { %v1891_v4 = vpack.c.bf16 %v5870_v16, %v5870_v16 }
 0x50a   :  { %1925 = vmatmul.mubr.bf16.vlgmr.msra.gmra.mrb[24].mxu1 %v1891_v4  ;;  %1966 = vmatmul.mubr.bf16.vlgmr.msra.gmra.mrb[32].mxu0 %v1891_v4 }
 0x50b   :  { %2019 = vmatpush1.bf16.msra.mxu1 %v5633_v41  ;;  %2060 = vmatpush1.bf16.msra.mxu0 %v5635_v42 }
 0x50c   :  { %2020 = vmatprep.subr.bf16.mxu1 %v5637_v44  ;;  %2061 = vmatprep.subr.bf16.mxu0 %v5639_v45 }
 0x50d   :  { %2050 = vmatprep.mubr.bf16.mxu1 %v5300_v0  ;;  %2091 = vmatprep.mubr.bf16.mxu0 %v5300_v0 }
 0x50f   :  { %2021 = vmatpush1.bf16.msra.mxu1 %v5643_v46  ;;  %2062 = vmatpush1.bf16.msra.mxu0 %v5645_v30 }
 0x510   :  { %2022 = vmatprep.subr.bf16.mxu1 %v5649_v47  ;;  %2063 = vmatprep.subr.bf16.mxu0 %v5651_v48 }
 0x513   :  { %2023 = vmatpush1.bf16.msra.mxu1 %v5657_v27  ;;  %2064 = vmatpush1.bf16.msra.mxu0 %v5659_v37 }
 0x514   :  { %2024 = vmatprep.subr.bf16.mxu1 %v5663_v43  ;;  %2065 = vmatprep.subr.bf16.mxu0 %v5665_v49 }
 0x517   :  { %2025 = vmatpush1.bf16.msra.mxu1 %v5669_v50  ;;  %2066 = vmatpush1.bf16.msra.mxu0 %v5671_v52 }
 0x518   :  { %2026 = vmatprep.subr.bf16.mxu1 %v5675_v53  ;;  %2067 = vmatprep.subr.bf16.mxu0 %v5677_v54 }
 0x51b   :  { %2027 = vmatpush1.bf16.msra.mxu1 %v5681_v55  ;;  %2068 = vmatpush1.bf16.msra.mxu0 %v5683_v56 }
 0x51c   :  { %2028 = vmatprep.subr.bf16.mxu1 %v5687_v57  ;;  %2069 = vmatprep.subr.bf16.mxu0 %v5689_v58 }
 0x51f   :  { %2029 = vmatpush1.bf16.msra.mxu1 %v5693_v59  ;;  %2070 = vmatpush1.bf16.msra.mxu0 %v5695_v20 }
 0x520   :  { %2030 = vmatprep.subr.bf16.mxu1 %v5699_v51  ;;  %2071 = vmatprep.subr.bf16.mxu0 %v5701_v28 }
 0x523   :  { %2031 = vmatpush1.bf16.msra.mxu1 %v5705_v40  ;;  %2072 = vmatpush1.bf16.msra.mxu0 %v5707_v60 }
 0x524   :  { %2032 = vmatprep.subr.bf16.mxu1 %v5711_v36  ;;  %2073 = vmatprep.subr.bf16.mxu0 %v5713_v61 }
 0x527   :  { %2033 = vmatpush1.bf16.msra.mxu1 %v5717_v62  ;;  %2074 = vmatpush1.bf16.msra.mxu0 %v5719_v2 }
 0x528   :  { %2144 = vmatprep.subr.bf16.mxu1 %v5607_v9  ;;  %2185 = vmatprep.subr.bf16.mxu0 %v5609_v10 }
 0x5dd   :  { %v1926_v19 = vpop.f32.mrb[24].mxu1  ;;  %v1967_v35 = vpop.f32.mrb[32].mxu0 }
 0x5de   :  { %v1928_v12 = vpop.f32.mrb[25].mxu1  ;;  %v1969_v21 = vpop.f32.mrb[33].mxu0 }
 0x5df   :  { %v1978_v17 = vcombine.low %v1926_v19, %v1928_v12  ;;  %v1979_v38 = vcombine.low %v1967_v35, %v1969_v21  ;;  %v1930_v32 = vpop.f32.mrb[26].mxu1  ;;  %v1971_v39 = vpop.f32.mrb[34].mxu0 }
 0x5e0   :  { %v1931_v26 = vpop.f32.mrb[27].mxu1  ;;  %v1972_v8 = vpop.f32.mrb[35].mxu0 }
 0x5e1   :  { %v1986_v6 = vrot.slane %v1978_v17, %v5502_v1  ;;  %v1993_v3 = vrot.slane %v1979_v38, %v5502_v1  ;;  %v2648_v38 = vcombine.low %v5870_v16, %v5870_v16 }
 0x5e3   :  { %v1994_v7 = vcombine.low %v1986_v6, %v1993_v3  ;;  %v2655_v8 = vrot.slane %v2648_v38, %v5502_v1 }
 0x5e5   :  { %v1996_v18 = vadd.f32 %v1994_v7, %v6616_v13 }
 0x5e7   :  { %v4531_v22 = vmul.f32 -1.442695, %v1996_v18  ;;  %v2004_v15 = vrot.slane %v1996_v18, 6 }
 0x5e9   :  { %5001 = vpow2.f32 %v4531_v22 }
 0x5f3   :  { %v5002_v31 = vpop.eup %5001 }
 0x5f4   :  { %v2000_v33 = vadd.f32 1.0, %v5002_v31 }
 0x5f6   :  { %5003 = vrcp.f32 %v2000_v33 }
 0x5f7   :  { %5005 = vtanh.f32 %v2004_v15 }
 0x600   :  { %v5004_v4 = vpop.eup %5003 }
 0x601   :  { %v2008_v19 = vrot.slane %v5004_v4, 2  ;;  %v5006_v35 = vpop.eup %5005  ;;  %v2014_v32 = vrot.slane %v5004_v4, 4 }
 0x602   :  { %v2011_v21 = vmul.f32 %v5006_v35, %v5004_v4 }
 0x603   :  { %v2010_v12 = vmul.f32 %v2008_v19, %v5867_v34  ;;  %v2709_v34 = vsel %vm1051_vm15, %v5823_v5, %v2655_v8 }
 0x605   :  { %v5914_v17 = vadd.f32 %v2011_v21, %v2010_v12 }
 0x607   :  { %5007 = vtanh.f32 %v5914_v17 }
 0x611   :  { %v5008_v39 = vpop.eup %5007 }
 0x612   :  { %v2016_v26 = vmul.f32 %v5008_v39, %v2014_v32 }
 0x614   :  { %v2017_v6 = vpack.c.bf16 %v2016_v26, %v2016_v26  ;;  %v2664_v3 = vrot.slane %v2016_v26, %v5502_v1 }
 0x616   :  { %2051 = vmatmul.mubr.bf16.vlgmr.msra.gmra.mrb[28].mxu1 %v2017_v6  ;;  %v2665_v7 = vcombine.low %v2664_v3, %v2664_v3  ;;  %2092 = vmatmul.mubr.bf16.vlgmr.msra.gmra.mrb[36].mxu0 %v2017_v6 }
 0x617   :  { %2145 = vmatpush1.bf16.msra.mxu1 %v5633_v41  ;;  %2186 = vmatpush1.bf16.msra.mxu0 %v5635_v42 }
 0x618   :  { %2146 = vmatprep.subr.bf16.mxu1 %v5637_v44  ;;  %2187 = vmatprep.subr.bf16.mxu0 %v5639_v45  ;;  %v5928_v16 = vsel %vm193_vm1, %v2709_v34, %v2665_v7 }
 0x619   :  { %2176 = vmatprep.mubr.bf16.mxu1 %v5300_v0  ;;  %2217 = vmatprep.mubr.bf16.mxu0 %v5300_v0 }
 0x61b   :  { %2147 = vmatpush1.bf16.msra.mxu1 %v5643_v46  ;;  %2188 = vmatpush1.bf16.msra.mxu0 %v5645_v30 }
 0x61c   :  { %2148 = vmatprep.subr.bf16.mxu1 %v5649_v47  ;;  %2189 = vmatprep.subr.bf16.mxu0 %v5651_v48 }
 0x61f   :  { %2149 = vmatpush1.bf16.msra.mxu1 %v5657_v27  ;;  %2190 = vmatpush1.bf16.msra.mxu0 %v5659_v37 }
 0x620   :  { %2150 = vmatprep.subr.bf16.mxu1 %v5663_v43  ;;  %2191 = vmatprep.subr.bf16.mxu0 %v5665_v49 }
 0x623   :  { %2151 = vmatpush1.bf16.msra.mxu1 %v5669_v50  ;;  %2192 = vmatpush1.bf16.msra.mxu0 %v5671_v52 }
 0x624   :  { %2152 = vmatprep.subr.bf16.mxu1 %v5675_v53  ;;  %2193 = vmatprep.subr.bf16.mxu0 %v5677_v54 }
 0x627   :  { %2153 = vmatpush1.bf16.msra.mxu1 %v5681_v55  ;;  %2194 = vmatpush1.bf16.msra.mxu0 %v5683_v56 }
 0x628   :  { %2154 = vmatprep.subr.bf16.mxu1 %v5687_v57  ;;  %2195 = vmatprep.subr.bf16.mxu0 %v5689_v58 }
 0x62b   :  { %2155 = vmatpush1.bf16.msra.mxu1 %v5693_v59  ;;  %2196 = vmatpush1.bf16.msra.mxu0 %v5695_v20 }
 0x62c   :  { %2156 = vmatprep.subr.bf16.mxu1 %v5699_v51  ;;  %2197 = vmatprep.subr.bf16.mxu0 %v5701_v28 }
 0x62f   :  { %2157 = vmatpush1.bf16.msra.mxu1 %v5705_v40  ;;  %2198 = vmatpush1.bf16.msra.mxu0 %v5707_v60 }
 0x630   :  { %2158 = vmatprep.subr.bf16.mxu1 %v5711_v36  ;;  %2199 = vmatprep.subr.bf16.mxu0 %v5713_v61 }
 0x633   :  { %2159 = vmatpush1.bf16.msra.mxu1 %v5717_v62  ;;  %2200 = vmatpush1.bf16.msra.mxu0 %v5719_v2 }
 0x634   :  { %2270 = vmatprep.subr.bf16.mxu1 %v5607_v9  ;;  %2311 = vmatprep.subr.bf16.mxu0 %v5609_v10  ;;  %v6617_v9 = vcombine.high %v5782_v14, %v5788_v11 }
 0x6e9   :  { %v2052_v5 = vpop.f32.mrb[28].mxu1  ;;  %v2093_v13 = vpop.f32.mrb[36].mxu0 }
 0x6ea   :  { %v2054_v18 = vpop.f32.mrb[29].mxu1  ;;  %v2095_v22 = vpop.f32.mrb[37].mxu0 }
 0x6eb   :  { %v2104_v31 = vcombine.low %v2052_v5, %v2054_v18  ;;  %v2105_v33 = vcombine.low %v2093_v13, %v2095_v22  ;;  %v2056_v15 = vpop.f32.mrb[30].mxu1  ;;  %v2097_v4 = vpop.f32.mrb[38].mxu0 }
 0x6ec   :  { %v2057_v19 = vpop.f32.mrb[31].mxu1  ;;  %v2098_v35 = vpop.f32.mrb[39].mxu0  ;;  %v6009_v4 = vld [vmem:[#allocation7 + $0xc] ss:$16 sps:$4 sm:$0xff]  }
 0x6ed   :  { %v2112_v12 = vrot.slane %v2104_v31, %v5502_v1  ;;  %v2119_v21 = vrot.slane %v2105_v33, %v5502_v1 }
 0x6ef   :  { %v2120_v38 = vcombine.low %v2112_v12, %v2119_v21 }
 0x6f1   :  { %v2122_v32 = vadd.f32 %v2120_v38, %v6617_v9 }
 0x6f3   :  { %v4532_v10 = vmul.f32 -1.442695, %v2122_v32  ;;  %v2130_v8 = vrot.slane %v2122_v32, 6 }
 0x6f5   :  { %5009 = vpow2.f32 %v4532_v10 }
 0x6ff   :  { %v5010_v39 = vpop.eup %5009 }
 0x700   :  { %v2126_v26 = vadd.f32 1.0, %v5010_v39 }
 0x702   :  { %5011 = vrcp.f32 %v2126_v26 }
 0x703   :  { %5013 = vtanh.f32 %v2130_v8 }
 0x70c   :  { %v5012_v6 = vpop.eup %5011 }
 0x70d   :  { %v2134_v3 = vrot.slane %v5012_v6, 2  ;;  %v5014_v7 = vpop.eup %5013  ;;  %v2140_v18 = vrot.slane %v5012_v6, 4 }
 0x70e   :  { %v2137_v5 = vmul.f32 %v5014_v7, %v5012_v6  ;;  %v6618_v7 = vcombine.low %v5799_v23, %v5805_v25 }
 0x70f   :  { %v2136_v34 = vmul.f32 %v2134_v3, %v5914_v17 }
 0x711   :  { %v5966_v13 = vadd.f32 %v2137_v5, %v2136_v34 }
 0x713   :  { %5015 = vtanh.f32 %v5966_v13 }
 0x71d   :  { %v5016_v14 = vpop.eup %5015 }
 0x71e   :  { %v2142_v11 = vmul.f32 %v5016_v14, %v2140_v18 }
 0x720   :  { %v2143_v22 = vpack.c.bf16 %v2142_v11, %v2142_v11  ;;  %v2668_v31 = vcombine.low %v2142_v11, %v2142_v11 }
 0x722   :  { %2177 = vmatmul.mubr.bf16.vlgmr.msra.gmra.mrb[32].mxu1 %v2143_v22  ;;  %2218 = vmatmul.mubr.bf16.vlgmr.msra.gmra.mrb[40].mxu0 %v2143_v22  ;;  %v2675_v33 = vrot.slane %v2668_v31, %v5502_v1 }
 0x723   :  { %2271 = vmatpush1.bf16.msra.mxu1 %v5633_v41  ;;  %2312 = vmatpush1.bf16.msra.mxu0 %v5635_v42 }
 0x724   :  { %2272 = vmatprep.subr.bf16.mxu1 %v5637_v44  ;;  %2313 = vmatprep.subr.bf16.mxu0 %v5639_v45  ;;  %v2676_v17 = vcombine.low %v2675_v33, %v2675_v33 }
 0x725   :  { %2302 = vmatprep.mubr.bf16.mxu1 %v5300_v0  ;;  %2343 = vmatprep.mubr.bf16.mxu0 %v5300_v0 }
 0x726   :  { %v5978_v15 = vsel %vm1054_vm2, %v5928_v16, %v2676_v17  ;;  %v6006_v16 = vld [vmem:[#allocation7 + $0x4] ss:$16 sps:$4 sm:$0xff]  }
 0x727   :  { %2273 = vmatpush1.bf16.msra.mxu1 %v5643_v46  ;;  %2314 = vmatpush1.bf16.msra.mxu0 %v5645_v30 }
 0x728   :  { %2274 = vmatprep.subr.bf16.mxu1 %v5649_v47  ;;  %2315 = vmatprep.subr.bf16.mxu0 %v5651_v48 }
 0x72b   :  { %2275 = vmatpush1.bf16.msra.mxu1 %v5657_v27  ;;  %2316 = vmatpush1.bf16.msra.mxu0 %v5659_v37 }
 0x72c   :  { %2276 = vmatprep.subr.bf16.mxu1 %v5663_v43  ;;  %2317 = vmatprep.subr.bf16.mxu0 %v5665_v49 }
 0x72f   :  { %2277 = vmatpush1.bf16.msra.mxu1 %v5669_v50  ;;  %2318 = vmatpush1.bf16.msra.mxu0 %v5671_v52 }
 0x730   :  { %2278 = vmatprep.subr.bf16.mxu1 %v5675_v53  ;;  %2319 = vmatprep.subr.bf16.mxu0 %v5677_v54 }
 0x733   :  { %2279 = vmatpush1.bf16.msra.mxu1 %v5681_v55  ;;  %2320 = vmatpush1.bf16.msra.mxu0 %v5683_v56 }
 0x734   :  { %2280 = vmatprep.subr.bf16.mxu1 %v5687_v57  ;;  %2321 = vmatprep.subr.bf16.mxu0 %v5689_v58 }
 0x737   :  { %2281 = vmatpush1.bf16.msra.mxu1 %v5693_v59  ;;  %2322 = vmatpush1.bf16.msra.mxu0 %v5695_v20 }
 0x738   :  { %2282 = vmatprep.subr.bf16.mxu1 %v5699_v51  ;;  %2323 = vmatprep.subr.bf16.mxu0 %v5701_v28 }
 0x73b   :  { %2283 = vmatpush1.bf16.msra.mxu1 %v5705_v40  ;;  %2324 = vmatpush1.bf16.msra.mxu0 %v5707_v60 }
 0x73c   :  { %2284 = vmatprep.subr.bf16.mxu1 %v5711_v36  ;;  %2325 = vmatprep.subr.bf16.mxu0 %v5713_v61 }
 0x73f   :  { %2285 = vmatpush1.bf16.msra.mxu1 %v5717_v62  ;;  %2326 = vmatpush1.bf16.msra.mxu0 %v5719_v2 }
 0x740   :  { %2396 = vmatprep.subr.bf16.mxu1 %v6006_v16  ;;  %2437 = vmatprep.subr.bf16.mxu0 %v6009_v4 }
 0x7f5   :  { %v2178_v19 = vpop.f32.mrb[32].mxu1  ;;  %v2219_v35 = vpop.f32.mrb[40].mxu0 }
 0x7f6   :  { %v2180_v12 = vpop.f32.mrb[33].mxu1  ;;  %v2221_v21 = vpop.f32.mrb[41].mxu0 }
 0x7f7   :  { %v2230_v38 = vcombine.low %v2178_v19, %v2180_v12  ;;  %v2231_v9 = vcombine.low %v2219_v35, %v2221_v21  ;;  %v2182_v32 = vpop.f32.mrb[34].mxu1  ;;  %v2223_v10 = vpop.f32.mrb[42].mxu0 }
 0x7f8   :  { %v2183_v39 = vpop.f32.mrb[35].mxu1  ;;  %v2224_v26 = vpop.f32.mrb[43].mxu0  ;;  %v5115_v32 = vld [vmem:[#allocation7] ss:$16 sps:$4 sm:$0xff]   ;;  %v5116_v10 = vld [vmem:[#allocation7 + $0x8] ss:$16 sps:$4 sm:$0xff]  }
 0x7f9   :  { %v2238_v8 = vrot.slane %v2230_v38, %v5502_v1  ;;  %v2245_v6 = vrot.slane %v2231_v9, %v5502_v1  ;;  %v5117_v39 = vld [vmem:[#allocation7 + $0x24] ss:$16 sps:$4 sm:$0xff]   ;;  %v5118_v26 = vld [vmem:[#allocation7 + $0x2c] ss:$16 sps:$4 sm:$0xff]  }
 0x7fb   :  { %v2246_v3 = vcombine.low %v2238_v8, %v2245_v6  ;;  %v5119_v8 = vld [vmem:[#allocation7 + $0x20] ss:$16 sps:$4 sm:$0xff]   ;;  %v5120_v6 = vld [vmem:[#allocation7 + $0x28] ss:$16 sps:$4 sm:$0xff]  }
 0x7fd   :  { %v2248_v34 = vadd.f32 %v2246_v3, %v6618_v7  ;;  %v5121_v3 = vld [vmem:[#allocation7 + $0x44] ss:$16 sps:$4 sm:$0xff]   ;;  %v5122_v7 = vld [vmem:[#allocation7 + $0x4c] ss:$16 sps:$4 sm:$0xff]  }
 0x7ff   :  { %v4533_v5 = vmul.f32 -1.442695, %v2248_v34  ;;  %v2256_v11 = vrot.slane %v2248_v34, 6  ;;  %v5123_v34 = vld [vmem:[#allocation7 + $0x40] ss:$16 sps:$4 sm:$0xff]  }
 0x801   :  { %5017 = vpow2.f32 %v4533_v5  ;;  %v5124_v5 = vld [vmem:[#allocation7 + $0x48] ss:$16 sps:$4 sm:$0xff]  }
 0x80b   :  { %v5018_v18 = vpop.eup %5017 }
 0x80c   :  { %v2252_v14 = vadd.f32 1.0, %v5018_v18  ;;  %v5125_v18 = vld [vmem:[#allocation7 + $0x64] ss:$16 sps:$4 sm:$0xff]  }
 0x80e   :  { %5019 = vrcp.f32 %v2252_v14  ;;  %v5126_v14 = vld [vmem:[#allocation7 + $0x6c] ss:$16 sps:$4 sm:$0xff]  }
 0x80f   :  { %5021 = vtanh.f32 %v2256_v11  ;;  %v5127_v11 = vld [vmem:[#allocation7 + $0x60] ss:$16 sps:$4 sm:$0xff]  }
 0x818   :  { %v5020_v22 = vpop.eup %5019 }
 0x819   :  { %v2260_v31 = vrot.slane %v5020_v22, 2  ;;  %v5022_v33 = vpop.eup %5021  ;;  %v2266_v12 = vrot.slane %v5020_v22, 4 }
 0x81a   :  { %v2263_v19 = vmul.f32 %v5022_v33, %v5020_v22  ;;  %v5128_v22 = vld [vmem:[#allocation7 + $0x68] ss:$16 sps:$4 sm:$0xff]   ;;  %v5130_v33 = vld [vmem:[#allocation7 + $0x8c] ss:$16 sps:$4 sm:$0xff]  }
 0x81b   :  { %v2262_v17 = vmul.f32 %v2260_v31, %v5966_v13  ;;  %v5129_v31 = vld [vmem:[#allocation7 + $0x84] ss:$16 sps:$4 sm:$0xff]  }
 0x81d   :  { %v6018_v35 = vadd.f32 %v2263_v19, %v2262_v17  ;;  %v5131_v17 = vld [vmem:[#allocation7 + $0x80] ss:$16 sps:$4 sm:$0xff]   ;;  %v5132_v19 = vld [vmem:[#allocation7 + $0x88] ss:$16 sps:$4 sm:$0xff]  }
 0x81f   :  { %5023 = vtanh.f32 %v6018_v35 }
 0x829   :  { %v5024_v21 = vpop.eup %5023 }
 0x82a   :  { %v6021_v38 = vmul.f32 %v5024_v21, %v2266_v12  ;;  %v5134_v12 = vld [vmem:[#allocation7 + $0xac] ss:$16 sps:$4 sm:$0xff]   ;;  %v5135_v21 = vld [vmem:[#allocation7 + $0xa0] ss:$16 sps:$4 sm:$0xff]  }
 0x82c   :  { %v2269_v9 = vpack.c.bf16 %v6021_v38, %v6021_v38 }
 0x82e   :  { %2303 = vmatmul.mubr.bf16.vlgmr.msra.gmra.mrb[36].mxu1 %v2269_v9  ;;  %2344 = vmatmul.mubr.bf16.vlgmr.msra.gmra.mrb[44].mxu0 %v2269_v9  ;;  %v5136_v9 = vld [vmem:[#allocation7 + $0xa8] ss:$16 sps:$4 sm:$0xff]  }
 0x82f   :  { %2397 = vmatpush1.bf16.msra.mxu1 %v5633_v41  ;;  %2438 = vmatpush1.bf16.msra.mxu0 %v5635_v42 }
 0x830   :  { %2398 = vmatprep.subr.bf16.mxu1 %v5637_v44  ;;  %2439 = vmatprep.subr.bf16.mxu0 %v5639_v45 }
 0x831   :  { %2428 = vmatprep.mubr.bf16.mxu1 %v5300_v0  ;;  %2469 = vmatprep.mubr.bf16.mxu0 %v5300_v0 }
 0x833   :  { %2399 = vmatpush1.bf16.msra.mxu1 %v5643_v46  ;;  %2440 = vmatpush1.bf16.msra.mxu0 %v5645_v30 }
 0x834   :  { %2400 = vmatprep.subr.bf16.mxu1 %v5649_v47  ;;  %2441 = vmatprep.subr.bf16.mxu0 %v5651_v48 }
 0x837   :  { %2401 = vmatpush1.bf16.msra.mxu1 %v5657_v27  ;;  %2442 = vmatpush1.bf16.msra.mxu0 %v5659_v37 }
 0x838   :  { %2402 = vmatprep.subr.bf16.mxu1 %v5663_v43  ;;  %2443 = vmatprep.subr.bf16.mxu0 %v5665_v49 }
 0x83b   :  { %2403 = vmatpush1.bf16.msra.mxu1 %v5669_v50  ;;  %2444 = vmatpush1.bf16.msra.mxu0 %v5671_v52  ;;  %v6619_v52 = vcombine.high %v5799_v23, %v5805_v25 }
 0x83c   :  { %2404 = vmatprep.subr.bf16.mxu1 %v5675_v53  ;;  %2445 = vmatprep.subr.bf16.mxu0 %v5677_v54 }
 0x83f   :  { %2405 = vmatpush1.bf16.msra.mxu1 %v5681_v55  ;;  %2446 = vmatpush1.bf16.msra.mxu0 %v5683_v56 }
 0x840   :  { %2406 = vmatprep.subr.bf16.mxu1 %v5687_v57  ;;  %2447 = vmatprep.subr.bf16.mxu0 %v5689_v58 }
 0x843   :  { %2407 = vmatpush1.bf16.msra.mxu1 %v5693_v59  ;;  %2448 = vmatpush1.bf16.msra.mxu0 %v5695_v20 }
 0x844   :  { %2408 = vmatprep.subr.bf16.mxu1 %v5699_v51  ;;  %2449 = vmatprep.subr.bf16.mxu0 %v5701_v28 }
 0x847   :  { %2409 = vmatpush1.bf16.msra.mxu1 %v5705_v40  ;;  %2450 = vmatpush1.bf16.msra.mxu0 %v5707_v60 }
 0x848   :  { %2410 = vmatprep.subr.bf16.mxu1 %v5711_v36  ;;  %2451 = vmatprep.subr.bf16.mxu0 %v5713_v61 }
 0x84b   :  { %2411 = vmatpush1.bf16.msra.mxu1 %v5717_v62  ;;  %2452 = vmatpush1.bf16.msra.mxu0 %v5719_v2 }
 0x84c   :  { %2522 = vmatprep.subr.bf16.mxu1 %v6006_v16  ;;  %2563 = vmatprep.subr.bf16.mxu0 %v6009_v4 }
 0x901   :  { %v2304_v41 = vpop.f32.mrb[36].mxu1  ;;  %v2345_v42 = vpop.f32.mrb[44].mxu0 }
 0x902   :  { %v2306_v44 = vpop.f32.mrb[37].mxu1  ;;  %v2347_v45 = vpop.f32.mrb[45].mxu0 }
 0x903   :  { %v2356_v46 = vcombine.low %v2304_v41, %v2306_v44  ;;  %v2357_v30 = vcombine.low %v2345_v42, %v2347_v45  ;;  %v2308_v47 = vpop.f32.mrb[38].mxu1  ;;  %v2349_v48 = vpop.f32.mrb[46].mxu0  ;;  %v5137_v41 = vld [vmem:[#allocation7 + $0xc4] ss:$16 sps:$4 sm:$0xff]   ;;  %v5138_v42 = vld [vmem:[#allocation7 + $0xcc] ss:$16 sps:$4 sm:$0xff]  }
 0x904   :  { %v2309_v27 = vpop.f32.mrb[39].mxu1  ;;  %v2350_v37 = vpop.f32.mrb[47].mxu0 }
 0x905   :  { %v2364_v43 = vrot.slane %v2356_v46, %v5502_v1  ;;  %v2371_v49 = vrot.slane %v2357_v30, %v5502_v1 }
 0x907   :  { %v2372_v50 = vcombine.low %v2364_v43, %v2371_v49 }
 0x909   :  { %v2374_v53 = vadd.f32 %v2372_v50, %v6619_v52 }
 0x90b   :  { %v4534_v54 = vmul.f32 -1.442695, %v2374_v53  ;;  %v2382_v57 = vrot.slane %v2374_v53, 6 }
 0x90d   :  { %5025 = vpow2.f32 %v4534_v54 }
 0x917   :  { %v5026_v55 = vpop.eup %5025 }
 0x918   :  { %v2378_v56 = vadd.f32 1.0, %v5026_v55 }
 0x91a   :  { %5027 = vrcp.f32 %v2378_v56 }
 0x91b   :  { %5029 = vtanh.f32 %v2382_v57 }
 0x924   :  { %v5028_v58 = vpop.eup %5027 }
 0x925   :  { %v2386_v59 = vrot.slane %v5028_v58, 2  ;;  %v5030_v20 = vpop.eup %5029  ;;  %v2392_v16 = vrot.slane %v5028_v58, 4 }
 0x926   :  { %v2389_v28 = vmul.f32 %v5030_v20, %v5028_v58 }
 0x927   :  { %v2388_v51 = vmul.f32 %v2386_v59, %v6018_v35  ;;  %v5133_v35 = vld [vmem:[#allocation7 + $0xa4] ss:$16 sps:$4 sm:$0xff]  }
 0x929   :  { %v6065_v13 = vadd.f32 %v2389_v28, %v2388_v51 }
 0x92b   :  { %5031 = vtanh.f32 %v6065_v13 }
 0x935   :  { %v5032_v23 = vpop.eup %5031 }
 0x936   :  { %v6068_v25 = vmul.f32 %v5032_v23, %v2392_v16 }
 0x938   :  { %v2395_v4 = vpack.c.bf16 %v6068_v25, %v6068_v25  ;;  %v2679_v20 = vcombine.low %v6068_v25, %v6068_v25 }
 0x93a   :  { %2429 = vmatmul.mubr.bf16.vlgmr.msra.gmra.mrb[40].mxu1 %v2395_v4  ;;  %2470 = vmatmul.mubr.bf16.vlgmr.msra.gmra.mrb[48].mxu0 %v2395_v4  ;;  %v2686_v23 = vrot.slane %v2679_v20, %v5502_v1  ;;  %v6621_v20 = vcombine.high %v5802_v24, %v5808_v29 }
 0x93b   :  { %2523 = vmatpush1.bf16.msra.mxu1 %v5115_v32  ;;  %2564 = vmatpush1.bf16.msra.mxu0 %v5116_v10 }
 0x93c   :  { %2524 = vmatprep.subr.bf16.mxu1 %v5117_v39  ;;  %2565 = vmatprep.subr.bf16.mxu0 %v5118_v26  ;;  %v4883_v39 = vld [vmem:[#allocation8 + $0x4] ss:$16 sps:$4 sm:$0xff]   ;;  %v4886_v26 = vld [vmem:[#allocation8 + $0xc] ss:$16 sps:$4 sm:$0xff]  }
 0x93d   :  { %2554 = vmatprep.mubr.bf16.mxu1 %v5300_v0  ;;  %2595 = vmatprep.mubr.bf16.mxu0 %v5300_v0 }
 0x93f   :  { %2525 = vmatpush1.bf16.msra.mxu1 %v5119_v8  ;;  %2566 = vmatpush1.bf16.msra.mxu0 %v5120_v6  ;;  %v4881_v8 = vld [vmem:[#allocation8] ss:$16 sps:$4 sm:$0xff]   ;;  %v4884_v6 = vld [vmem:[#allocation8 + $0x8] ss:$16 sps:$4 sm:$0xff]  }
 0x940   :  { %2526 = vmatprep.subr.bf16.mxu1 %v5121_v3  ;;  %2567 = vmatprep.subr.bf16.mxu0 %v5122_v7  ;;  %v4889_v3 = vld [vmem:[#allocation8 + $0x24] ss:$16 sps:$4 sm:$0xff]   ;;  %v4892_v7 = vld [vmem:[#allocation8 + $0x2c] ss:$16 sps:$4 sm:$0xff]  }
 0x943   :  { %2527 = vmatpush1.bf16.msra.mxu1 %v5123_v34  ;;  %2568 = vmatpush1.bf16.msra.mxu0 %v5124_v5  ;;  %v4887_v34 = vld [vmem:[#allocation8 + $0x20] ss:$16 sps:$4 sm:$0xff]   ;;  %v4890_v5 = vld [vmem:[#allocation8 + $0x28] ss:$16 sps:$4 sm:$0xff]  }
 0x944   :  { %2528 = vmatprep.subr.bf16.mxu1 %v5125_v18  ;;  %2569 = vmatprep.subr.bf16.mxu0 %v5126_v14  ;;  %v4895_v18 = vld [vmem:[#allocation8 + $0x44] ss:$16 sps:$4 sm:$0xff]   ;;  %v4896_v14 = vld [vmem:[#allocation8 + $0x48] ss:$16 sps:$4 sm:$0xff]  }
 0x947   :  { %2529 = vmatpush1.bf16.msra.mxu1 %v5127_v11  ;;  %2570 = vmatpush1.bf16.msra.mxu0 %v5128_v22  ;;  %v4898_v11 = vld [vmem:[#allocation8 + $0x4c] ss:$16 sps:$4 sm:$0xff]   ;;  %v4901_v22 = vld [vmem:[#allocation8 + $0x64] ss:$16 sps:$4 sm:$0xff]  }
 0x948   :  { %2530 = vmatprep.subr.bf16.mxu1 %v5129_v31  ;;  %2571 = vmatprep.subr.bf16.mxu0 %v5130_v33  ;;  %v4904_v31 = vld [vmem:[#allocation8 + $0x6c] ss:$16 sps:$4 sm:$0xff]   ;;  %v4899_v33 = vld [vmem:[#allocation8 + $0x60] ss:$16 sps:$4 sm:$0xff]  }
 0x94b   :  { %2531 = vmatpush1.bf16.msra.mxu1 %v5131_v17  ;;  %2572 = vmatpush1.bf16.msra.mxu0 %v5132_v19  ;;  %v4902_v17 = vld [vmem:[#allocation8 + $0x68] ss:$16 sps:$4 sm:$0xff]   ;;  %v4907_v19 = vld [vmem:[#allocation8 + $0x84] ss:$16 sps:$4 sm:$0xff]  }
 0x94c   :  { %2532 = vmatprep.subr.bf16.mxu1 %v5133_v35  ;;  %2573 = vmatprep.subr.bf16.mxu0 %v5134_v12  ;;  %v4910_v35 = vld [vmem:[#allocation8 + $0x8c] ss:$16 sps:$4 sm:$0xff]   ;;  %v4905_v12 = vld [vmem:[#allocation8 + $0x80] ss:$16 sps:$4 sm:$0xff]  }
 0x94f   :  { %2533 = vmatpush1.bf16.msra.mxu1 %v5135_v21  ;;  %2574 = vmatpush1.bf16.msra.mxu0 %v5136_v9  ;;  %v4908_v21 = vld [vmem:[#allocation8 + $0x88] ss:$16 sps:$4 sm:$0xff]   ;;  %v4913_v9 = vld [vmem:[#allocation8 + $0xa4] ss:$16 sps:$4 sm:$0xff]  }
 0x950   :  { %2534 = vmatprep.subr.bf16.mxu1 %v5137_v41  ;;  %2575 = vmatprep.subr.bf16.mxu0 %v5138_v42  ;;  %v4916_v41 = vld [vmem:[#allocation8 + $0xac] ss:$16 sps:$4 sm:$0xff]   ;;  %v4911_v42 = vld [vmem:[#allocation8 + $0xa0] ss:$16 sps:$4 sm:$0xff]  }
 0x953   :  { %2535 = vmatpush1.bf16.msra.mxu1 %v5705_v40  ;;  %2576 = vmatpush1.bf16.msra.mxu0 %v5707_v60 }
 0x954   :  { %2536 = vmatprep.subr.bf16.mxu1 %v5711_v36  ;;  %2577 = vmatprep.subr.bf16.mxu0 %v5713_v61  ;;  %v6620_v61 = vcombine.low %v5802_v24, %v5808_v29 }
 0x957   :  { %2537 = vmatpush1.bf16.msra.mxu1 %v5717_v62  ;;  %2578 = vmatpush1.bf16.msra.mxu0 %v5719_v2 }
 0x958   :  { %2930 = vmatprep.subr.bf16.mxu1 %v4883_v39  ;;  %2973 = vmatprep.subr.bf16.mxu0 %v4886_v26 }
 0xa0d   :  { %v2430_v44 = vpop.f32.mrb[40].mxu1  ;;  %v2471_v45 = vpop.f32.mrb[48].mxu0 }
 0xa0e   :  { %v2432_v46 = vpop.f32.mrb[41].mxu1  ;;  %v2473_v30 = vpop.f32.mrb[49].mxu0 }
 0xa0f   :  { %v2482_v47 = vcombine.low %v2430_v44, %v2432_v46  ;;  %v2483_v48 = vcombine.low %v2471_v45, %v2473_v30  ;;  %v2434_v27 = vpop.f32.mrb[42].mxu1  ;;  %v2475_v37 = vpop.f32.mrb[50].mxu0  ;;  %v4914_v44 = vld [vmem:[#allocation8 + $0xa8] ss:$16 sps:$4 sm:$0xff]   ;;  %v4919_v45 = vld [vmem:[#allocation8 + $0xc4] ss:$16 sps:$4 sm:$0xff]  }
 0xa10   :  { %v2435_v43 = vpop.f32.mrb[43].mxu1  ;;  %v2476_v40 = vpop.f32.mrb[51].mxu0  ;;  %v4922_v46 = vld [vmem:[#allocation8 + $0xcc] ss:$16 sps:$4 sm:$0xff]   ;;  %v4917_v30 = vld [vmem:[#allocation8 + $0xc0] ss:$16 sps:$4 sm:$0xff]  }
 0xa11   :  { %v2490_v60 = vrot.slane %v2482_v47, %v5502_v1  ;;  %v2497_v36 = vrot.slane %v2483_v48, %v5502_v1  ;;  %v4920_v47 = vld [vmem:[#allocation8 + $0xc8] ss:$16 sps:$4 sm:$0xff]   ;;  %v4925_v48 = vld [vmem:[#allocation8 + $0xe4] ss:$16 sps:$4 sm:$0xff]   ;;  %v4928_v27 = vld [vmem:[#allocation8 + $0xec] ss:$16 sps:$4 sm:$0xff]  }
 0xa12   :  { %v4923_v37 = vld [vmem:[#allocation8 + $0xe0] ss:$16 sps:$4 sm:$0xff]   ;;  %v4926_v43 = vld [vmem:[#allocation8 + $0xe8] ss:$16 sps:$4 sm:$0xff]   ;;  %v6100_v40 = vld [vmem:[#allocation10 + $0x4] ss:$16 sps:$4 sm:$0xff]  }
 0xa13   :  { %v2498_v49 = vcombine.low %v2490_v60, %v2497_v36  ;;  %v6102_v60 = vld [vmem:[#allocation10 + $0xc] ss:$16 sps:$4 sm:$0xff]  }
 0xa15   :  { %v2500_v62 = vadd.f32 %v2498_v49, %v6620_v61 }
 0xa17   :  { %v4535_v2 = vmul.f32 -1.442695, %v2500_v62  ;;  %v2508_v53 = vrot.slane %v2500_v62, 6 }
 0xa19   :  { %5033 = vpow2.f32 %v4535_v2 }
 0xa23   :  { %v5034_v50 = vpop.eup %5033 }
 0xa24   :  { %v2504_v52 = vadd.f32 1.0, %v5034_v50 }
 0xa26   :  { %5035 = vrcp.f32 %v2504_v52 }
 0xa27   :  { %5037 = vtanh.f32 %v2508_v53 }
 0xa30   :  { %v5036_v54 = vpop.eup %5035 }
 0xa31   :  { %v2512_v55 = vrot.slane %v5036_v54, 2  ;;  %v5038_v56 = vpop.eup %5037  ;;  %v2518_v51 = vrot.slane %v5036_v54, 4 }
 0xa32   :  { %v2515_v58 = vmul.f32 %v5038_v56, %v5036_v54 }
 0xa33   :  { %v2514_v57 = vmul.f32 %v2512_v55, %v6065_v13  ;;  %v2712_v13 = vsel %vm1051_vm15, %v6021_v38, %v2686_v23  ;;  %v4893_v38 = vld [vmem:[#allocation8 + $0x40] ss:$16 sps:$4 sm:$0xff]  }
 0xa35   :  { %v6086_v59 = vadd.f32 %v2515_v58, %v2514_v57 }
 0xa37   :  { %5039 = vtanh.f32 %v6086_v59 }
 0xa41   :  { %v5040_v28 = vpop.eup %5039 }
 0xa42   :  { %v2520_v16 = vmul.f32 %v5040_v28, %v2518_v51 }
 0xa44   :  { %v2521_v4 = vpack.c.bf16 %v2520_v16, %v2520_v16  ;;  %v2695_v32 = vrot.slane %v2520_v16, %v5502_v1 }
 0xa46   :  { %2555 = vmatmul.mubr.bf16.vlgmr.msra.gmra.mrb[44].mxu1 %v2521_v4  ;;  %v2696_v10 = vcombine.low %v2695_v32, %v2695_v32  ;;  %2596 = vmatmul.mubr.bf16.vlgmr.msra.gmra.mrb[52].mxu0 %v2521_v4 }
 0xa47   :  { %2962 = vmatprep.mubr.bf16.mxu1 %v5300_v0  ;;  %3005 = vmatprep.mubr.bf16.mxu0 %v5300_v0 }
 0xa48   :  { %v6098_v25 = vsel %vm193_vm1, %v2712_v13, %v2696_v10  ;;  %2931 = vmatpush1.bf16.msra.mxu1 %v4881_v8  ;;  %2974 = vmatpush1.bf16.msra.mxu0 %v4884_v6 }
 0xa49   :  { %2932 = vmatprep.subr.bf16.mxu1 %v4889_v3  ;;  %2975 = vmatprep.subr.bf16.mxu0 %v4892_v7 }
 0xa4c   :  { %2933 = vmatpush1.bf16.msra.mxu1 %v4887_v34  ;;  %2976 = vmatpush1.bf16.msra.mxu0 %v4890_v5 }
 0xa4d   :  { %2934 = vmatprep.subr.bf16.mxu1 %v4895_v18  ;;  %2977 = vmatprep.subr.bf16.mxu0 %v4898_v11  ;;  %v6117_v18 = vld [vmem:[#allocation10 + $0x8] ss:$16 sps:$4 sm:$0xff]   ;;  %v6122_v11 = vld [vmem:[#allocation10 + $0x2c] ss:$16 sps:$4 sm:$0xff]  }
 0xa50   :  { %2935 = vmatpush1.bf16.msra.mxu1 %v4893_v38  ;;  %2978 = vmatpush1.bf16.msra.mxu0 %v4896_v14  ;;  %v6115_v38 = vld [vmem:[#allocation10] ss:$16 sps:$4 sm:$0xff]  }
 0xa51   :  { %2936 = vmatprep.subr.bf16.mxu1 %v4901_v22  ;;  %2979 = vmatprep.subr.bf16.mxu0 %v4904_v31  ;;  %v6126_v22 = vld [vmem:[#allocation10 + $0x20] ss:$16 sps:$4 sm:$0xff]   ;;  %v6128_v31 = vld [vmem:[#allocation10 + $0x28] ss:$16 sps:$4 sm:$0xff]  }
 0xa54   :  { %2937 = vmatpush1.bf16.msra.mxu1 %v4899_v33  ;;  %2980 = vmatpush1.bf16.msra.mxu0 %v4902_v17  ;;  %v6140_v33 = vld [vmem:[#allocation10 + $0x40] ss:$16 sps:$4 sm:$0xff]   ;;  %v6142_v17 = vld [vmem:[#allocation10 + $0x48] ss:$16 sps:$4 sm:$0xff]  }
 0xa55   :  { %2938 = vmatprep.subr.bf16.mxu1 %v4907_v19  ;;  %2981 = vmatprep.subr.bf16.mxu0 %v4910_v35  ;;  %v6146_v19 = vld [vmem:[#allocation10 + $0x64] ss:$16 sps:$4 sm:$0xff]   ;;  %v6148_v35 = vld [vmem:[#allocation10 + $0x6c] ss:$16 sps:$4 sm:$0xff]  }
 0xa58   :  { %2939 = vmatpush1.bf16.msra.mxu1 %v4905_v12  ;;  %2982 = vmatpush1.bf16.msra.mxu0 %v4908_v21  ;;  %v6152_v12 = vld [vmem:[#allocation10 + $0x60] ss:$16 sps:$4 sm:$0xff]   ;;  %v6154_v21 = vld [vmem:[#allocation10 + $0x68] ss:$16 sps:$4 sm:$0xff]  }
 0xa59   :  { %2940 = vmatprep.subr.bf16.mxu1 %v4913_v9  ;;  %2983 = vmatprep.subr.bf16.mxu0 %v4916_v41  ;;  %v6158_v9 = vld [vmem:[#allocation10 + $0x84] ss:$16 sps:$4 sm:$0xff]   ;;  %v6160_v41 = vld [vmem:[#allocation10 + $0x8c] ss:$16 sps:$4 sm:$0xff]  }
 0xa5c   :  { %2941 = vmatpush1.bf16.msra.mxu1 %v4911_v42  ;;  %2984 = vmatpush1.bf16.msra.mxu0 %v4914_v44  ;;  %v6164_v42 = vld [vmem:[#allocation10 + $0x80] ss:$16 sps:$4 sm:$0xff]   ;;  %v6166_v44 = vld [vmem:[#allocation10 + $0x88] ss:$16 sps:$4 sm:$0xff]  }
 0xa5d   :  { %2942 = vmatprep.subr.bf16.mxu1 %v4919_v45  ;;  %2985 = vmatprep.subr.bf16.mxu0 %v4922_v46  ;;  %v6170_v45 = vld [vmem:[#allocation10 + $0xa4] ss:$16 sps:$4 sm:$0xff]   ;;  %v6172_v46 = vld [vmem:[#allocation10 + $0xac] ss:$16 sps:$4 sm:$0xff]  }
 0xa60   :  { %2943 = vmatpush1.bf16.msra.mxu1 %v4917_v30  ;;  %2986 = vmatpush1.bf16.msra.mxu0 %v4920_v47  ;;  %v6176_v30 = vld [vmem:[#allocation10 + $0xa0] ss:$16 sps:$4 sm:$0xff]   ;;  %v6178_v47 = vld [vmem:[#allocation10 + $0xa8] ss:$16 sps:$4 sm:$0xff]  }
 0xa61   :  { %2944 = vmatprep.subr.bf16.mxu1 %v4925_v48  ;;  %2987 = vmatprep.subr.bf16.mxu0 %v4928_v27  ;;  %v6182_v48 = vld [vmem:[#allocation10 + $0xc4] ss:$16 sps:$4 sm:$0xff]   ;;  %v6184_v27 = vld [vmem:[#allocation10 + $0xcc] ss:$16 sps:$4 sm:$0xff]  }
 0xa64   :  { %2945 = vmatpush1.bf16.msra.mxu1 %v4923_v37  ;;  %2988 = vmatpush1.bf16.msra.mxu0 %v4926_v43  ;;  %v6188_v37 = vld [vmem:[#allocation10 + $0xc0] ss:$16 sps:$4 sm:$0xff]   ;;  %v6190_v43 = vld [vmem:[#allocation10 + $0xc8] ss:$16 sps:$4 sm:$0xff]  }
 0xa65   :  { %3296 = vmatprep.subr.bf16.mxu1 %v6100_v40  ;;  %3337 = vmatprep.subr.bf16.mxu0 %v6102_v60 }
 0xb19   :  { %v2556_v36 = vpop.f32.mrb[44].mxu1  ;;  %v2597_v49 = vpop.f32.mrb[52].mxu0 }
 0xb1a   :  { %v2558_v61 = vpop.f32.mrb[45].mxu1  ;;  %v2599_v62 = vpop.f32.mrb[53].mxu0 }
 0xb1b   :  { %v2608_v2 = vcombine.low %v2556_v36, %v2558_v61  ;;  %v2609_v50 = vcombine.low %v2597_v49, %v2599_v62  ;;  %v2560_v52 = vpop.f32.mrb[46].mxu1  ;;  %v2601_v53 = vpop.f32.mrb[54].mxu0  ;;  %v6194_v36 = vld [vmem:[#allocation10 + $0xe4] ss:$16 sps:$4 sm:$0xff]   ;;  %v6196_v49 = vld [vmem:[#allocation10 + $0xec] ss:$16 sps:$4 sm:$0xff]  }
 0xb1c   :  { %v2561_v54 = vpop.f32.mrb[47].mxu1  ;;  %v2602_v55 = vpop.f32.mrb[55].mxu0  ;;  %v6200_v61 = vld [vmem:[#allocation10 + $0xe0] ss:$16 sps:$4 sm:$0xff]   ;;  %v6202_v62 = vld [vmem:[#allocation10 + $0xe8] ss:$16 sps:$4 sm:$0xff]  }
 0xb1d   :  { %v2616_v56 = vrot.slane %v2608_v2, %v5502_v1  ;;  %v2623_v57 = vrot.slane %v2609_v50, %v5502_v1  ;;  %v2748_v2 = vld [vmem:[%s6606_s9] sm:$0xf]  ;;  %v6622_v50 = vsub.s32 0, %v5499_v63  ;;  %v6623_v53 = vsub.s32 2, %v5499_v63 }
 0xb1e   :  { %v6624_v55 = vsub.s32 1, %v5499_v63 }
 0xb1f   :  { %v2624_v58 = vcombine.low %v2616_v56, %v2623_v57  ;;  %v2753_v52 = vrot.slane %v2748_v2, %v6622_v50  ;;  %v2761_v54 = vrot.slane %v2748_v2, %v6623_v53  ;;  %v6625_v57 = vsub.s32 3, %v5499_v63 }
 0xb20   :  { %v2757_v56 = vrot.slane %v2748_v2, %v6624_v55 }
 0xb21   :  { %v2626_v51 = vadd.f32 %v2624_v58, %v6621_v20  ;;  %v2765_v58 = vrot.slane %v2748_v2, %v6625_v57 }
 0xb23   :  { %v4536_v28 = vmul.f32 -1.442695, %v2626_v51  ;;  %v2634_v4 = vrot.slane %v2626_v51, 6 }
 0xb25   :  { %5041 = vpow2.f32 %v4536_v28 }
 0xb2f   :  { %v5042_v16 = vpop.eup %5041 }
 0xb30   :  { %v2630_v23 = vadd.f32 1.0, %v5042_v16 }
 0xb32   :  { %5043 = vrcp.f32 %v2630_v23 }
 0xb33   :  { %5045 = vtanh.f32 %v2634_v4 }
 0xb3c   :  { %v5044_v32 = vpop.eup %5043 }
 0xb3d   :  { %v2638_v10 = vrot.slane %v5044_v32, 2  ;;  %v5046_v13 = vpop.eup %5045  ;;  %v2644_v6 = vrot.slane %v5044_v32, 4 }
 0xb3e   :  { %v2641_v26 = vmul.f32 %v5046_v13, %v5044_v32 }
 0xb3f   :  { %v2640_v39 = vmul.f32 %v2638_v10, %v6086_v59  ;;  %v6120_v59 = vld [vmem:[#allocation10 + $0x24] ss:$16 sps:$4 sm:$0xff]  }
 0xb41   :  { %v2642_v8 = vadd.f32 %v2641_v26, %v2640_v39 }
 0xb43   :  { %5047 = vtanh.f32 %v2642_v8 }
 0xb4d   :  { %v5048_v3 = vpop.eup %5047 }
 0xb4e   :  { %v2646_v7 = vmul.f32 %v5048_v3, %v2644_v6 }
 0xb50   :  { %v2699_v24 = vcombine.low %v2646_v7, %v2646_v7 }
 0xb52   :  { %v2706_v29 = vrot.slane %v2699_v24, %v5502_v1 }
 0xb54   :  { %v2707_v34 = vcombine.low %v2706_v29, %v2706_v29 }
 0xb56   :  { %v2714_v5 = vsel %vm1054_vm2, %v6098_v25, %v2707_v34  ;;  %v6132_v25 = vld [vmem:[#allocation10 + $0x44] ss:$16 sps:$4 sm:$0xff]  }
 0xb57   :  { %v2715_v14 = vpack.c.bf16 %v2714_v5, %v5978_v15  ;;  %v6134_v15 = vld [vmem:[#allocation10 + $0x4c] ss:$16 sps:$4 sm:$0xff]  }
 0xb59   :  { %2963 = vmatmul.mubr.bf16.vlgmr.msra.gmra.mrb[48].mxu1 %v2715_v14  ;;  %3006 = vmatmul.mubr.bf16.vlgmr.msra.gmra.mrb[56].mxu0 %v2715_v14 }
 0xb5a   :  { %3297 = vmatpush1.bf16.msra.mxu1 %v6115_v38  ;;  %3338 = vmatpush1.bf16.msra.mxu0 %v6117_v18 }
 0xb5b   :  { %3298 = vmatprep.subr.bf16.mxu1 %v6120_v59  ;;  %3339 = vmatprep.subr.bf16.mxu0 %v6122_v11 }
 0xb5c   :  { %3328 = vmatprep.mubr.bf16.mxu1 %v5300_v0  ;;  %3369 = vmatprep.mubr.bf16.mxu0 %v5300_v0 }
 0xb5e   :  { %3299 = vmatpush1.bf16.msra.mxu1 %v6126_v22  ;;  %3340 = vmatpush1.bf16.msra.mxu0 %v6128_v31 }
 0xb5f   :  { %3300 = vmatprep.subr.bf16.mxu1 %v6132_v25  ;;  %3341 = vmatprep.subr.bf16.mxu0 %v6134_v15 }
 0xb62   :  { %3301 = vmatpush1.bf16.msra.mxu1 %v6140_v33  ;;  %3342 = vmatpush1.bf16.msra.mxu0 %v6142_v17 }
 0xb63   :  { %3302 = vmatprep.subr.bf16.mxu1 %v6146_v19  ;;  %3343 = vmatprep.subr.bf16.mxu0 %v6148_v35 }
 0xb66   :  { %3303 = vmatpush1.bf16.msra.mxu1 %v6152_v12  ;;  %3344 = vmatpush1.bf16.msra.mxu0 %v6154_v21 }
 0xb67   :  { %3304 = vmatprep.subr.bf16.mxu1 %v6158_v9  ;;  %3345 = vmatprep.subr.bf16.mxu0 %v6160_v41 }
 0xb6a   :  { %3305 = vmatpush1.bf16.msra.mxu1 %v6164_v42  ;;  %3346 = vmatpush1.bf16.msra.mxu0 %v6166_v44 }
 0xb6b   :  { %3306 = vmatprep.subr.bf16.mxu1 %v6170_v45  ;;  %3347 = vmatprep.subr.bf16.mxu0 %v6172_v46 }
 0xb6e   :  { %3307 = vmatpush1.bf16.msra.mxu1 %v6176_v30  ;;  %3348 = vmatpush1.bf16.msra.mxu0 %v6178_v47 }
 0xb6f   :  { %3308 = vmatprep.subr.bf16.mxu1 %v6182_v48  ;;  %3349 = vmatprep.subr.bf16.mxu0 %v6184_v27 }
 0xb72   :  { %3309 = vmatpush1.bf16.msra.mxu1 %v6188_v37  ;;  %3350 = vmatpush1.bf16.msra.mxu0 %v6190_v43 }
 0xb73   :  { %3310 = vmatprep.subr.bf16.mxu1 %v6194_v36  ;;  %3351 = vmatprep.subr.bf16.mxu0 %v6196_v49 }
 0xb76   :  { %3311 = vmatpush1.bf16.msra.mxu1 %v6200_v61  ;;  %3352 = vmatpush1.bf16.msra.mxu0 %v6202_v62 }
 0xb77   :  { %3422 = vmatprep.subr.bf16.mxu1 %v6100_v40  ;;  %3463 = vmatprep.subr.bf16.mxu0 %v6102_v60 }
 0xb79   :  { %3329 = vmatmul.mubr.bf16.vlgmr.msra.gmra.mrb[52].mxu1 %v5300_v0  ;;  %3370 = vmatmul.mubr.bf16.vlgmr.msra.gmra.mrb[60].mxu0 %v5300_v0 }
 0xb7a   :  { %3423 = vmatpush1.bf16.msra.mxu1 %v6115_v38  ;;  %3464 = vmatpush1.bf16.msra.mxu0 %v6117_v18 }
 0xb7b   :  { %3424 = vmatprep.subr.bf16.mxu1 %v6120_v59  ;;  %3465 = vmatprep.subr.bf16.mxu0 %v6122_v11 }
 0xb7c   :  { %3454 = vmatprep.mubr.bf16.mxu1 %v5300_v0  ;;  %3495 = vmatprep.mubr.bf16.mxu0 %v5300_v0 }
 0xb7e   :  { %3425 = vmatpush1.bf16.msra.mxu1 %v6126_v22  ;;  %3466 = vmatpush1.bf16.msra.mxu0 %v6128_v31 }
 0xb7f   :  { %3426 = vmatprep.subr.bf16.mxu1 %v6132_v25  ;;  %3467 = vmatprep.subr.bf16.mxu0 %v6134_v15 }
 0xb82   :  { %3427 = vmatpush1.bf16.msra.mxu1 %v6140_v33  ;;  %3468 = vmatpush1.bf16.msra.mxu0 %v6142_v17 }
 0xb83   :  { %3428 = vmatprep.subr.bf16.mxu1 %v6146_v19  ;;  %3469 = vmatprep.subr.bf16.mxu0 %v6148_v35 }
 0xb86   :  { %3429 = vmatpush1.bf16.msra.mxu1 %v6152_v12  ;;  %3470 = vmatpush1.bf16.msra.mxu0 %v6154_v21 }
 0xb87   :  { %3430 = vmatprep.subr.bf16.mxu1 %v6158_v9  ;;  %3471 = vmatprep.subr.bf16.mxu0 %v6160_v41 }
 0xb8a   :  { %3431 = vmatpush1.bf16.msra.mxu1 %v6164_v42  ;;  %3472 = vmatpush1.bf16.msra.mxu0 %v6166_v44 }
 0xb8b   :  { %3432 = vmatprep.subr.bf16.mxu1 %v6170_v45  ;;  %3473 = vmatprep.subr.bf16.mxu0 %v6172_v46 }
 0xb8e   :  { %3433 = vmatpush1.bf16.msra.mxu1 %v6176_v30  ;;  %3474 = vmatpush1.bf16.msra.mxu0 %v6178_v47 }
 0xb8f   :  { %3434 = vmatprep.subr.bf16.mxu1 %v6182_v48  ;;  %3475 = vmatprep.subr.bf16.mxu0 %v6184_v27 }
 0xb92   :  { %3435 = vmatpush1.bf16.msra.mxu1 %v6188_v37  ;;  %3476 = vmatpush1.bf16.msra.mxu0 %v6190_v43 }
 0xb93   :  { %3436 = vmatprep.subr.bf16.mxu1 %v6194_v36  ;;  %3477 = vmatprep.subr.bf16.mxu0 %v6196_v49 }
 0xb96   :  { %3437 = vmatpush1.bf16.msra.mxu1 %v6200_v61  ;;  %3478 = vmatpush1.bf16.msra.mxu0 %v6202_v62 }
 0xb97   :  { %3548 = vmatprep.subr.bf16.mxu1 %v6100_v40  ;;  %3589 = vmatprep.subr.bf16.mxu0 %v6102_v60 }
 0xc2c   :  { %v2964_v20 = vpop.f32.mrb[48].mxu1  ;;  %v3007_v51 = vpop.f32.mrb[56].mxu0 }
 0xc2d   :  { %v2965_v28 = vadd.f32 %v2964_v20, %v2753_v52  ;;  %v3008_v16 = vadd.f32 %v3007_v51, %v2761_v54  ;;  %v2966_v23 = vpop.f32.mrb[49].mxu1  ;;  %v3009_v4 = vpop.f32.mrb[57].mxu0 }
 0xc2e   :  { %v2967_v32 = vadd.f32 %v2966_v23, %v2757_v56  ;;  %v3010_v10 = vadd.f32 %v3009_v4, %v2765_v58  ;;  %v2968_v13 = vpop.f32.mrb[50].mxu1  ;;  %v3011_v39 = vpop.f32.mrb[58].mxu0 }
 0xc2f   :  { %v2969_v26 = vadd.f32 %v2968_v13, %v2753_v52  ;;  %v3012_v8 = vadd.f32 %v3011_v39, %v2761_v54  ;;  %v2970_v6 = vpop.f32.mrb[51].mxu1  ;;  %v3013_v3 = vpop.f32.mrb[59].mxu0 }
 0xc30   :  { %v3024_v7 = vcombine.low %v2965_v28, %v2967_v32  ;;  %v3025_v24 = vcombine.high %v2965_v28, %v2967_v32  ;;  %v3026_v29 = vcombine.low %v3008_v16, %v3010_v10  ;;  %v3027_v34 = vcombine.high %v3008_v16, %v3010_v10 }
 0xc31   :  { %v2971_v63 = vadd.f32 %v2970_v6, %v2757_v56  ;;  %v3014_v5 = vadd.f32 %v3013_v3, %v2765_v58 }
 0xc32   :  { %v6258_v14 = vrot.slane %v3024_v7, %v5502_v1  ;;  %v6261_v2 = vrot.slane %v3025_v24, %v5502_v1  ;;  %v6264_v50 = vrot.slane %v3026_v29, %v5502_v1  ;;  %v6267_v52 = vrot.slane %v3027_v34, %v5502_v1 }
 0xc33   :  { %v3060_v53 = vcombine.low %v2969_v26, %v2971_v63  ;;  %v3061_v54 = vcombine.high %v2969_v26, %v2971_v63  ;;  %v3062_v55 = vcombine.low %v3012_v8, %v3014_v5  ;;  %v3063_v57 = vcombine.high %v3012_v8, %v3014_v5 }
 0xc34   :  { %v3056_v56 = vcombine.low %v6258_v14, %v6264_v50  ;;  %v3057_v58 = vcombine.high %v6258_v14, %v6264_v50  ;;  %v3058_v20 = vcombine.low %v6261_v2, %v6267_v52 }
 0xc35   :  { %v6278_v28 = vrot.slane %v3060_v53, %v5502_v1  ;;  %v6281_v16 = vrot.slane %v3061_v54, %v5502_v1  ;;  %v6284_v23 = vrot.slane %v3062_v55, %v5502_v1  ;;  %v6287_v4 = vrot.slane %v3063_v57, %v5502_v1 }
 0xc4c   :  { %v3330_v26 = vpop.f32.mrb[52].mxu1  ;;  %v3371_v8 = vpop.f32.mrb[60].mxu0 }
 0xc4d   :  { %v3332_v6 = vpop.f32.mrb[53].mxu1  ;;  %v3373_v3 = vpop.f32.mrb[61].mxu0 }
 0xc4e   :  { %v3382_v7 = vcombine.low %v3330_v26, %v3332_v6  ;;  %v3383_v24 = vcombine.low %v3371_v8, %v3373_v3  ;;  %v3334_v29 = vpop.f32.mrb[54].mxu1  ;;  %v3375_v34 = vpop.f32.mrb[62].mxu0 }
 0xc4f   :  { %v3335_v63 = vpop.f32.mrb[55].mxu1  ;;  %v3376_v5 = vpop.f32.mrb[63].mxu0 }
 0xc50   :  { %v3390_v53 = vrot.slane %v3382_v7, %v5502_v1  ;;  %v3397_v54 = vrot.slane %v3383_v24, %v5502_v1 }
 0xc52   :  { %v3398_v55 = vcombine.low %v3390_v53, %v3397_v54 }
 0xc54   :  { %v3400_v57 = vadd.f32 %v3398_v55, %v3056_v56 }
 0xc56   :  { %v4601_v13 = vmul.f32 -1.442695, %v3400_v57  ;;  %v3408_v32 = vrot.slane %v3400_v57, 6 }
 0xc58   :  { %5049 = vpow2.f32 %v4601_v13 }
 0xc62   :  { %v5050_v10 = vpop.eup %5049 }
 0xc63   :  { %v3404_v39 = vadd.f32 1.0, %v5050_v10 }
 0xc65   :  { %5051 = vrcp.f32 %v3404_v39 }
 0xc66   :  { %5053 = vtanh.f32 %v3408_v32 }
 0xc6f   :  { %v5052_v51 = vpop.eup %5051 }
 0xc70   :  { %v3412_v26 = vrot.slane %v5052_v51, 2  ;;  %v5054_v8 = vpop.eup %5053  ;;  %v3418_v7 = vrot.slane %v5052_v51, 4 }
 0xc71   :  { %v3415_v6 = vmul.f32 %v5054_v8, %v5052_v51 }
 0xc72   :  { %v3414_v3 = vmul.f32 0.0, %v3412_v26 }
 0xc74   :  { %v6299_v29 = vadd.f32 %v3415_v6, %v3414_v3 }
 0xc76   :  { %5055 = vtanh.f32 %v6299_v29 }
 0xc80   :  { %v5056_v24 = vpop.eup %5055 }
 0xc81   :  { %v3420_v34 = vmul.f32 %v5056_v24, %v3418_v7 }
 0xc83   :  { %v3421_v56 = vpack.c.bf16 %v3420_v34, %v3420_v34 }
 0xc85   :  { %3455 = vmatmul.mubr.bf16.vlgmr.msra.gmra.mrb[56].mxu1 %v3421_v56  ;;  %3496 = vmatmul.mubr.bf16.vlgmr.msra.gmra.mrb[64].mxu0 %v3421_v56 }
 0xc86   :  { %3549 = vmatpush1.bf16.msra.mxu1 %v6115_v38  ;;  %3590 = vmatpush1.bf16.msra.mxu0 %v6117_v18 }
 0xc87   :  { %3550 = vmatprep.subr.bf16.mxu1 %v6120_v59  ;;  %3591 = vmatprep.subr.bf16.mxu0 %v6122_v11 }
 0xc88   :  { %3580 = vmatprep.mubr.bf16.mxu1 %v5300_v0  ;;  %3621 = vmatprep.mubr.bf16.mxu0 %v5300_v0 }
 0xc8a   :  { %3551 = vmatpush1.bf16.msra.mxu1 %v6126_v22  ;;  %3592 = vmatpush1.bf16.msra.mxu0 %v6128_v31 }
 0xc8b   :  { %3552 = vmatprep.subr.bf16.mxu1 %v6132_v25  ;;  %3593 = vmatprep.subr.bf16.mxu0 %v6134_v15 }
 0xc8e   :  { %3553 = vmatpush1.bf16.msra.mxu1 %v6140_v33  ;;  %3594 = vmatpush1.bf16.msra.mxu0 %v6142_v17 }
 0xc8f   :  { %3554 = vmatprep.subr.bf16.mxu1 %v6146_v19  ;;  %3595 = vmatprep.subr.bf16.mxu0 %v6148_v35 }
 0xc92   :  { %3555 = vmatpush1.bf16.msra.mxu1 %v6152_v12  ;;  %3596 = vmatpush1.bf16.msra.mxu0 %v6154_v21 }
 0xc93   :  { %3556 = vmatprep.subr.bf16.mxu1 %v6158_v9  ;;  %3597 = vmatprep.subr.bf16.mxu0 %v6160_v41 }
 0xc96   :  { %3557 = vmatpush1.bf16.msra.mxu1 %v6164_v42  ;;  %3598 = vmatpush1.bf16.msra.mxu0 %v6166_v44 }
 0xc97   :  { %3558 = vmatprep.subr.bf16.mxu1 %v6170_v45  ;;  %3599 = vmatprep.subr.bf16.mxu0 %v6172_v46 }
 0xc9a   :  { %3559 = vmatpush1.bf16.msra.mxu1 %v6176_v30  ;;  %3600 = vmatpush1.bf16.msra.mxu0 %v6178_v47 }
 0xc9b   :  { %3560 = vmatprep.subr.bf16.mxu1 %v6182_v48  ;;  %3601 = vmatprep.subr.bf16.mxu0 %v6184_v27 }
 0xc9e   :  { %3561 = vmatpush1.bf16.msra.mxu1 %v6188_v37  ;;  %3602 = vmatpush1.bf16.msra.mxu0 %v6190_v43 }
 0xc9f   :  { %3562 = vmatprep.subr.bf16.mxu1 %v6194_v36  ;;  %3603 = vmatprep.subr.bf16.mxu0 %v6196_v49 }
 0xca2   :  { %3563 = vmatpush1.bf16.msra.mxu1 %v6200_v61  ;;  %3604 = vmatpush1.bf16.msra.mxu0 %v6202_v62 }
 0xca3   :  { %3674 = vmatprep.subr.bf16.mxu1 %v6100_v40  ;;  %3715 = vmatprep.subr.bf16.mxu0 %v6102_v60 }
 0xd58   :  { %v3456_v51 = vpop.f32.mrb[56].mxu1  ;;  %v3497_v32 = vpop.f32.mrb[64].mxu0 }
 0xd59   :  { %v3458_v10 = vpop.f32.mrb[57].mxu1  ;;  %v3499_v13 = vpop.f32.mrb[65].mxu0 }
 0xd5a   :  { %v3508_v39 = vcombine.low %v3456_v51, %v3458_v10  ;;  %v3509_v63 = vcombine.low %v3497_v32, %v3499_v13  ;;  %v3460_v5 = vpop.f32.mrb[58].mxu1  ;;  %v3501_v53 = vpop.f32.mrb[66].mxu0 }
 0xd5b   :  { %v3461_v54 = vpop.f32.mrb[59].mxu1  ;;  %v3502_v55 = vpop.f32.mrb[67].mxu0 }
 0xd5c   :  { %v3516_v57 = vrot.slane %v3508_v39, %v5502_v1  ;;  %v3523_v26 = vrot.slane %v3509_v63, %v5502_v1 }
 0xd5e   :  { %v3524_v8 = vcombine.low %v3516_v57, %v3523_v26 }
 0xd60   :  { %v3526_v6 = vadd.f32 %v3524_v8, %v3057_v58 }
 0xd62   :  { %v4602_v3 = vmul.f32 -1.442695, %v3526_v6  ;;  %v3534_v34 = vrot.slane %v3526_v6, 6 }
 0xd64   :  { %5057 = vpow2.f32 %v4602_v3 }
 0xd6e   :  { %v5058_v7 = vpop.eup %5057 }
 0xd6f   :  { %v3530_v24 = vadd.f32 1.0, %v5058_v7 }
 0xd71   :  { %5059 = vrcp.f32 %v3530_v24 }
 0xd72   :  { %5061 = vtanh.f32 %v3534_v34 }
 0xd7b   :  { %v5060_v56 = vpop.eup %5059 }
 0xd7c   :  { %v3538_v51 = vrot.slane %v5060_v56, 2  ;;  %v5062_v32 = vpop.eup %5061  ;;  %v3544_v63 = vrot.slane %v5060_v56, 4 }
 0xd7d   :  { %v3541_v10 = vmul.f32 %v5062_v32, %v5060_v56 }
 0xd7e   :  { %v3540_v13 = vmul.f32 %v3538_v51, %v6299_v29 }
 0xd80   :  { %v6342_v39 = vadd.f32 %v3541_v10, %v3540_v13 }
 0xd82   :  { %5063 = vtanh.f32 %v6342_v39 }
 0xd8c   :  { %v5064_v14 = vpop.eup %5063 }
 0xd8d   :  { %v3546_v50 = vmul.f32 %v5064_v14, %v3544_v63 }
 0xd8f   :  { %v3547_v58 = vpack.c.bf16 %v3546_v50, %v3546_v50 }
 0xd91   :  { %3581 = vmatmul.mubr.bf16.vlgmr.msra.gmra.mrb[60].mxu1 %v3547_v58  ;;  %3622 = vmatmul.mubr.bf16.vlgmr.msra.gmra.mrb[68].mxu0 %v3547_v58 }
 0xd92   :  { %3675 = vmatpush1.bf16.msra.mxu1 %v6115_v38  ;;  %3716 = vmatpush1.bf16.msra.mxu0 %v6117_v18 }
 0xd93   :  { %3676 = vmatprep.subr.bf16.mxu1 %v6120_v59  ;;  %3717 = vmatprep.subr.bf16.mxu0 %v6122_v11 }
 0xd94   :  { %3706 = vmatprep.mubr.bf16.mxu1 %v5300_v0  ;;  %3747 = vmatprep.mubr.bf16.mxu0 %v5300_v0 }
 0xd96   :  { %3677 = vmatpush1.bf16.msra.mxu1 %v6126_v22  ;;  %3718 = vmatpush1.bf16.msra.mxu0 %v6128_v31 }
 0xd97   :  { %3678 = vmatprep.subr.bf16.mxu1 %v6132_v25  ;;  %3719 = vmatprep.subr.bf16.mxu0 %v6134_v15 }
 0xd9a   :  { %3679 = vmatpush1.bf16.msra.mxu1 %v6140_v33  ;;  %3720 = vmatpush1.bf16.msra.mxu0 %v6142_v17 }
 0xd9b   :  { %3680 = vmatprep.subr.bf16.mxu1 %v6146_v19  ;;  %3721 = vmatprep.subr.bf16.mxu0 %v6148_v35 }
 0xd9e   :  { %3681 = vmatpush1.bf16.msra.mxu1 %v6152_v12  ;;  %3722 = vmatpush1.bf16.msra.mxu0 %v6154_v21 }
 0xd9f   :  { %3682 = vmatprep.subr.bf16.mxu1 %v6158_v9  ;;  %3723 = vmatprep.subr.bf16.mxu0 %v6160_v41 }
 0xda2   :  { %3683 = vmatpush1.bf16.msra.mxu1 %v6164_v42  ;;  %3724 = vmatpush1.bf16.msra.mxu0 %v6166_v44 }
 0xda3   :  { %3684 = vmatprep.subr.bf16.mxu1 %v6170_v45  ;;  %3725 = vmatprep.subr.bf16.mxu0 %v6172_v46 }
 0xda6   :  { %3685 = vmatpush1.bf16.msra.mxu1 %v6176_v30  ;;  %3726 = vmatpush1.bf16.msra.mxu0 %v6178_v47 }
 0xda7   :  { %3686 = vmatprep.subr.bf16.mxu1 %v6182_v48  ;;  %3727 = vmatprep.subr.bf16.mxu0 %v6184_v27 }
 0xdaa   :  { %3687 = vmatpush1.bf16.msra.mxu1 %v6188_v37  ;;  %3728 = vmatpush1.bf16.msra.mxu0 %v6190_v43 }
 0xdab   :  { %3688 = vmatprep.subr.bf16.mxu1 %v6194_v36  ;;  %3729 = vmatprep.subr.bf16.mxu0 %v6196_v49 }
 0xdae   :  { %3689 = vmatpush1.bf16.msra.mxu1 %v6200_v61  ;;  %3730 = vmatpush1.bf16.msra.mxu0 %v6202_v62 }
 0xdaf   :  { %3800 = vmatprep.subr.bf16.mxu1 %v6100_v40  ;;  %3841 = vmatprep.subr.bf16.mxu0 %v6102_v60 }
 0xe64   :  { %v3582_v29 = vpop.f32.mrb[60].mxu1  ;;  %v3623_v5 = vpop.f32.mrb[68].mxu0 }
 0xe65   :  { %v3584_v53 = vpop.f32.mrb[61].mxu1  ;;  %v3625_v54 = vpop.f32.mrb[69].mxu0 }
 0xe66   :  { %v3634_v55 = vcombine.low %v3582_v29, %v3584_v53  ;;  %v3635_v57 = vcombine.low %v3623_v5, %v3625_v54  ;;  %v3586_v26 = vpop.f32.mrb[62].mxu1  ;;  %v3627_v8 = vpop.f32.mrb[70].mxu0 }
 0xe67   :  { %v3587_v6 = vpop.f32.mrb[63].mxu1  ;;  %v3628_v3 = vpop.f32.mrb[71].mxu0 }
 0xe68   :  { %v3642_v7 = vrot.slane %v3634_v55, %v5502_v1  ;;  %v3649_v24 = vrot.slane %v3635_v57, %v5502_v1 }
 0xe6a   :  { %v3650_v34 = vcombine.low %v3642_v7, %v3649_v24 }
 0xe6c   :  { %v3652_v56 = vadd.f32 %v3650_v34, %v3058_v20 }
 0xe6e   :  { %v4603_v51 = vmul.f32 -1.442695, %v3652_v56  ;;  %v3660_v13 = vrot.slane %v3652_v56, 6 }
 0xe70   :  { %5065 = vpow2.f32 %v4603_v51 }
 0xe7a   :  { %v5066_v32 = vpop.eup %5065 }
 0xe7b   :  { %v3656_v10 = vadd.f32 1.0, %v5066_v32 }
 0xe7d   :  { %5067 = vrcp.f32 %v3656_v10 }
 0xe7e   :  { %5069 = vtanh.f32 %v3660_v13  ;;  %v6626_v13 = vcombine.high %v6261_v2, %v6267_v52 }
 0xe87   :  { %v5068_v63 = vpop.eup %5067 }
 0xe88   :  { %v3664_v14 = vrot.slane %v5068_v63, 2  ;;  %v5070_v50 = vpop.eup %5069  ;;  %v3670_v53 = vrot.slane %v5068_v63, 4 }
 0xe89   :  { %v3667_v58 = vmul.f32 %v5070_v50, %v5068_v63 }
 0xe8a   :  { %v3666_v29 = vmul.f32 %v3664_v14, %v6342_v39 }
 0xe8c   :  { %v6385_v5 = vadd.f32 %v3667_v58, %v3666_v29 }
 0xe8e   :  { %5071 = vtanh.f32 %v6385_v5 }
 0xe98   :  { %v5072_v54 = vpop.eup %5071 }
 0xe99   :  { %v3672_v20 = vmul.f32 %v5072_v54, %v3670_v53 }
 0xe9b   :  { %v3673_v55 = vpack.c.bf16 %v3672_v20, %v3672_v20 }
 0xe9d   :  { %3707 = vmatmul.mubr.bf16.vlgmr.msra.gmra.mrb[64].mxu1 %v3673_v55  ;;  %3748 = vmatmul.mubr.bf16.vlgmr.msra.gmra.mrb[72].mxu0 %v3673_v55 }
 0xe9e   :  { %3801 = vmatpush1.bf16.msra.mxu1 %v6115_v38  ;;  %3842 = vmatpush1.bf16.msra.mxu0 %v6117_v18 }
 0xe9f   :  { %3802 = vmatprep.subr.bf16.mxu1 %v6120_v59  ;;  %3843 = vmatprep.subr.bf16.mxu0 %v6122_v11 }
 0xea0   :  { %3832 = vmatprep.mubr.bf16.mxu1 %v5300_v0  ;;  %3873 = vmatprep.mubr.bf16.mxu0 %v5300_v0 }
 0xea2   :  { %3803 = vmatpush1.bf16.msra.mxu1 %v6126_v22  ;;  %3844 = vmatpush1.bf16.msra.mxu0 %v6128_v31 }
 0xea3   :  { %3804 = vmatprep.subr.bf16.mxu1 %v6132_v25  ;;  %3845 = vmatprep.subr.bf16.mxu0 %v6134_v15 }
 0xea6   :  { %3805 = vmatpush1.bf16.msra.mxu1 %v6140_v33  ;;  %3846 = vmatpush1.bf16.msra.mxu0 %v6142_v17 }
 0xea7   :  { %3806 = vmatprep.subr.bf16.mxu1 %v6146_v19  ;;  %3847 = vmatprep.subr.bf16.mxu0 %v6148_v35 }
 0xeaa   :  { %3807 = vmatpush1.bf16.msra.mxu1 %v6152_v12  ;;  %3848 = vmatpush1.bf16.msra.mxu0 %v6154_v21 }
 0xeab   :  { %3808 = vmatprep.subr.bf16.mxu1 %v6158_v9  ;;  %3849 = vmatprep.subr.bf16.mxu0 %v6160_v41 }
 0xeae   :  { %3809 = vmatpush1.bf16.msra.mxu1 %v6164_v42  ;;  %3850 = vmatpush1.bf16.msra.mxu0 %v6166_v44 }
 0xeaf   :  { %3810 = vmatprep.subr.bf16.mxu1 %v6170_v45  ;;  %3851 = vmatprep.subr.bf16.mxu0 %v6172_v46 }
 0xeb2   :  { %3811 = vmatpush1.bf16.msra.mxu1 %v6176_v30  ;;  %3852 = vmatpush1.bf16.msra.mxu0 %v6178_v47 }
 0xeb3   :  { %3812 = vmatprep.subr.bf16.mxu1 %v6182_v48  ;;  %3853 = vmatprep.subr.bf16.mxu0 %v6184_v27 }
 0xeb6   :  { %3813 = vmatpush1.bf16.msra.mxu1 %v6188_v37  ;;  %3854 = vmatpush1.bf16.msra.mxu0 %v6190_v43 }
 0xeb7   :  { %3814 = vmatprep.subr.bf16.mxu1 %v6194_v36  ;;  %3855 = vmatprep.subr.bf16.mxu0 %v6196_v49 }
 0xeba   :  { %3815 = vmatpush1.bf16.msra.mxu1 %v6200_v61  ;;  %3856 = vmatpush1.bf16.msra.mxu0 %v6202_v62 }
 0xebb   :  { %3926 = vmatprep.subr.bf16.mxu1 %v6100_v40  ;;  %3967 = vmatprep.subr.bf16.mxu0 %v6102_v60 }
 0xf70   :  { %v3708_v39 = vpop.f32.mrb[64].mxu1  ;;  %v3749_v57 = vpop.f32.mrb[72].mxu0 }
 0xf71   :  { %v3710_v26 = vpop.f32.mrb[65].mxu1  ;;  %v3751_v8 = vpop.f32.mrb[73].mxu0 }
 0xf72   :  { %v3760_v6 = vcombine.low %v3708_v39, %v3710_v26  ;;  %v3761_v3 = vcombine.low %v3749_v57, %v3751_v8  ;;  %v3712_v7 = vpop.f32.mrb[66].mxu1  ;;  %v3753_v24 = vpop.f32.mrb[74].mxu0 }
 0xf73   :  { %v3713_v34 = vpop.f32.mrb[67].mxu1  ;;  %v3754_v56 = vpop.f32.mrb[75].mxu0 }
 0xf74   :  { %v3768_v51 = vrot.slane %v3760_v6, %v5502_v1  ;;  %v3775_v32 = vrot.slane %v3761_v3, %v5502_v1 }
 0xf76   :  { %v3776_v10 = vcombine.low %v3768_v51, %v3775_v32 }
 0xf78   :  { %v3778_v63 = vadd.f32 %v3776_v10, %v6626_v13 }
 0xf7a   :  { %v4604_v14 = vmul.f32 -1.442695, %v3778_v63  ;;  %v3786_v29 = vrot.slane %v3778_v63, 6 }
 0xf7c   :  { %5073 = vpow2.f32 %v4604_v14 }
 0xf86   :  { %v5074_v50 = vpop.eup %5073 }
 0xf87   :  { %v3782_v58 = vadd.f32 1.0, %v5074_v50 }
 0xf89   :  { %5075 = vrcp.f32 %v3782_v58 }
 0xf8a   :  { %5077 = vtanh.f32 %v3786_v29 }
 0xf93   :  { %v5076_v53 = vpop.eup %5075 }
 0xf94   :  { %v3790_v54 = vrot.slane %v5076_v53, 2  ;;  %v5078_v20 = vpop.eup %5077  ;;  %v3796_v26 = vrot.slane %v5076_v53, 4 }
 0xf95   :  { %v3793_v55 = vmul.f32 %v5078_v20, %v5076_v53 }
 0xf96   :  { %v3792_v39 = vmul.f32 %v3790_v54, %v6385_v5 }
 0xf98   :  { %v6428_v57 = vadd.f32 %v3793_v55, %v3792_v39 }
 0xf9a   :  { %5079 = vtanh.f32 %v6428_v57 }
 0xfa4   :  { %v5080_v2 = vpop.eup %5079 }
 0xfa5   :  { %v3798_v52 = vmul.f32 %v5080_v2, %v3796_v26 }
 0xfa7   :  { %v3799_v8 = vpack.c.bf16 %v3798_v52, %v3798_v52 }
 0xfa9   :  { %3833 = vmatmul.mubr.bf16.vlgmr.msra.gmra.mrb[68].mxu1 %v3799_v8  ;;  %3874 = vmatmul.mubr.bf16.vlgmr.msra.gmra.mrb[76].mxu0 %v3799_v8 }
 0xfaa   :  { %3927 = vmatpush1.bf16.msra.mxu1 %v6115_v38  ;;  %3968 = vmatpush1.bf16.msra.mxu0 %v6117_v18 }
 0xfab   :  { %3928 = vmatprep.subr.bf16.mxu1 %v6120_v59  ;;  %3969 = vmatprep.subr.bf16.mxu0 %v6122_v11 }
 0xfac   :  { %3958 = vmatprep.mubr.bf16.mxu1 %v5300_v0  ;;  %3999 = vmatprep.mubr.bf16.mxu0 %v5300_v0 }
 0xfae   :  { %3929 = vmatpush1.bf16.msra.mxu1 %v6126_v22  ;;  %3970 = vmatpush1.bf16.msra.mxu0 %v6128_v31 }
 0xfaf   :  { %3930 = vmatprep.subr.bf16.mxu1 %v6132_v25  ;;  %3971 = vmatprep.subr.bf16.mxu0 %v6134_v15 }
 0xfb2   :  { %3931 = vmatpush1.bf16.msra.mxu1 %v6140_v33  ;;  %3972 = vmatpush1.bf16.msra.mxu0 %v6142_v17 }
 0xfb3   :  { %3932 = vmatprep.subr.bf16.mxu1 %v6146_v19  ;;  %3973 = vmatprep.subr.bf16.mxu0 %v6148_v35 }
 0xfb6   :  { %3933 = vmatpush1.bf16.msra.mxu1 %v6152_v12  ;;  %3974 = vmatpush1.bf16.msra.mxu0 %v6154_v21 }
 0xfb7   :  { %3934 = vmatprep.subr.bf16.mxu1 %v6158_v9  ;;  %3975 = vmatprep.subr.bf16.mxu0 %v6160_v41 }
 0xfba   :  { %3935 = vmatpush1.bf16.msra.mxu1 %v6164_v42  ;;  %3976 = vmatpush1.bf16.msra.mxu0 %v6166_v44 }
 0xfbb   :  { %3936 = vmatprep.subr.bf16.mxu1 %v6170_v45  ;;  %3977 = vmatprep.subr.bf16.mxu0 %v6172_v46 }
 0xfbe   :  { %3937 = vmatpush1.bf16.msra.mxu1 %v6176_v30  ;;  %3978 = vmatpush1.bf16.msra.mxu0 %v6178_v47 }
 0xfbf   :  { %3938 = vmatprep.subr.bf16.mxu1 %v6182_v48  ;;  %3979 = vmatprep.subr.bf16.mxu0 %v6184_v27 }
 0xfc2   :  { %3939 = vmatpush1.bf16.msra.mxu1 %v6188_v37  ;;  %3980 = vmatpush1.bf16.msra.mxu0 %v6190_v43 }
 0xfc3   :  { %3940 = vmatprep.subr.bf16.mxu1 %v6194_v36  ;;  %3981 = vmatprep.subr.bf16.mxu0 %v6196_v49 }
 0xfc6   :  { %3941 = vmatpush1.bf16.msra.mxu1 %v6200_v61  ;;  %3982 = vmatpush1.bf16.msra.mxu0 %v6202_v62 }
 0xfc7   :  { %4052 = vmatprep.subr.bf16.mxu1 %v6100_v40  ;;  %4093 = vmatprep.subr.bf16.mxu0 %v6102_v60  ;;  %v6627_v40 = vcombine.low %v6278_v28, %v6284_v23 }
0x107c   :  { %v3834_v5 = vpop.f32.mrb[68].mxu1  ;;  %v3875_v6 = vpop.f32.mrb[76].mxu0 }
0x107d   :  { %v3836_v3 = vpop.f32.mrb[69].mxu1  ;;  %v3877_v7 = vpop.f32.mrb[77].mxu0 }
0x107e   :  { %v3886_v24 = vcombine.low %v3834_v5, %v3836_v3  ;;  %v3887_v34 = vcombine.low %v3875_v6, %v3877_v7  ;;  %v3838_v56 = vpop.f32.mrb[70].mxu1  ;;  %v3879_v51 = vpop.f32.mrb[78].mxu0 }
0x107f   :  { %v3839_v32 = vpop.f32.mrb[71].mxu1  ;;  %v3880_v10 = vpop.f32.mrb[79].mxu0  ;;  %v6628_v56 = vcombine.high %v6278_v28, %v6284_v23 }
0x1080   :  { %v3894_v13 = vrot.slane %v3886_v24, %v5502_v1  ;;  %v3901_v63 = vrot.slane %v3887_v34, %v5502_v1 }
0x1082   :  { %v3902_v14 = vcombine.low %v3894_v13, %v3901_v63 }
0x1084   :  { %v3904_v50 = vadd.f32 %v3902_v14, %v6627_v40 }
0x1086   :  { %v4605_v60 = vmul.f32 -1.442695, %v3904_v50  ;;  %v3912_v53 = vrot.slane %v3904_v50, 6 }
0x1088   :  { %5081 = vpow2.f32 %v4605_v60 }
0x1092   :  { %v5082_v58 = vpop.eup %5081 }
0x1093   :  { %v3908_v29 = vadd.f32 1.0, %v5082_v58 }
0x1095   :  { %5083 = vrcp.f32 %v3908_v29 }
0x1096   :  { %5085 = vtanh.f32 %v3912_v53 }
0x109f   :  { %v5084_v54 = vpop.eup %5083 }
0x10a0   :  { %v3916_v20 = vrot.slane %v5084_v54, 2  ;;  %v5086_v55 = vpop.eup %5085  ;;  %v3922_v52 = vrot.slane %v5084_v54, 4 }
0x10a1   :  { %v3919_v39 = vmul.f32 %v5086_v55, %v5084_v54  ;;  %v5142_v55 = vld [vmem:[#allocation10 + $0x8] ss:$16 sps:$4 sm:$0xff]  }
0x10a2   :  { %v3918_v26 = vmul.f32 %v3916_v20, %v6428_v57  ;;  %v5141_v20 = vld [vmem:[#allocation10] ss:$16 sps:$4 sm:$0xff]  }
0x10a4   :  { %v6471_v2 = vadd.f32 %v3919_v39, %v3918_v26  ;;  %v5143_v39 = vld [vmem:[#allocation10 + $0x24] ss:$16 sps:$4 sm:$0xff]   ;;  %v5144_v26 = vld [vmem:[#allocation10 + $0x2c] ss:$16 sps:$4 sm:$0xff]  }
0x10a6   :  { %5087 = vtanh.f32 %v6471_v2 }
0x10b0   :  { %v5088_v8 = vpop.eup %5087 }
0x10b1   :  { %v3924_v5 = vmul.f32 %v5088_v8, %v3922_v52  ;;  %v5146_v52 = vld [vmem:[#allocation10 + $0x28] ss:$16 sps:$4 sm:$0xff]   ;;  %v5147_v8 = vld [vmem:[#allocation10 + $0x44] ss:$16 sps:$4 sm:$0xff]  }
0x10b3   :  { %v3925_v6 = vpack.c.bf16 %v3924_v5, %v3924_v5  ;;  %v5148_v5 = vld [vmem:[#allocation10 + $0x4c] ss:$16 sps:$4 sm:$0xff]  }
0x10b5   :  { %3959 = vmatmul.mubr.bf16.vlgmr.msra.gmra.mrb[72].mxu1 %v3925_v6  ;;  %4000 = vmatmul.mubr.bf16.vlgmr.msra.gmra.mrb[80].mxu0 %v3925_v6  ;;  %v5149_v6 = vld [vmem:[#allocation10 + $0x40] ss:$16 sps:$4 sm:$0xff]  }
0x10b6   :  { %4053 = vmatpush1.bf16.msra.mxu1 %v6115_v38  ;;  %4094 = vmatpush1.bf16.msra.mxu0 %v6117_v18  ;;  %v5139_v38 = vld [vmem:[#allocation10 + $0x4] ss:$16 sps:$4 sm:$0xff]   ;;  %v5140_v18 = vld [vmem:[#allocation10 + $0xc] ss:$16 sps:$4 sm:$0xff]  }
0x10b7   :  { %4054 = vmatprep.subr.bf16.mxu1 %v6120_v59  ;;  %4095 = vmatprep.subr.bf16.mxu0 %v6122_v11 }
0x10b8   :  { %4084 = vmatprep.mubr.bf16.mxu1 %v5300_v0  ;;  %4125 = vmatprep.mubr.bf16.mxu0 %v5300_v0 }
0x10ba   :  { %4055 = vmatpush1.bf16.msra.mxu1 %v6126_v22  ;;  %4096 = vmatpush1.bf16.msra.mxu0 %v6128_v31 }
0x10bb   :  { %4056 = vmatprep.subr.bf16.mxu1 %v6132_v25  ;;  %4097 = vmatprep.subr.bf16.mxu0 %v6134_v15 }
0x10be   :  { %4057 = vmatpush1.bf16.msra.mxu1 %v6140_v33  ;;  %4098 = vmatpush1.bf16.msra.mxu0 %v6142_v17 }
0x10bf   :  { %4058 = vmatprep.subr.bf16.mxu1 %v6146_v19  ;;  %4099 = vmatprep.subr.bf16.mxu0 %v6148_v35 }
0x10c2   :  { %4059 = vmatpush1.bf16.msra.mxu1 %v6152_v12  ;;  %4100 = vmatpush1.bf16.msra.mxu0 %v6154_v21 }
0x10c3   :  { %4060 = vmatprep.subr.bf16.mxu1 %v6158_v9  ;;  %4101 = vmatprep.subr.bf16.mxu0 %v6160_v41 }
0x10c6   :  { %4061 = vmatpush1.bf16.msra.mxu1 %v6164_v42  ;;  %4102 = vmatpush1.bf16.msra.mxu0 %v6166_v44 }
0x10c7   :  { %4062 = vmatprep.subr.bf16.mxu1 %v6170_v45  ;;  %4103 = vmatprep.subr.bf16.mxu0 %v6172_v46 }
0x10ca   :  { %4063 = vmatpush1.bf16.msra.mxu1 %v6176_v30  ;;  %4104 = vmatpush1.bf16.msra.mxu0 %v6178_v47 }
0x10cb   :  { %4064 = vmatprep.subr.bf16.mxu1 %v6182_v48  ;;  %4105 = vmatprep.subr.bf16.mxu0 %v6184_v27 }
0x10ce   :  { %4065 = vmatpush1.bf16.msra.mxu1 %v6188_v37  ;;  %4106 = vmatpush1.bf16.msra.mxu0 %v6190_v43 }
0x10cf   :  { %4066 = vmatprep.subr.bf16.mxu1 %v6194_v36  ;;  %4107 = vmatprep.subr.bf16.mxu0 %v6196_v49 }
0x10d2   :  { %4067 = vmatpush1.bf16.msra.mxu1 %v6200_v61  ;;  %4108 = vmatpush1.bf16.msra.mxu0 %v6202_v62 }
0x10d3   :  { %4178 = vmatprep.subr.bf16.mxu1 %v5139_v38  ;;  %4219 = vmatprep.subr.bf16.mxu0 %v5140_v18  ;;  %v5150_v38 = vld [vmem:[#allocation10 + $0x48] ss:$16 sps:$4 sm:$0xff]  }
0x1188   :  { %v3960_v59 = vpop.f32.mrb[72].mxu1  ;;  %v4001_v11 = vpop.f32.mrb[80].mxu0 }
0x1189   :  { %v3962_v22 = vpop.f32.mrb[73].mxu1  ;;  %v4003_v31 = vpop.f32.mrb[81].mxu0 }
0x118a   :  { %v4012_v25 = vcombine.low %v3960_v59, %v3962_v22  ;;  %v4013_v15 = vcombine.low %v4001_v11, %v4003_v31  ;;  %v3964_v33 = vpop.f32.mrb[74].mxu1  ;;  %v4005_v17 = vpop.f32.mrb[82].mxu0 }
0x118b   :  { %v3965_v57 = vpop.f32.mrb[75].mxu1  ;;  %v4006_v3 = vpop.f32.mrb[83].mxu0 }
0x118c   :  { %v4020_v7 = vrot.slane %v4012_v25, %v5502_v1  ;;  %v4027_v24 = vrot.slane %v4013_v15, %v5502_v1  ;;  %v4977_v57 = vld [vmem:[%s6607_s10] sm:$0xff]   ;;  %v4978_v3 = vld [vmem:[%s6607_s10 + $0x8] sm:$0xff]  }
0x118e   :  { %v4028_v34 = vcombine.low %v4020_v7, %v4027_v24  ;;  %v4979_v7 = vld [vmem:[%s6607_s10 + $0x10] sm:$0xff]   ;;  %v4980_v24 = vld [vmem:[%s6607_s10 + $0x18] sm:$0xff]  }
0x1190   :  { %v4030_v51 = vadd.f32 %v4028_v34, %v6628_v56  ;;  %v4981_v34 = vld [vmem:[%s6607_s10 + $0x20] sm:$0xff]   ;;  %v4982_v56 = vld [vmem:[%s6607_s10 + $0x28] sm:$0xff]  }
0x1192   :  { %v4606_v32 = vmul.f32 -1.442695, %v4030_v51  ;;  %v4038_v63 = vrot.slane %v4030_v51, 6  ;;  %v4983_v51 = vld [vmem:[%s6607_s10 + $0x30] sm:$0xff]  }
0x1194   :  { %5089 = vpow2.f32 %v4606_v32  ;;  %v4984_v32 = vld [vmem:[%s6607_s10 + $0x38] sm:$0xff]  }
0x119e   :  { %v5090_v10 = vpop.eup %5089 }
0x119f   :  { %v4034_v13 = vadd.f32 1.0, %v5090_v10 }
0x11a1   :  { %5091 = vrcp.f32 %v4034_v13 }
0x11a2   :  { %5093 = vtanh.f32 %v4038_v63 }
0x11ab   :  { %v5092_v14 = vpop.eup %5091 }
0x11ac   :  { %v4042_v40 = vrot.slane %v5092_v14, 2  ;;  %v5094_v50 = vpop.eup %5093  ;;  %v4048_v53 = vrot.slane %v5092_v14, 4 }
0x11ad   :  { %v4045_v60 = vmul.f32 %v5094_v50, %v5092_v14 }
0x11ae   :  { %v4044_v58 = vmul.f32 %v4042_v40, %v6471_v2  ;;  %v5145_v2 = vld [vmem:[#allocation10 + $0x20] ss:$16 sps:$4 sm:$0xff]  }
0x11b0   :  { %v6512_v29 = vadd.f32 %v4045_v60, %v4044_v58 }
0x11b2   :  { %5095 = vtanh.f32 %v6512_v29 }
0x11bc   :  { %v5096_v28 = vpop.eup %5095 }
0x11bd   :  { %v4050_v23 = vmul.f32 %v5096_v28, %v4048_v53 }
0x11bf   :  { %v4051_v54 = vpack.c.bf16 %v4050_v23, %v4050_v23 }
0x11c1   :  { %4085 = vmatmul.mubr.bf16.vlgmr.msra.gmra.mrb[76].mxu1 %v4051_v54  ;;  %4126 = vmatmul.mubr.bf16.vlgmr.msra.gmra.mrb[84].mxu0 %v4051_v54 }
0x11c2   :  { %4179 = vmatpush1.bf16.msra.mxu1 %v5141_v20  ;;  %4220 = vmatpush1.bf16.msra.mxu0 %v5142_v55  ;;  %v6631_v20 = vcombine.high %v6281_v16, %v6287_v4 }
0x11c3   :  { %4180 = vmatprep.subr.bf16.mxu1 %v5143_v39  ;;  %4221 = vmatprep.subr.bf16.mxu0 %v5144_v26 }
0x11c4   :  { %4210 = vmatprep.mubr.bf16.mxu1 %v5300_v0  ;;  %4251 = vmatprep.mubr.bf16.mxu0 %v5300_v0  ;;  %v6629_v0 = vmov 0.0  }
0x11c6   :  { %4181 = vmatpush1.bf16.msra.mxu1 %v5145_v2  ;;  %4222 = vmatpush1.bf16.msra.mxu0 %v5146_v52 }
0x11c7   :  { %4182 = vmatprep.subr.bf16.mxu1 %v5147_v8  ;;  %4223 = vmatprep.subr.bf16.mxu0 %v5148_v5 }
0x11ca   :  { %4183 = vmatpush1.bf16.msra.mxu1 %v5149_v6  ;;  %4224 = vmatpush1.bf16.msra.mxu0 %v5150_v38 }
0x11cb   :  { %4184 = vmatprep.subr.bf16.mxu1 %v6146_v19  ;;  %4225 = vmatprep.subr.bf16.mxu0 %v6148_v35 }
0x11ce   :  { %4185 = vmatpush1.bf16.msra.mxu1 %v6152_v12  ;;  %4226 = vmatpush1.bf16.msra.mxu0 %v6154_v21 }
0x11cf   :  { %4186 = vmatprep.subr.bf16.mxu1 %v6158_v9  ;;  %4227 = vmatprep.subr.bf16.mxu0 %v6160_v41 }
0x11d2   :  { %4187 = vmatpush1.bf16.msra.mxu1 %v6164_v42  ;;  %4228 = vmatpush1.bf16.msra.mxu0 %v6166_v44 }
0x11d3   :  { %4188 = vmatprep.subr.bf16.mxu1 %v6170_v45  ;;  %4229 = vmatprep.subr.bf16.mxu0 %v6172_v46 }
0x11d6   :  { %4189 = vmatpush1.bf16.msra.mxu1 %v6176_v30  ;;  %4230 = vmatpush1.bf16.msra.mxu0 %v6178_v47 }
0x11d7   :  { %4190 = vmatprep.subr.bf16.mxu1 %v6182_v48  ;;  %4231 = vmatprep.subr.bf16.mxu0 %v6184_v27  ;;  %v6630_v27 = vcombine.low %v6281_v16, %v6287_v4  ;;  %v4609_v16 = vld [vmem:[%s6608_s11] ss:$0 sm:$0xff] }
0x11da   :  { %4191 = vmatpush1.bf16.msra.mxu1 %v6188_v37  ;;  %4232 = vmatpush1.bf16.msra.mxu0 %v6190_v43 }
0x11db   :  { %4192 = vmatprep.subr.bf16.mxu1 %v6194_v36  ;;  %4233 = vmatprep.subr.bf16.mxu0 %v6196_v49 }
0x11de   :  { %4193 = vmatpush1.bf16.msra.mxu1 %v6200_v61  ;;  %4234 = vmatpush1.bf16.msra.mxu0 %v6202_v62 }
0x11df   :  { %4721 = vmatprep.subr.bf16.mxu1 %v6629_v0 }
0x1294   :  { %v4086_v19 = vpop.f32.mrb[76].mxu1  ;;  %v4127_v35 = vpop.f32.mrb[84].mxu0 }
0x1295   :  { %v4088_v12 = vpop.f32.mrb[77].mxu1  ;;  %v4129_v21 = vpop.f32.mrb[85].mxu0 }
0x1296   :  { %v4138_v9 = vcombine.low %v4086_v19, %v4088_v12  ;;  %v4139_v41 = vcombine.low %v4127_v35, %v4129_v21  ;;  %v4090_v42 = vpop.f32.mrb[78].mxu1  ;;  %v4131_v44 = vpop.f32.mrb[86].mxu0 }
0x1297   :  { %v4091_v45 = vpop.f32.mrb[79].mxu1  ;;  %v4132_v46 = vpop.f32.mrb[87].mxu0 }
0x1298   :  { %v4146_v30 = vrot.slane %v4138_v9, %v5502_v1  ;;  %v4153_v47 = vrot.slane %v4139_v41, %v5502_v1 }
0x129a   :  { %v4154_v48 = vcombine.low %v4146_v30, %v4153_v47 }
0x129c   :  { %v4156_v37 = vadd.f32 %v4154_v48, %v6630_v27 }
0x129e   :  { %v4607_v43 = vmul.f32 -1.442695, %v4156_v37  ;;  %v4164_v61 = vrot.slane %v4156_v37, 6 }
0x12a0   :  { %5097 = vpow2.f32 %v4607_v43 }
0x12aa   :  { %v5098_v36 = vpop.eup %5097 }
0x12ab   :  { %v4160_v49 = vadd.f32 1.0, %v5098_v36 }
0x12ad   :  { %5099 = vrcp.f32 %v4160_v49 }
0x12ae   :  { %5101 = vtanh.f32 %v4164_v61 }
0x12b7   :  { %v5100_v62 = vpop.eup %5099 }
0x12b8   :  { %v4168_v18 = vrot.slane %v5100_v62, 2  ;;  %v5102_v59 = vpop.eup %5101  ;;  %v4174_v25 = vrot.slane %v5100_v62, 4 }
0x12b9   :  { %v4171_v11 = vmul.f32 %v5102_v59, %v5100_v62 }
0x12ba   :  { %v4170_v22 = vmul.f32 %v4168_v18, %v6512_v29 }
0x12bc   :  { %v4172_v31 = vadd.f32 %v4171_v11, %v4170_v22 }
0x12be   :  { %5103 = vtanh.f32 %v4172_v31 }
0x12c8   :  { %v5104_v15 = vpop.eup %5103 }
0x12c9   :  { %v4176_v33 = vmul.f32 %v5104_v15, %v4174_v25 }
0x12cb   :  { %v4177_v17 = vpack.c.bf16 %v4176_v33, %v4176_v33 }
0x12cd   :  { %4211 = vmatmul.mubr.bf16.vlgmr.msra.gmra.mrb[80].mxu1 %v4177_v17  ;;  %4252 = vmatmul.mubr.bf16.vlgmr.msra.gmra.mrb[88].mxu0 %v4177_v17 }
0x12ce   :  { %4737 = vmatprep.mubr.msk.bf16.mxu1 %vm5303_vm10, %v6629_v0  ;;  %4722 = vmatpush3.bf16.msra.mxu1 %v4977_v57 }
0x12cf   :  { %4723 = vmatprep.subr.bf16.mxu1 %v6629_v0 }
0x12d2   :  { %4724 = vmatpush3.bf16.msra.mxu1 %v4978_v3 }
0x12d3   :  { %4725 = vmatprep.subr.bf16.mxu1 %v6629_v0 }
0x12d6   :  { %4726 = vmatpush3.bf16.msra.mxu1 %v4979_v7 }
0x12d7   :  { %4727 = vmatprep.subr.bf16.mxu1 %v6629_v0 }
0x12da   :  { %4728 = vmatpush3.bf16.msra.mxu1 %v4980_v24 }
0x12db   :  { %4729 = vmatprep.subr.bf16.mxu1 %v6629_v0 }
0x12de   :  { %4730 = vmatpush3.bf16.msra.mxu1 %v4981_v34 }
0x12df   :  { %4731 = vmatprep.subr.bf16.mxu1 %v6629_v0 }
0x12e2   :  { %4732 = vmatpush3.bf16.msra.mxu1 %v4982_v56 }
0x12e3   :  { %4733 = vmatprep.subr.bf16.mxu1 %v6629_v0 }
0x12e6   :  { %4734 = vmatpush3.bf16.msra.mxu1 %v4983_v51 }
0x12e7   :  { %4735 = vmatprep.subr.bf16.mxu1 %v6629_v0 }
0x12ea   :  { %4736 = vmatpush3.bf16.msra.mxu1 %v4984_v32 }
0x13a0   :  { %v4212_v10 = vpop.f32.mrb[80].mxu1  ;;  %v4253_v13 = vpop.f32.mrb[88].mxu0 }
0x13a1   :  { %v4214_v63 = vpop.f32.mrb[81].mxu1  ;;  %v4255_v14 = vpop.f32.mrb[89].mxu0 }
0x13a2   :  { %v4264_v40 = vcombine.low %v4212_v10, %v4214_v63  ;;  %v4265_v50 = vcombine.low %v4253_v13, %v4255_v14  ;;  %v4216_v60 = vpop.f32.mrb[82].mxu1  ;;  %v4257_v58 = vpop.f32.mrb[90].mxu0 }
0x13a3   :  { %v4217_v29 = vpop.f32.mrb[83].mxu1  ;;  %v4258_v53 = vpop.f32.mrb[91].mxu0 }
0x13a4   :  { %v4272_v28 = vrot.slane %v4264_v40, %v5502_v1  ;;  %v4279_v23 = vrot.slane %v4265_v50, %v5502_v1 }
0x13a6   :  { %v4280_v54 = vcombine.low %v4272_v28, %v4279_v23 }
0x13a8   :  { %v4282_v55 = vadd.f32 %v4280_v54, %v6631_v20 }
0x13aa   :  { %v4608_v39 = vmul.f32 -1.442695, %v4282_v55  ;;  %v4290_v52 = vrot.slane %v4282_v55, 6 }
0x13ac   :  { %5105 = vpow2.f32 %v4608_v39 }
0x13b6   :  { %v5106_v26 = vpop.eup %5105 }
0x13b7   :  { %v4286_v2 = vadd.f32 1.0, %v5106_v26 }
0x13b9   :  { %5107 = vrcp.f32 %v4286_v2 }
0x13ba   :  { %5109 = vtanh.f32 %v4290_v52 }
0x13c3   :  { %v5108_v8 = vpop.eup %5107 }
0x13c4   :  { %v4294_v5 = vrot.slane %v5108_v8, 2  ;;  %v5110_v6 = vpop.eup %5109  ;;  %v4300_v1 = vrot.slane %v5108_v8, 4 }
0x13c5   :  { %v4297_v38 = vmul.f32 %v5110_v6, %v5108_v8 }
0x13c6   :  { %v4296_v0 = vmul.f32 %v4294_v5, %v4172_v31 }
0x13c8   :  { %v4298_v19 = vadd.f32 %v4297_v38, %v4296_v0 }
0x13ca   :  { %5111 = vtanh.f32 %v4298_v19 }
0x13d4   :  { %v5112_v35 = vpop.eup %5111 }
0x13d5   :  { %v4302_v12 = vmul.f32 %v5112_v35, %v4300_v1 }
0x13d7   :  { %v4303_v21 = vpack.c.bf16 %v4302_v12, %v4302_v12 }
0x13d9   :  { %4738 = vmatmul.mubr.bf16.vlgmr.msra.gmra.mrb[84].mxu1 %v4303_v21 }
0x14ac   :  { %v4409_v4 = vpop.f32.mrb[84].mxu1 }
0x14ad   :  { %v4410_v9 = vadd.f32 %v4609_v16, %v4409_v4  ;;  %v4739_v41 = vpop.f32.mrb[85].mxu1 }
0x14ae   :  { %v4412_v42 = vpop.f32.mrb[86].mxu1 }
0x14af   :  { %4415 = vst [vmem:[#allocation11] sm:$0x3] %v4410_v9  ;;  %v4740_v44 = vpop.f32.mrb[87].mxu1 }
0x14b0   :  { %5272 = shalt.err (!%p5269_p2)
}
0x14b1   :  { %s5273_s11 = scalar_lea.hbm %s6609_s12, 32 }
0x14b2   :  { %p5274_p3 = scmp.ne.s32.totalorder %s6609_s12, %s5273_s11  ;;  %p5277_p4 = scmp.lt.u32.totalorder %s5273_s11, %s6609_s12 }
0x14b4   :  { %p5279_p5 = pnand %p5277_p4, %p5274_p3 }
0x14b6   :  { %5282 = shalt.err (!%p5279_p5)
}
0x14b7   :  { %4425 = dma.vmem_to_hbm [thread:$0]  %s4423_s25, 32, %s6609_s12, [#allocation4]  }
0x14b8   :  { %5289 = dma.done.wait [#allocation4], 32  }
0x14b9   :  { %5290 = vsyncadd [#allocation4], 4294967264 }
0x14ba   :  { %4429 = vsyncpa [#allocation3], 1 }
0x14bb   :  { %4430 = vsyncpa [#allocation6], 1 }
0x14bc   :  { %4431 = vsyncpa [#allocation9], 1 }
0x14bd   :  { %4432 = vsyncpa [#allocation4], 1 }

</bundles_post_ra>
